<compile_context>
chip_gen: v7x
topology: tpu7x:2x2x1
jax: 0.10.0
libtpu: 0.0.40
codegen_flags: <defaults>
</compile_context>

<pallas_src>
import functools

import numpy as np

import jax
import jax.numpy as jnp
from jax import lax
from jax.experimental import pallas as pl
from jax.experimental.pallas import tpu as pltpu


def _round_up(x, m):
    return ((x + m - 1) // m) * m


def _bilstm_kernel(mask_ref, xf_ref, xb_ref, wih_f_ref, wih_b_ref, wblk_ref,
                   bias_f_ref, bias_b_ref, outf_ref, outb_ref,
                   gxf_ref, gxb_ref, h_ref, c_ref):
    """One (batch-group, time-tile) grid step of the fused bi-LSTM.

    Grid = (batch_groups, time_tiles): axis 0 'parallel', axis 1 'arbitrary'.
    Forward walks time tiles left->right (tile t); backward walks them
    right->left via reversed index_maps (tile nT-1-t), so ONE sequential grid
    pass covers both directions.

    mask_ref : (tT, Bp, 1)    f32   validity of the *backward* tile's times
    xf_ref   : (tT*Bp, E)     bf16  forward  time tile (time-major, flattened)
    xb_ref   : (tT*Bp, E)     bf16  backward time tile
    wih_*    : (E, 4*Hp)      bf16  gate-padded input projections
    wblk_ref : (2*Hp, 8*Hp)   bf16  block-diagonal [Whh_f 0; 0 Whh_b]
    bias_*   : (1, 4*Hp)      f32   b_ih + b_hh, gate-padded
    out*_ref : (tT, Bp, Hp)   f32   per-direction hidden states of this tile
    gx*_ref  : (tT*Bp, 4*Hp)  f32   scratch: hoisted input projections
    h_ref    : (Bp, 2*Hp)     f32   carried [h_fwd | h_bwd] across time tiles
    c_ref    : (Bp, 2*Hp)     f32   carried [c_fwd | c_bwd] across time tiles
    """
    tT, Bp, _ = mask_ref.shape
    H4 = gxf_ref.shape[-1]
    Hp = H4 // 4

    # Reset the recurrent carry at the first time tile of each batch group.
    @pl.when(pl.program_id(1) == 0)
    def _init():
        h_ref[...] = jnp.zeros_like(h_ref)
        c_ref[...] = jnp.zeros_like(c_ref)

    # (1) Hoisted input projections: one MXU matmul per direction written
    # straight into per-direction scratch (no full-width f32 temp).
    gxf_ref[...] = (jnp.dot(xf_ref[...], wih_f_ref[...],
                            preferred_element_type=jnp.float32)
                    + bias_f_ref[...])
    gxb_ref[...] = (jnp.dot(xb_ref[...], wih_b_ref[...],
                            preferred_element_type=jnp.float32)
                    + bias_b_ref[...])

    def gate_math(g, c):
        i = jax.nn.sigmoid(g[:, 0 * Hp:1 * Hp])
        f = jax.nn.sigmoid(g[:, 1 * Hp:2 * Hp])
        gg = jnp.tanh(g[:, 2 * Hp:3 * Hp])
        o = jax.nn.sigmoid(g[:, 3 * Hp:4 * Hp])
        c_new = f * c + i * gg
        return o * jnp.tanh(c_new), c_new

    # (2) Recurrence: ONE fused block-diagonal matmul per step (256-deep
    # contraction fills the v6e/v7x MXU) + gate math.
    # TODO(synk): keep wblk latched in the MXU across the loop
    # (pltpu.matmul_push_rhs once, matmul_acc_lhs/matmul_pop per step).
    def step(s, carry):
        h_cat, c_cat = carry                          # (Bp, 2Hp) f32 each
        tb = tT - 1 - s                               # backward local time

        g_cat = jnp.dot(h_cat.astype(wblk_ref.dtype), wblk_ref[...],
                        preferred_element_type=jnp.float32)   # (Bp, 8Hp)
        rf = pl.multiple_of(s * Bp, Bp)
        rb = pl.multiple_of(tb * Bp, Bp)
        g_f = g_cat[:, :H4] + gxf_ref[pl.ds(rf, Bp), :]
        g_b = g_cat[:, H4:] + gxb_ref[pl.ds(rb, Bp), :]

        hf, cf = gate_math(g_f, c_cat[:, :Hp])
        hb, cb = gate_math(g_b, c_cat[:, Hp:])

        # Hold the backward state at zero until t < len[b] ==> exact
        # packed-sequence semantics without a reverse gather.  jnp.where is
        # NaN-safe even if padded x slots held non-finite garbage.
        valid = mask_ref[tb] > 0.0                    # (Bp, 1) bool
        hb = jnp.where(valid, hb, 0.0)
        cb = jnp.where(valid, cb, 0.0)

        outf_ref[s] = hf
        outb_ref[tb] = hb
        return (jnp.concatenate([hf, hb], axis=-1),
                jnp.concatenate([cf, cb], axis=-1))

    carry0 = (h_ref[...], c_ref[...])
    h_fin, c_fin = lax.fori_loop(0, tT, step, carry0, unroll=min(8, tT))
    h_ref[...] = h_fin
    c_ref[...] = c_fin


@functools.partial(jax.jit,
                   static_argnames=("T", "B", "t_tile", "batch_splits", "Hp"))
def _bilstm_time_major(x, lens, wih_f, wih_b, w_blk, bias_f, bias_b, *,
                       T, B, t_tile, batch_splits, Hp):
    """(B, T, E) f32 -> (out_fwd, out_bwd), each (T_pad, Bp, Hp) f32."""
    E = x.shape[-1]
    nB = batch_splits
    Bp = _round_up(B, 8 * nB)
    Bpc = Bp // nB                              # batch rows per batch group
    T_pad = _round_up(T, t_tile)
    nT = T_pad // t_tile

    # One relayout pass over x: (B,T,E) f32 -> (nB, T_pad*Bpc, E) bf16,
    # time-major inside each batch group, zero padded.
    # TODO(synk): read straight from the user (B,T,E) layout with a batch-major
    # BlockSpec and do the per-tile relayout in-kernel to drop this HBM pass.
    x_tm = jnp.transpose(x, (1, 0, 2))
    x_tm = jnp.pad(x_tm, ((0, T_pad - T), (0, Bp - B), (0, 0)))
    x_flat = (x_tm.reshape(T_pad, nB, Bpc, E)
              .transpose(1, 0, 2, 3)
              .reshape(nB, T_pad * Bpc, E)
              .astype(jnp.bfloat16))

    lens_p = jnp.pad(lens.astype(jnp.int32), (0, Bp - B))
    mask = (jnp.arange(T_pad, dtype=jnp.int32)[:, None]
            < lens_p[None, :]).astype(jnp.float32)[:, :, None]  # (T_pad,Bp,1)

    def rev(t):
        return nT - 1 - t

    in_specs = [
        pl.BlockSpec((t_tile, Bpc, 1), lambda b, t: (rev(t), b, 0)),       # mask (bwd)
        pl.BlockSpec((None, t_tile * Bpc, E), lambda b, t: (b, t, 0)),     # x fwd
        pl.BlockSpec((None, t_tile * Bpc, E), lambda b, t: (b, rev(t), 0)),# x bwd
        pl.BlockSpec((E, 4 * Hp), lambda b, t: (0, 0)),                    # wih_f
        pl.BlockSpec((E, 4 * Hp), lambda b, t: (0, 0)),                    # wih_b
        pl.BlockSpec((2 * Hp, 8 * Hp), lambda b, t: (0, 0)),               # w_blk
        pl.BlockSpec((1, 4 * Hp), lambda b, t: (0, 0)),                    # bias_f
        pl.BlockSpec((1, 4 * Hp), lambda b, t: (0, 0)),                    # bias_b
    ]
    out_specs = (
        pl.BlockSpec((t_tile, Bpc, Hp), lambda b, t: (t, b, 0)),           # out fwd
        pl.BlockSpec((t_tile, Bpc, Hp), lambda b, t: (rev(t), b, 0)),      # out bwd
    )

    # Scoped-VMEM budget from the actual per-step residency (+2x headroom).
    Er = _round_up(E, 128)
    est = (2 * 2 * t_tile * Bpc * Er * 2          # x fwd+bwd blocks, 2 bufs, bf16
           + 2 * t_tile * Bpc * 128 * 4           # mask block (lane padded)
           + 2 * 2 * t_tile * Bpc * Hp * 4        # out fwd+bwd blocks, 2 bufs
           + 2 * (2 * Er * 4 * Hp * 2             # wih_f + wih_b (bf16)
                  + 2 * Hp * 8 * Hp * 2           # w_blk (bf16)
                  + 2 * 8 * 4 * Hp * 4)           # biases (sublane padded)
           + 2 * t_tile * Bpc * 4 * Hp * 4        # gx scratch (f32)
           + 2 * Bpc * 2 * Hp * 4                 # h/c carry
           + t_tile * Bpc * 4 * Hp * 4)           # matmul/store transient
    vmem_limit = int(min(110 * 2 ** 20, max(16 * 2 ** 20, 2 * est)))

    out_f, out_b = pl.pallas_call(
        _bilstm_kernel,
        out_shape=(jax.ShapeDtypeStruct((T_pad, Bp, Hp), jnp.float32),
                   jax.ShapeDtypeStruct((T_pad, Bp, Hp), jnp.float32)),
        grid_spec=pltpu.PrefetchScalarGridSpec(
            num_scalar_prefetch=0,
            grid=(nB, nT),
            in_specs=in_specs,
            out_specs=out_specs,
            scratch_shapes=[
                pltpu.VMEM((t_tile * Bpc, 4 * Hp), jnp.float32),  # gx fwd
                pltpu.VMEM((t_tile * Bpc, 4 * Hp), jnp.float32),  # gx bwd
                pltpu.VMEM((Bpc, 2 * Hp), jnp.float32),           # h carry
                pltpu.VMEM((Bpc, 2 * Hp), jnp.float32),           # c carry
            ]),
        compiler_params=pltpu.CompilerParams(
            dimension_semantics=("parallel", "arbitrary"),
            vmem_limit_bytes=vmem_limit),
    )(mask, x_flat, x_flat, wih_f, wih_b, w_blk, bias_f, bias_b)
    return out_f, out_b


class LSTMEncoderPallas:
    """Bidirectional LSTM encoder matching AGIF's LSTMEncoder.forward (eval)."""

    def __init__(self, embedding_dim, hidden_dim, dropout_rate, key, *,
                 t_tile=32, batch_splits=1):
        # batch_splits: leading 'parallel' grid axis. Set to 2 on v7x
        # (2 TensorCores/chip) to split the batch across cores; keep 1 on
        # v5e/v6e where the recurrence is latency-bound on a single core.
        self.embedding_dim = embedding_dim
        self.hidden_dim = hidden_dim
        self.dropout_rate = dropout_rate   # identity at inference (eval mode)
        self.t_tile = int(t_tile)
        self.batch_splits = int(batch_splits)

        H = hidden_dim // 2
        self.H = H
        self.Hp = _round_up(max(H, 1), 128)   # 128-lane-aligned gate blocks
        Hp = self.Hp
        E = embedding_dim

        bound = 1.0 / float(H) ** 0.5
        keys = jax.random.split(key, 8)

        def u(k, shape):
            return jax.random.uniform(k, shape, jnp.float32, -bound, bound)

        # Raw PyTorch nn.LSTM parameter shapes (gate order: i, f, g, o).
        self.w_ih_f = u(keys[0], (4 * H, E))
        self.w_hh_f = u(keys[1], (4 * H, H))
        self.b_ih_f = u(keys[2], (4 * H,))
        self.b_hh_f = u(keys[3], (4 * H,))
        self.w_ih_b = u(keys[4], (4 * H, E))
        self.w_hh_b = u(keys[5], (4 * H, H))
        self.b_ih_b = u(keys[6], (4 * H,))
        self.b_hh_b = u(keys[7], (4 * H,))

        # One-time weight prep: transpose, gate-pad to Hp lanes, fuse the two
        # recurrent matrices block-diagonally, bf16-cast for the MXU.
        def pad_ih(w):                          # (4H, E) -> (E, 4Hp)
            out = np.zeros((E, 4 * Hp), np.float32)
            wt = np.asarray(w).T
            for g in range(4):
                out[:, g * Hp:g * Hp + H] = wt[:, g * H:(g + 1) * H]
            return out

        def pad_b(b):                           # (4H,) -> (1, 4Hp)
            out = np.zeros((1, 4 * Hp), np.float32)
            bn = np.asarray(b)
            for g in range(4):
                out[0, g * Hp:g * Hp + H] = bn[g * H:(g + 1) * H]
            return out

        w_blk = np.zeros((2 * Hp, 8 * Hp), np.float32)
        whf = np.asarray(self.w_hh_f).T         # (H, 4H)
        whb = np.asarray(self.w_hh_b).T
        for g in range(4):
            w_blk[:H, g * Hp:g * Hp + H] = whf[:, g * H:(g + 1) * H]
            w_blk[Hp:Hp + H, 4 * Hp + g * Hp:4 * Hp + g * Hp + H] = \
                whb[:, g * H:(g + 1) * H]

        self.wih_f_p = jnp.asarray(pad_ih(self.w_ih_f), jnp.bfloat16)
        self.wih_b_p = jnp.asarray(pad_ih(self.w_ih_b), jnp.bfloat16)
        self.w_blk = jnp.asarray(w_blk, jnp.bfloat16)           # (2Hp, 8Hp)
        self.bias_f_p = jnp.asarray(pad_b(np.asarray(self.b_ih_f)
                                          + np.asarray(self.b_hh_f)))
        self.bias_b_p = jnp.asarray(pad_b(np.asarray(self.b_ih_b)
                                          + np.asarray(self.b_hh_b)))

    @staticmethod
    def _flat_gather_idx(seq_lens):
        lens_np = np.asarray(seq_lens, dtype=np.int64)
        b_idx = np.repeat(np.arange(len(lens_np)), lens_np)
        t_idx = np.concatenate([np.arange(n) for n in lens_np])
        return jnp.asarray(b_idx), jnp.asarray(t_idx)

    def __call__(self, embedded_text, seq_lens):
        # TODO(synk): training-mode dropout not reproduced (PyTorch RNG);
        # eval-mode dropout is identity.
        B, T, _ = embedded_text.shape
        lens = jnp.asarray(seq_lens, jnp.int32)
        t_tile = max(1, min(self.t_tile, T))
        out_f, out_b = _bilstm_time_major(
            embedded_text, lens, self.wih_f_p, self.wih_b_p, self.w_blk,
            self.bias_f_p, self.bias_b_p,
            T=T, B=B, t_tile=t_tile, batch_splits=self.batch_splits,
            Hp=self.Hp)
        # Gather valid (t, b) rows straight from the time-major padded outputs
        # (no padded-array transpose / concat); concat only the gathered rows.
        b_idx, t_idx = self._flat_gather_idx(seq_lens)
        h_f = out_f[t_idx, b_idx, :self.H]
        h_b = out_b[t_idx, b_idx, :self.H]
        return jnp.concatenate([h_f, h_b], axis=-1)   # (total_word_num, 2H)

    # ---------------- pure-JAX reference (independent semantics check) -----
    def reference(self, embedded_text, seq_lens):
        """Packed-sequence semantics via per-sequence reversal (independent of
        the kernel's masked-hold trick).  Same precision policy as the kernel:
        bf16 matmul operands, f32 accumulation / state."""
        B, T, E = embedded_text.shape
        H = self.H
        lens = jnp.asarray(seq_lens, jnp.int32)
        x = embedded_text.astype(jnp.bfloat16)

        def run_dir(x_bte, w_ih, w_hh, b_ih, b_hh):
            wih = w_ih.T.astype(jnp.bfloat16)             # (E, 4H)
            whh = w_hh.T.astype(jnp.bfloat16)             # (H, 4H)
            bias = (b_ih + b_hh)[None, :]                 # (1, 4H) f32
            gx = jnp.dot(x_bte.reshape(B * T, E), wih,
                         preferred_element_type=jnp.float32)
            gx = gx.reshape(B, T, 4 * H) + bias
            gx_tm = jnp.transpose(gx, (1, 0, 2))          # (T, B, 4H)

            def step(carry, g_x):
                h, c = carry
                g = g_x + jnp.dot(h.astype(jnp.bfloat16), whh,
                                  preferred_element_type=jnp.float32)
                i = jax.nn.sigmoid(g[:, 0:H])
                f = jax.nn.sigmoid(g[:, H:2 * H])
                gg = jnp.tanh(g[:, 2 * H:3 * H])
                o = jax.nn.sigmoid(g[:, 3 * H:4 * H])
                c = f * c + i * gg
                h = o * jnp.tanh(c)
                return (h, c), h

            z = jnp.zeros((B, H), jnp.float32)
            _, hs = lax.scan(step, (z, z), gx_tm)
            return jnp.transpose(hs, (1, 0, 2))           # (B, T, H)

        h_fwd = run_dir(x, self.w_ih_f, self.w_hh_f, self.b_ih_f, self.b_hh_f)

        t_idx = jnp.arange(T)[None, :]
        rev_idx = jnp.clip(lens[:, None] - 1 - t_idx, 0, T - 1)   # (B, T)
        x_rev = jnp.take_along_axis(x, rev_idx[:, :, None], axis=1)
        h_bwd_rev = run_dir(x_rev, self.w_ih_b, self.w_hh_b,
                            self.b_ih_b, self.b_hh_b)
        h_bwd = jnp.take_along_axis(h_bwd_rev, rev_idx[:, :, None], axis=1)

        padded = jnp.concatenate([h_fwd, h_bwd], axis=-1)
        b_idx, tt = self._flat_gather_idx(seq_lens)
        return padded[b_idx, tt]


if __name__ == "__main__":
    key = jax.random.PRNGKey(0)
    k_params, k_data = jax.random.split(key)

    B, T, E, HIDDEN = 2, 8, 32, 32
    seq_lens = [8, 5]  # descending, as pack_padded_sequence requires

    embedded_text = jax.random.normal(k_data, (B, T, E), jnp.float32)

    # Config 1: two time tiles (exercises the carried state across the
    # 'arbitrary' grid axis and the reversed backward index maps).
    enc = LSTMEncoderPallas(E, HIDDEN, 0.4, k_params, t_tile=4, batch_splits=1)
    out = jax.block_until_ready(enc(embedded_text, seq_lens))
    assert out.shape == (sum(seq_lens), HIDDEN), out.shape

    ref = enc.reference(embedded_text, seq_lens)
    max_err = float(jnp.max(jnp.abs(out - ref)))
    assert max_err < 1e-2, f"mismatch vs reference (tiled-T): {max_err}"

    # Config 2: batch split across two 'parallel' grid groups (v7x path);
    # identical weights, so it must match the same reference.
    enc2 = LSTMEncoderPallas(E, HIDDEN, 0.4, k_params, t_tile=8,
                             batch_splits=2)
    out2 = jax.block_until_ready(enc2(embedded_text, seq_lens))
    max_err2 = float(jnp.max(jnp.abs(out2 - ref)))
    assert max_err2 < 1e-2, f"mismatch vs reference (batch-split): {max_err2}"

    print("KERNEL_OK")
</pallas_src>

<mosaic_0001>
module attributes {stable_mosaic.version = 11 : i64} {
  func.func @_bilstm_kernel(%arg0: i32, %arg1: i32, %arg2: memref<4x8x1xf32, #tpu.memory_space<vmem>>, %arg3: memref<1x32x32xbf16, #tpu.memory_space<vmem>>, %arg4: memref<1x32x32xbf16, #tpu.memory_space<vmem>>, %arg5: memref<32x512xbf16, #tpu.memory_space<vmem>>, %arg6: memref<32x512xbf16, #tpu.memory_space<vmem>>, %arg7: memref<256x1024xbf16, #tpu.memory_space<vmem>>, %arg8: memref<1x512xf32, #tpu.memory_space<vmem>>, %arg9: memref<1x512xf32, #tpu.memory_space<vmem>>, %arg10: memref<4x8x128xf32, #tpu.memory_space<vmem>>, %arg11: memref<4x8x128xf32, #tpu.memory_space<vmem>>, %arg12: memref<32x512xf32, #tpu.memory_space<vmem>>, %arg13: memref<32x512xf32, #tpu.memory_space<vmem>>, %arg14: memref<8x256xf32, #tpu.memory_space<vmem>>, %arg15: memref<8x256xf32, #tpu.memory_space<vmem>>) attributes {dimension_semantics = [#tpu.dimension_semantics<parallel>, #tpu.dimension_semantics<arbitrary>], iteration_bounds = array<i64: 1, 2>, scalar_prefetch = 0 : i64, scratch_operands = 4 : i64, tpu.core_type = #tpu.core_type<tc>, window_params = [{transform_indices = @transform_0, window_bounds = array<i64: 4, 8, 1>}, {transform_indices = @transform_1, window_bounds = array<i64: 1, 32, 32>}, {transform_indices = @transform_2, window_bounds = array<i64: 1, 32, 32>}, {pipeline_mode = #tpu.pipeline_mode<synchronous>, transform_indices = @transform_3, window_bounds = array<i64: 32, 512>}, {pipeline_mode = #tpu.pipeline_mode<synchronous>, transform_indices = @transform_4, window_bounds = array<i64: 32, 512>}, {pipeline_mode = #tpu.pipeline_mode<synchronous>, transform_indices = @transform_5, window_bounds = array<i64: 256, 1024>}, {pipeline_mode = #tpu.pipeline_mode<synchronous>, transform_indices = @transform_6, window_bounds = array<i64: 1, 512>}, {pipeline_mode = #tpu.pipeline_mode<synchronous>, transform_indices = @transform_7, window_bounds = array<i64: 1, 512>}, {transform_indices = @transform_8, window_bounds = array<i64: 4, 8, 128>}, {transform_indices = @transform_9, window_bounds = array<i64: 4, 8, 128>}]} {
    %c0_i32 = arith.constant 0 : i32
    %0 = arith.cmpi eq, %arg1, %c0_i32 : i32
    %1 = arith.extui %0 : i1 to i32
    %c0_i32_0 = arith.constant 0 : i32
    %2 = arith.cmpi ne, %1, %c0_i32_0 : i32
    scf.if %2 {
      %cst_119 = arith.constant 0.000000e+00 : f32
      %387 = vector.broadcast %cst_119 : f32 to vector<8x256xf32>
      %c0_120 = arith.constant 0 : index
      %c0_121 = arith.constant 0 : index
      %388 = vector.load %arg14[%c0_120, %c0_121] : memref<8x256xf32, #tpu.memory_space<vmem>>, vector<8x256xf32>
      tpu.vector_store %arg14[%c0_120, %c0_121], %387 {strides = array<i32>} : memref<8x256xf32, #tpu.memory_space<vmem>>, vector<8x256xf32>,
      %cst_122 = arith.constant 0.000000e+00 : f32
      %389 = vector.broadcast %cst_122 : f32 to vector<8x256xf32>
      %c0_123 = arith.constant 0 : index
      %c0_124 = arith.constant 0 : index
      %390 = vector.load %arg15[%c0_123, %c0_124] : memref<8x256xf32, #tpu.memory_space<vmem>>, vector<8x256xf32>
      tpu.vector_store %arg15[%c0_123, %c0_124], %389 {strides = array<i32>} : memref<8x256xf32, #tpu.memory_space<vmem>>, vector<8x256xf32>,
    } else {
    }
    %c0 = arith.constant 0 : index
    %c0_1 = arith.constant 0 : index
    %c0_2 = arith.constant 0 : index
    %3 = vector.load %arg3[%c0, %c0_1, %c0_2] : memref<1x32x32xbf16, #tpu.memory_space<vmem>>, vector<1x32x32xbf16>
    %4 = vector.shape_cast %3 : vector<1x32x32xbf16> to vector<32x32xbf16>
    %c0_3 = arith.constant 0 : index
    %c0_4 = arith.constant 0 : index
    %5 = vector.load %arg5[%c0_3, %c0_4] : memref<32x512xbf16, #tpu.memory_space<vmem>>, vector<32x512xbf16>
    %cst = arith.constant dense<0.000000e+00> : vector<32x512xf32>
    %6 = tpu.matmul %4, %5, %cst {dimension_numbers = #tpu.dot_dimension_numbers<[1], [0], [0], [1], [0, 0, 1, 1], [], []>} : vector<32x32xbf16>, vector<32x512xbf16>, vector<32x512xf32> -> vector<32x512xf32>
    %c0_5 = arith.constant 0 : index
    %c0_6 = arith.constant 0 : index
    %7 = vector.load %arg8[%c0_5, %c0_6] : memref<1x512xf32, #tpu.memory_space<vmem>>, vector<1x512xf32>
    %8 = vector.broadcast %7 : vector<1x512xf32> to vector<32x512xf32>
    %9 = arith.addf %6, %8 : vector<32x512xf32>
    %c0_7 = arith.constant 0 : index
    %c0_8 = arith.constant 0 : index
    %10 = vector.load %arg12[%c0_7, %c0_8] : memref<32x512xf32, #tpu.memory_space<vmem>>, vector<32x512xf32>
    tpu.vector_store %arg12[%c0_7, %c0_8], %9 {strides = array<i32>} : memref<32x512xf32, #tpu.memory_space<vmem>>, vector<32x512xf32>,
    %c0_9 = arith.constant 0 : index
    %c0_10 = arith.constant 0 : index
    %c0_11 = arith.constant 0 : index
    %11 = vector.load %arg4[%c0_9, %c0_10, %c0_11] : memref<1x32x32xbf16, #tpu.memory_space<vmem>>, vector<1x32x32xbf16>
    %12 = vector.shape_cast %11 : vector<1x32x32xbf16> to vector<32x32xbf16>
    %c0_12 = arith.constant 0 : index
    %c0_13 = arith.constant 0 : index
    %13 = vector.load %arg6[%c0_12, %c0_13] : memref<32x512xbf16, #tpu.memory_space<vmem>>, vector<32x512xbf16>
    %cst_14 = arith.constant dense<0.000000e+00> : vector<32x512xf32>
    %14 = tpu.matmul %12, %13, %cst_14 {dimension_numbers = #tpu.dot_dimension_numbers<[1], [0], [0], [1], [0, 0, 1, 1], [], []>} : vector<32x32xbf16>, vector<32x512xbf16>, vector<32x512xf32> -> vector<32x512xf32>
    %c0_15 = arith.constant 0 : index
    %c0_16 = arith.constant 0 : index
    %15 = vector.load %arg9[%c0_15, %c0_16] : memref<1x512xf32, #tpu.memory_space<vmem>>, vector<1x512xf32>
    %16 = vector.broadcast %15 : vector<1x512xf32> to vector<32x512xf32>
    %17 = arith.addf %14, %16 : vector<32x512xf32>
    %c0_17 = arith.constant 0 : index
    %c0_18 = arith.constant 0 : index
    %18 = vector.load %arg13[%c0_17, %c0_18] : memref<32x512xf32, #tpu.memory_space<vmem>>, vector<32x512xf32>
    tpu.vector_store %arg13[%c0_17, %c0_18], %17 {strides = array<i32>} : memref<32x512xf32, #tpu.memory_space<vmem>>, vector<32x512xf32>,
    %c0_19 = arith.constant 0 : index
    %c0_20 = arith.constant 0 : index
    %19 = vector.load %arg14[%c0_19, %c0_20] : memref<8x256xf32, #tpu.memory_space<vmem>>, vector<8x256xf32>
    %c0_21 = arith.constant 0 : index
    %c0_22 = arith.constant 0 : index
    %20 = vector.load %arg15[%c0_21, %c0_22] : memref<8x256xf32, #tpu.memory_space<vmem>>, vector<8x256xf32>
    %c0_i32_23 = arith.constant 0 : i32
    %c3_i32 = arith.constant 3 : i32
    %21 = arith.subi %c3_i32, %c0_i32_23 : i32
    %22 = arith.truncf %19 : vector<8x256xf32> to vector<8x256xbf16>
    %c0_24 = arith.constant 0 : index
    %c0_25 = arith.constant 0 : index
    %23 = vector.load %arg7[%c0_24, %c0_25] : memref<256x1024xbf16, #tpu.memory_space<vmem>>, vector<256x1024xbf16>
    %cst_26 = arith.constant dense<0.000000e+00> : vector<8x1024xf32>
    %24 = tpu.matmul %22, %23, %cst_26 {dimension_numbers = #tpu.dot_dimension_numbers<[1], [0], [0], [1], [0, 0, 1, 1], [], []>} : vector<8x256xbf16>, vector<256x1024xbf16>, vector<8x1024xf32> -> vector<8x1024xf32>
    %c8_i32 = arith.constant 8 : i32
    %25 = arith.muli %c0_i32_23, %c8_i32 : i32
    %26 = tpu.assume_multiple %25, 8 : i32
    %c8_i32_27 = arith.constant 8 : i32
    %27 = arith.muli %21, %c8_i32_27 : i32
    %28 = tpu.assume_multiple %27, 8 : i32
    %29 = vector.extract_strided_slice %24 {offsets = [0, 0], sizes = [8, 512], strides = [1, 1]} : vector<8x1024xf32> to vector<8x512xf32>
    %30 = arith.index_cast %26 : i32 to index
    %c0_28 = arith.constant 0 : index
    %31 = vector.load %arg12[%30, %c0_28] : memref<32x512xf32, #tpu.memory_space<vmem>>, vector<8x512xf32>
    %32 = arith.addf %29, %31 : vector<8x512xf32>
    %33 = vector.extract_strided_slice %24 {offsets = [0, 512], sizes = [8, 512], strides = [1, 1]} : vector<8x1024xf32> to vector<8x512xf32>
    %34 = arith.index_cast %28 : i32 to index
    %c0_29 = arith.constant 0 : index
    %35 = vector.load %arg13[%34, %c0_29] : memref<32x512xf32, #tpu.memory_space<vmem>>, vector<8x512xf32>
    %36 = arith.addf %33, %35 : vector<8x512xf32>
    %37 = vector.extract_strided_slice %20 {offsets = [0, 0], sizes = [8, 128], strides = [1, 1]} : vector<8x256xf32> to vector<8x128xf32>
    %38 = vector.extract_strided_slice %32 {offsets = [0, 0], sizes = [8, 128], strides = [1, 1]} : vector<8x512xf32> to vector<8x128xf32>
    %39 = arith.negf %38 : vector<8x128xf32>
    %40 = math.exp %39 : vector<8x128xf32>
    %cst_30 = arith.constant 1.000000e+00 : f32
    %41 = vector.broadcast %cst_30 : f32 to vector<8x128xf32>
    %42 = arith.addf %41, %40 : vector<8x128xf32>
    %43 = arith.divf %41, %42 : vector<8x128xf32>
    %44 = vector.extract_strided_slice %32 {offsets = [0, 128], sizes = [8, 128], strides = [1, 1]} : vector<8x512xf32> to vector<8x128xf32>
    %45 = arith.negf %44 : vector<8x128xf32>
    %46 = math.exp %45 : vector<8x128xf32>
    %cst_31 = arith.constant 1.000000e+00 : f32
    %47 = vector.broadcast %cst_31 : f32 to vector<8x128xf32>
    %48 = arith.addf %47, %46 : vector<8x128xf32>
    %49 = arith.divf %47, %48 : vector<8x128xf32>
    %50 = vector.extract_strided_slice %32 {offsets = [0, 256], sizes = [8, 128], strides = [1, 1]} : vector<8x512xf32> to vector<8x128xf32>
    %51 = math.tanh %50 : vector<8x128xf32>
    %52 = vector.extract_strided_slice %32 {offsets = [0, 384], sizes = [8, 128], strides = [1, 1]} : vector<8x512xf32> to vector<8x128xf32>
    %53 = arith.negf %52 : vector<8x128xf32>
    %54 = math.exp %53 : vector<8x128xf32>
    %cst_32 = arith.constant 1.000000e+00 : f32
    %55 = vector.broadcast %cst_32 : f32 to vector<8x128xf32>
    %56 = arith.addf %55, %54 : vector<8x128xf32>
    %57 = arith.divf %55, %56 : vector<8x128xf32>
    %58 = arith.mulf %49, %37 : vector<8x128xf32>
    %59 = arith.mulf %43, %51 : vector<8x128xf32>
    %60 = arith.addf %58, %59 : vector<8x128xf32>
    %61 = math.tanh %60 : vector<8x128xf32>
    %62 = arith.mulf %57, %61 : vector<8x128xf32>
    %63 = vector.extract_strided_slice %20 {offsets = [0, 128], sizes = [8, 128], strides = [1, 1]} : vector<8x256xf32> to vector<8x128xf32>
    %64 = vector.extract_strided_slice %36 {offsets = [0, 0], sizes = [8, 128], strides = [1, 1]} : vector<8x512xf32> to vector<8x128xf32>
    %65 = arith.negf %64 : vector<8x128xf32>
    %66 = math.exp %65 : vector<8x128xf32>
    %cst_33 = arith.constant 1.000000e+00 : f32
    %67 = vector.broadcast %cst_33 : f32 to vector<8x128xf32>
    %68 = arith.addf %67, %66 : vector<8x128xf32>
    %69 = arith.divf %67, %68 : vector<8x128xf32>
    %70 = vector.extract_strided_slice %36 {offsets = [0, 128], sizes = [8, 128], strides = [1, 1]} : vector<8x512xf32> to vector<8x128xf32>
    %71 = arith.negf %70 : vector<8x128xf32>
    %72 = math.exp %71 : vector<8x128xf32>
    %cst_34 = arith.constant 1.000000e+00 : f32
    %73 = vector.broadcast %cst_34 : f32 to vector<8x128xf32>
    %74 = arith.addf %73, %72 : vector<8x128xf32>
    %75 = arith.divf %73, %74 : vector<8x128xf32>
    %76 = vector.extract_strided_slice %36 {offsets = [0, 256], sizes = [8, 128], strides = [1, 1]} : vector<8x512xf32> to vector<8x128xf32>
    %77 = math.tanh %76 : vector<8x128xf32>
    %78 = vector.extract_strided_slice %36 {offsets = [0, 384], sizes = [8, 128], strides = [1, 1]} : vector<8x512xf32> to vector<8x128xf32>
    %79 = arith.negf %78 : vector<8x128xf32>
    %80 = math.exp %79 : vector<8x128xf32>
    %cst_35 = arith.constant 1.000000e+00 : f32
    %81 = vector.broadcast %cst_35 : f32 to vector<8x128xf32>
    %82 = arith.addf %81, %80 : vector<8x128xf32>
    %83 = arith.divf %81, %82 : vector<8x128xf32>
    %84 = arith.mulf %75, %63 : vector<8x128xf32>
    %85 = arith.mulf %69, %77 : vector<8x128xf32>
    %86 = arith.addf %84, %85 : vector<8x128xf32>
    %87 = math.tanh %86 : vector<8x128xf32>
    %88 = arith.mulf %83, %87 : vector<8x128xf32>
    %89 = arith.index_cast %21 : i32 to index
    %c0_36 = arith.constant 0 : index
    %c0_37 = arith.constant 0 : index
    %90 = vector.load %arg2[%89, %c0_36, %c0_37] : memref<4x8x1xf32, #tpu.memory_space<vmem>>, vector<1x8x1xf32>
    %91 = vector.shape_cast %90 : vector<1x8x1xf32> to vector<8x1xf32>
    %cst_38 = arith.constant 0.000000e+00 : f32
    %92 = vector.broadcast %cst_38 : f32 to vector<8x1xf32>
    %93 = arith.cmpf ogt, %91, %92 : vector<8x1xf32>
    %cst_39 = arith.constant 0.000000e+00 : f32
    %94 = vector.shape_cast %93 : vector<8x1xi1> to vector<8x1xi1>
    %95 = vector.broadcast %94 : vector<8x1xi1> to vector<8x128xi1>
    %96 = vector.broadcast %cst_39 : f32 to vector<8x128xf32>
    %97 = arith.select %95, %88, %96 : vector<8x128xi1>, vector<8x128xf32>
    %cst_40 = arith.constant 0.000000e+00 : f32
    %98 = vector.shape_cast %93 : vector<8x1xi1> to vector<8x1xi1>
    %99 = vector.broadcast %98 : vector<8x1xi1> to vector<8x128xi1>
    %100 = vector.broadcast %cst_40 : f32 to vector<8x128xf32>
    %101 = arith.select %99, %86, %100 : vector<8x128xi1>, vector<8x128xf32>
    %102 = arith.index_cast %c0_i32_23 : i32 to index
    %c0_41 = arith.constant 0 : index
    %c0_42 = arith.constant 0 : index
    %103 = vector.load %arg10[%102, %c0_41, %c0_42] : memref<4x8x128xf32, #tpu.memory_space<vmem>>, vector<1x8x128xf32>
    %104 = vector.shape_cast %103 : vector<1x8x128xf32> to vector<8x128xf32>
    %105 = vector.shape_cast %62 : vector<8x128xf32> to vector<1x8x128xf32>
    tpu.vector_store %arg10[%102, %c0_41, %c0_42], %105 {strides = array<i32>} : memref<4x8x128xf32, #tpu.memory_space<vmem>>, vector<1x8x128xf32>,
    %106 = arith.index_cast %21 : i32 to index
    %c0_43 = arith.constant 0 : index
    %c0_44 = arith.constant 0 : index
    %107 = vector.load %arg11[%106, %c0_43, %c0_44] : memref<4x8x128xf32, #tpu.memory_space<vmem>>, vector<1x8x128xf32>
    %108 = vector.shape_cast %107 : vector<1x8x128xf32> to vector<8x128xf32>
    %109 = vector.shape_cast %97 : vector<8x128xf32> to vector<1x8x128xf32>
    tpu.vector_store %arg11[%106, %c0_43, %c0_44], %109 {strides = array<i32>} : memref<4x8x128xf32, #tpu.memory_space<vmem>>, vector<1x8x128xf32>,
    %110 = tpu.concatenate %62, %97 in 1 : vector<8x128xf32>, vector<8x128xf32> -> vector<8x256xf32>
    %111 = tpu.concatenate %60, %101 in 1 : vector<8x128xf32>, vector<8x128xf32> -> vector<8x256xf32>
    %c1_i32 = arith.constant 1 : i32
    %c3_i32_45 = arith.constant 3 : i32
    %112 = arith.subi %c3_i32_45, %c1_i32 : i32
    %113 = arith.truncf %110 : vector<8x256xf32> to vector<8x256xbf16>
    %c0_46 = arith.constant 0 : index
    %c0_47 = arith.constant 0 : index
    %114 = vector.load %arg7[%c0_46, %c0_47] : memref<256x1024xbf16, #tpu.memory_space<vmem>>, vector<256x1024xbf16>
    %cst_48 = arith.constant dense<0.000000e+00> : vector<8x1024xf32>
    %115 = tpu.matmul %113, %114, %cst_48 {dimension_numbers = #tpu.dot_dimension_numbers<[1], [0], [0], [1], [0, 0, 1, 1], [], []>} : vector<8x256xbf16>, vector<256x1024xbf16>, vector<8x1024xf32> -> vector<8x1024xf32>
    %c8_i32_49 = arith.constant 8 : i32
    %116 = arith.muli %c1_i32, %c8_i32_49 : i32
    %117 = tpu.assume_multiple %116, 8 : i32
    %c8_i32_50 = arith.constant 8 : i32
    %118 = arith.muli %112, %c8_i32_50 : i32
    %119 = tpu.assume_multiple %118, 8 : i32
    %120 = vector.extract_strided_slice %115 {offsets = [0, 0], sizes = [8, 512], strides = [1, 1]} : vector<8x1024xf32> to vector<8x512xf32>
    %121 = arith.index_cast %117 : i32 to index
    %c0_51 = arith.constant 0 : index
    %122 = vector.load %arg12[%121, %c0_51] : memref<32x512xf32, #tpu.memory_space<vmem>>, vector<8x512xf32>
    %123 = arith.addf %120, %122 : vector<8x512xf32>
    %124 = vector.extract_strided_slice %115 {offsets = [0, 512], sizes = [8, 512], strides = [1, 1]} : vector<8x1024xf32> to vector<8x512xf32>
    %125 = arith.index_cast %119 : i32 to index
    %c0_52 = arith.constant 0 : index
    %126 = vector.load %arg13[%125, %c0_52] : memref<32x512xf32, #tpu.memory_space<vmem>>, vector<8x512xf32>
    %127 = arith.addf %124, %126 : vector<8x512xf32>
    %128 = vector.extract_strided_slice %111 {offsets = [0, 0], sizes = [8, 128], strides = [1, 1]} : vector<8x256xf32> to vector<8x128xf32>
    %129 = vector.extract_strided_slice %123 {offsets = [0, 0], sizes = [8, 128], strides = [1, 1]} : vector<8x512xf32> to vector<8x128xf32>
    %130 = arith.negf %129 : vector<8x128xf32>
    %131 = math.exp %130 : vector<8x128xf32>
    %cst_53 = arith.constant 1.000000e+00 : f32
    %132 = vector.broadcast %cst_53 : f32 to vector<8x128xf32>
    %133 = arith.addf %132, %131 : vector<8x128xf32>
    %134 = arith.divf %132, %133 : vector<8x128xf32>
    %135 = vector.extract_strided_slice %123 {offsets = [0, 128], sizes = [8, 128], strides = [1, 1]} : vector<8x512xf32> to vector<8x128xf32>
    %136 = arith.negf %135 : vector<8x128xf32>
    %137 = math.exp %136 : vector<8x128xf32>
    %cst_54 = arith.constant 1.000000e+00 : f32
    %138 = vector.broadcast %cst_54 : f32 to vector<8x128xf32>
    %139 = arith.addf %138, %137 : vector<8x128xf32>
    %140 = arith.divf %138, %139 : vector<8x128xf32>
    %141 = vector.extract_strided_slice %123 {offsets = [0, 256], sizes = [8, 128], strides = [1, 1]} : vector<8x512xf32> to vector<8x128xf32>
    %142 = math.tanh %141 : vector<8x128xf32>
    %143 = vector.extract_strided_slice %123 {offsets = [0, 384], sizes = [8, 128], strides = [1, 1]} : vector<8x512xf32> to vector<8x128xf32>
    %144 = arith.negf %143 : vector<8x128xf32>
    %145 = math.exp %144 : vector<8x128xf32>
    %cst_55 = arith.constant 1.000000e+00 : f32
    %146 = vector.broadcast %cst_55 : f32 to vector<8x128xf32>
    %147 = arith.addf %146, %145 : vector<8x128xf32>
    %148 = arith.divf %146, %147 : vector<8x128xf32>
    %149 = arith.mulf %140, %128 : vector<8x128xf32>
    %150 = arith.mulf %134, %142 : vector<8x128xf32>
    %151 = arith.addf %149, %150 : vector<8x128xf32>
    %152 = math.tanh %151 : vector<8x128xf32>
    %153 = arith.mulf %148, %152 : vector<8x128xf32>
    %154 = vector.extract_strided_slice %111 {offsets = [0, 128], sizes = [8, 128], strides = [1, 1]} : vector<8x256xf32> to vector<8x128xf32>
    %155 = vector.extract_strided_slice %127 {offsets = [0, 0], sizes = [8, 128], strides = [1, 1]} : vector<8x512xf32> to vector<8x128xf32>
    %156 = arith.negf %155 : vector<8x128xf32>
    %157 = math.exp %156 : vector<8x128xf32>
    %cst_56 = arith.constant 1.000000e+00 : f32
    %158 = vector.broadcast %cst_56 : f32 to vector<8x128xf32>
    %159 = arith.addf %158, %157 : vector<8x128xf32>
    %160 = arith.divf %158, %159 : vector<8x128xf32>
    %161 = vector.extract_strided_slice %127 {offsets = [0, 128], sizes = [8, 128], strides = [1, 1]} : vector<8x512xf32> to vector<8x128xf32>
    %162 = arith.negf %161 : vector<8x128xf32>
    %163 = math.exp %162 : vector<8x128xf32>
    %cst_57 = arith.constant 1.000000e+00 : f32
    %164 = vector.broadcast %cst_57 : f32 to vector<8x128xf32>
    %165 = arith.addf %164, %163 : vector<8x128xf32>
    %166 = arith.divf %164, %165 : vector<8x128xf32>
    %167 = vector.extract_strided_slice %127 {offsets = [0, 256], sizes = [8, 128], strides = [1, 1]} : vector<8x512xf32> to vector<8x128xf32>
    %168 = math.tanh %167 : vector<8x128xf32>
    %169 = vector.extract_strided_slice %127 {offsets = [0, 384], sizes = [8, 128], strides = [1, 1]} : vector<8x512xf32> to vector<8x128xf32>
    %170 = arith.negf %169 : vector<8x128xf32>
    %171 = math.exp %170 : vector<8x128xf32>
    %cst_58 = arith.constant 1.000000e+00 : f32
    %172 = vector.broadcast %cst_58 : f32 to vector<8x128xf32>
    %173 = arith.addf %172, %171 : vector<8x128xf32>
    %174 = arith.divf %172, %173 : vector<8x128xf32>
    %175 = arith.mulf %166, %154 : vector<8x128xf32>
    %176 = arith.mulf %160, %168 : vector<8x128xf32>
    %177 = arith.addf %175, %176 : vector<8x128xf32>
    %178 = math.tanh %177 : vector<8x128xf32>
    %179 = arith.mulf %174, %178 : vector<8x128xf32>
    %180 = arith.index_cast %112 : i32 to index
    %c0_59 = arith.constant 0 : index
    %c0_60 = arith.constant 0 : index
    %181 = vector.load %arg2[%180, %c0_59, %c0_60] : memref<4x8x1xf32, #tpu.memory_space<vmem>>, vector<1x8x1xf32>
    %182 = vector.shape_cast %181 : vector<1x8x1xf32> to vector<8x1xf32>
    %cst_61 = arith.constant 0.000000e+00 : f32
    %183 = vector.broadcast %cst_61 : f32 to vector<8x1xf32>
    %184 = arith.cmpf ogt, %182, %183 : vector<8x1xf32>
    %cst_62 = arith.constant 0.000000e+00 : f32
    %185 = vector.shape_cast %184 : vector<8x1xi1> to vector<8x1xi1>
    %186 = vector.broadcast %185 : vector<8x1xi1> to vector<8x128xi1>
    %187 = vector.broadcast %cst_62 : f32 to vector<8x128xf32>
    %188 = arith.select %186, %179, %187 : vector<8x128xi1>, vector<8x128xf32>
    %cst_63 = arith.constant 0.000000e+00 : f32
    %189 = vector.shape_cast %184 : vector<8x1xi1> to vector<8x1xi1>
    %190 = vector.broadcast %189 : vector<8x1xi1> to vector<8x128xi1>
    %191 = vector.broadcast %cst_63 : f32 to vector<8x128xf32>
    %192 = arith.select %190, %177, %191 : vector<8x128xi1>, vector<8x128xf32>
    %193 = arith.index_cast %c1_i32 : i32 to index
    %c0_64 = arith.constant 0 : index
    %c0_65 = arith.constant 0 : index
    %194 = vector.load %arg10[%193, %c0_64, %c0_65] : memref<4x8x128xf32, #tpu.memory_space<vmem>>, vector<1x8x128xf32>
    %195 = vector.shape_cast %194 : vector<1x8x128xf32> to vector<8x128xf32>
    %196 = vector.shape_cast %153 : vector<8x128xf32> to vector<1x8x128xf32>
    tpu.vector_store %arg10[%193, %c0_64, %c0_65], %196 {strides = array<i32>} : memref<4x8x128xf32, #tpu.memory_space<vmem>>, vector<1x8x128xf32>,
    %197 = arith.index_cast %112 : i32 to index
    %c0_66 = arith.constant 0 : index
    %c0_67 = arith.constant 0 : index
    %198 = vector.load %arg11[%197, %c0_66, %c0_67] : memref<4x8x128xf32, #tpu.memory_space<vmem>>, vector<1x8x128xf32>
    %199 = vector.shape_cast %198 : vector<1x8x128xf32> to vector<8x128xf32>
    %200 = vector.shape_cast %188 : vector<8x128xf32> to vector<1x8x128xf32>
    tpu.vector_store %arg11[%197, %c0_66, %c0_67], %200 {strides = array<i32>} : memref<4x8x128xf32, #tpu.memory_space<vmem>>, vector<1x8x128xf32>,
    %201 = tpu.concatenate %153, %188 in 1 : vector<8x128xf32>, vector<8x128xf32> -> vector<8x256xf32>
    %202 = tpu.concatenate %151, %192 in 1 : vector<8x128xf32>, vector<8x128xf32> -> vector<8x256xf32>
    %c2_i32 = arith.constant 2 : i32
    %c3_i32_68 = arith.constant 3 : i32
    %203 = arith.subi %c3_i32_68, %c2_i32 : i32
    %204 = arith.truncf %201 : vector<8x256xf32> to vector<8x256xbf16>
    %c0_69 = arith.constant 0 : index
    %c0_70 = arith.constant 0 : index
    %205 = vector.load %arg7[%c0_69, %c0_70] : memref<256x1024xbf16, #tpu.memory_space<vmem>>, vector<256x1024xbf16>
    %cst_71 = arith.constant dense<0.000000e+00> : vector<8x1024xf32>
    %206 = tpu.matmul %204, %205, %cst_71 {dimension_numbers = #tpu.dot_dimension_numbers<[1], [0], [0], [1], [0, 0, 1, 1], [], []>} : vector<8x256xbf16>, vector<256x1024xbf16>, vector<8x1024xf32> -> vector<8x1024xf32>
    %c8_i32_72 = arith.constant 8 : i32
    %207 = arith.muli %c2_i32, %c8_i32_72 : i32
    %208 = tpu.assume_multiple %207, 8 : i32
    %c8_i32_73 = arith.constant 8 : i32
    %209 = arith.muli %203, %c8_i32_73 : i32
    %210 = tpu.assume_multiple %209, 8 : i32
    %211 = vector.extract_strided_slice %206 {offsets = [0, 0], sizes = [8, 512], strides = [1, 1]} : vector<8x1024xf32> to vector<8x512xf32>
    %212 = arith.index_cast %208 : i32 to index
    %c0_74 = arith.constant 0 : index
    %213 = vector.load %arg12[%212, %c0_74] : memref<32x512xf32, #tpu.memory_space<vmem>>, vector<8x512xf32>
    %214 = arith.addf %211, %213 : vector<8x512xf32>
    %215 = vector.extract_strided_slice %206 {offsets = [0, 512], sizes = [8, 512], strides = [1, 1]} : vector<8x1024xf32> to vector<8x512xf32>
    %216 = arith.index_cast %210 : i32 to index
    %c0_75 = arith.constant 0 : index
    %217 = vector.load %arg13[%216, %c0_75] : memref<32x512xf32, #tpu.memory_space<vmem>>, vector<8x512xf32>
    %218 = arith.addf %215, %217 : vector<8x512xf32>
    %219 = vector.extract_strided_slice %202 {offsets = [0, 0], sizes = [8, 128], strides = [1, 1]} : vector<8x256xf32> to vector<8x128xf32>
    %220 = vector.extract_strided_slice %214 {offsets = [0, 0], sizes = [8, 128], strides = [1, 1]} : vector<8x512xf32> to vector<8x128xf32>
    %221 = arith.negf %220 : vector<8x128xf32>
    %222 = math.exp %221 : vector<8x128xf32>
    %cst_76 = arith.constant 1.000000e+00 : f32
    %223 = vector.broadcast %cst_76 : f32 to vector<8x128xf32>
    %224 = arith.addf %223, %222 : vector<8x128xf32>
    %225 = arith.divf %223, %224 : vector<8x128xf32>
    %226 = vector.extract_strided_slice %214 {offsets = [0, 128], sizes = [8, 128], strides = [1, 1]} : vector<8x512xf32> to vector<8x128xf32>
    %227 = arith.negf %226 : vector<8x128xf32>
    %228 = math.exp %227 : vector<8x128xf32>
    %cst_77 = arith.constant 1.000000e+00 : f32
    %229 = vector.broadcast %cst_77 : f32 to vector<8x128xf32>
    %230 = arith.addf %229, %228 : vector<8x128xf32>
    %231 = arith.divf %229, %230 : vector<8x128xf32>
    %232 = vector.extract_strided_slice %214 {offsets = [0, 256], sizes = [8, 128], strides = [1, 1]} : vector<8x512xf32> to vector<8x128xf32>
    %233 = math.tanh %232 : vector<8x128xf32>
    %234 = vector.extract_strided_slice %214 {offsets = [0, 384], sizes = [8, 128], strides = [1, 1]} : vector<8x512xf32> to vector<8x128xf32>
    %235 = arith.negf %234 : vector<8x128xf32>
    %236 = math.exp %235 : vector<8x128xf32>
    %cst_78 = arith.constant 1.000000e+00 : f32
    %237 = vector.broadcast %cst_78 : f32 to vector<8x128xf32>
    %238 = arith.addf %237, %236 : vector<8x128xf32>
    %239 = arith.divf %237, %238 : vector<8x128xf32>
    %240 = arith.mulf %231, %219 : vector<8x128xf32>
    %241 = arith.mulf %225, %233 : vector<8x128xf32>
    %242 = arith.addf %240, %241 : vector<8x128xf32>
    %243 = math.tanh %242 : vector<8x128xf32>
    %244 = arith.mulf %239, %243 : vector<8x128xf32>
    %245 = vector.extract_strided_slice %202 {offsets = [0, 128], sizes = [8, 128], strides = [1, 1]} : vector<8x256xf32> to vector<8x128xf32>
    %246 = vector.extract_strided_slice %218 {offsets = [0, 0], sizes = [8, 128], strides = [1, 1]} : vector<8x512xf32> to vector<8x128xf32>
    %247 = arith.negf %246 : vector<8x128xf32>
    %248 = math.exp %247 : vector<8x128xf32>
    %cst_79 = arith.constant 1.000000e+00 : f32
    %249 = vector.broadcast %cst_79 : f32 to vector<8x128xf32>
    %250 = arith.addf %249, %248 : vector<8x128xf32>
    %251 = arith.divf %249, %250 : vector<8x128xf32>
    %252 = vector.extract_strided_slice %218 {offsets = [0, 128], sizes = [8, 128], strides = [1, 1]} : vector<8x512xf32> to vector<8x128xf32>
    %253 = arith.negf %252 : vector<8x128xf32>
    %254 = math.exp %253 : vector<8x128xf32>
    %cst_80 = arith.constant 1.000000e+00 : f32
    %255 = vector.broadcast %cst_80 : f32 to vector<8x128xf32>
    %256 = arith.addf %255, %254 : vector<8x128xf32>
    %257 = arith.divf %255, %256 : vector<8x128xf32>
    %258 = vector.extract_strided_slice %218 {offsets = [0, 256], sizes = [8, 128], strides = [1, 1]} : vector<8x512xf32> to vector<8x128xf32>
    %259 = math.tanh %258 : vector<8x128xf32>
    %260 = vector.extract_strided_slice %218 {offsets = [0, 384], sizes = [8, 128], strides = [1, 1]} : vector<8x512xf32> to vector<8x128xf32>
    %261 = arith.negf %260 : vector<8x128xf32>
    %262 = math.exp %261 : vector<8x128xf32>
    %cst_81 = arith.constant 1.000000e+00 : f32
    %263 = vector.broadcast %cst_81 : f32 to vector<8x128xf32>
    %264 = arith.addf %263, %262 : vector<8x128xf32>
    %265 = arith.divf %263, %264 : vector<8x128xf32>
    %266 = arith.mulf %257, %245 : vector<8x128xf32>
    %267 = arith.mulf %251, %259 : vector<8x128xf32>
    %268 = arith.addf %266, %267 : vector<8x128xf32>
    %269 = math.tanh %268 : vector<8x128xf32>
    %270 = arith.mulf %265, %269 : vector<8x128xf32>
    %271 = arith.index_cast %203 : i32 to index
    %c0_82 = arith.constant 0 : index
    %c0_83 = arith.constant 0 : index
    %272 = vector.load %arg2[%271, %c0_82, %c0_83] : memref<4x8x1xf32, #tpu.memory_space<vmem>>, vector<1x8x1xf32>
    %273 = vector.shape_cast %272 : vector<1x8x1xf32> to vector<8x1xf32>
    %cst_84 = arith.constant 0.000000e+00 : f32
    %274 = vector.broadcast %cst_84 : f32 to vector<8x1xf32>
    %275 = arith.cmpf ogt, %273, %274 : vector<8x1xf32>
    %cst_85 = arith.constant 0.000000e+00 : f32
    %276 = vector.shape_cast %275 : vector<8x1xi1> to vector<8x1xi1>
    %277 = vector.broadcast %276 : vector<8x1xi1> to vector<8x128xi1>
    %278 = vector.broadcast %cst_85 : f32 to vector<8x128xf32>
    %279 = arith.select %277, %270, %278 : vector<8x128xi1>, vector<8x128xf32>
    %cst_86 = arith.constant 0.000000e+00 : f32
    %280 = vector.shape_cast %275 : vector<8x1xi1> to vector<8x1xi1>
    %281 = vector.broadcast %280 : vector<8x1xi1> to vector<8x128xi1>
    %282 = vector.broadcast %cst_86 : f32 to vector<8x128xf32>
    %283 = arith.select %281, %268, %282 : vector<8x128xi1>, vector<8x128xf32>
    %284 = arith.index_cast %c2_i32 : i32 to index
    %c0_87 = arith.constant 0 : index
    %c0_88 = arith.constant 0 : index
    %285 = vector.load %arg10[%284, %c0_87, %c0_88] : memref<4x8x128xf32, #tpu.memory_space<vmem>>, vector<1x8x128xf32>
    %286 = vector.shape_cast %285 : vector<1x8x128xf32> to vector<8x128xf32>
    %287 = vector.shape_cast %244 : vector<8x128xf32> to vector<1x8x128xf32>
    tpu.vector_store %arg10[%284, %c0_87, %c0_88], %287 {strides = array<i32>} : memref<4x8x128xf32, #tpu.memory_space<vmem>>, vector<1x8x128xf32>,
    %288 = arith.index_cast %203 : i32 to index
    %c0_89 = arith.constant 0 : index
    %c0_90 = arith.constant 0 : index
    %289 = vector.load %arg11[%288, %c0_89, %c0_90] : memref<4x8x128xf32, #tpu.memory_space<vmem>>, vector<1x8x128xf32>
    %290 = vector.shape_cast %289 : vector<1x8x128xf32> to vector<8x128xf32>
    %291 = vector.shape_cast %279 : vector<8x128xf32> to vector<1x8x128xf32>
    tpu.vector_store %arg11[%288, %c0_89, %c0_90], %291 {strides = array<i32>} : memref<4x8x128xf32, #tpu.memory_space<vmem>>, vector<1x8x128xf32>,
    %292 = tpu.concatenate %244, %279 in 1 : vector<8x128xf32>, vector<8x128xf32> -> vector<8x256xf32>
    %293 = tpu.concatenate %242, %283 in 1 : vector<8x128xf32>, vector<8x128xf32> -> vector<8x256xf32>
    %c3_i32_91 = arith.constant 3 : i32
    %c3_i32_92 = arith.constant 3 : i32
    %294 = arith.subi %c3_i32_92, %c3_i32_91 : i32
    %295 = arith.truncf %292 : vector<8x256xf32> to vector<8x256xbf16>
    %c0_93 = arith.constant 0 : index
    %c0_94 = arith.constant 0 : index
    %296 = vector.load %arg7[%c0_93, %c0_94] : memref<256x1024xbf16, #tpu.memory_space<vmem>>, vector<256x1024xbf16>
    %cst_95 = arith.constant dense<0.000000e+00> : vector<8x1024xf32>
    %297 = tpu.matmul %295, %296, %cst_95 {dimension_numbers = #tpu.dot_dimension_numbers<[1], [0], [0], [1], [0, 0, 1, 1], [], []>} : vector<8x256xbf16>, vector<256x1024xbf16>, vector<8x1024xf32> -> vector<8x1024xf32>
    %c8_i32_96 = arith.constant 8 : i32
    %298 = arith.muli %c3_i32_91, %c8_i32_96 : i32
    %299 = tpu.assume_multiple %298, 8 : i32
    %c8_i32_97 = arith.constant 8 : i32
    %300 = arith.muli %294, %c8_i32_97 : i32
    %301 = tpu.assume_multiple %300, 8 : i32
    %302 = vector.extract_strided_slice %297 {offsets = [0, 0], sizes = [8, 512], strides = [1, 1]} : vector<8x1024xf32> to vector<8x512xf32>
    %303 = arith.index_cast %299 : i32 to index
    %c0_98 = arith.constant 0 : index
    %304 = vector.load %arg12[%303, %c0_98] : memref<32x512xf32, #tpu.memory_space<vmem>>, vector<8x512xf32>
    %305 = arith.addf %302, %304 : vector<8x512xf32>
    %306 = vector.extract_strided_slice %297 {offsets = [0, 512], sizes = [8, 512], strides = [1, 1]} : vector<8x1024xf32> to vector<8x512xf32>
    %307 = arith.index_cast %301 : i32 to index
    %c0_99 = arith.constant 0 : index
    %308 = vector.load %arg13[%307, %c0_99] : memref<32x512xf32, #tpu.memory_space<vmem>>, vector<8x512xf32>
    %309 = arith.addf %306, %308 : vector<8x512xf32>
    %310 = vector.extract_strided_slice %293 {offsets = [0, 0], sizes = [8, 128], strides = [1, 1]} : vector<8x256xf32> to vector<8x128xf32>
    %311 = vector.extract_strided_slice %305 {offsets = [0, 0], sizes = [8, 128], strides = [1, 1]} : vector<8x512xf32> to vector<8x128xf32>
    %312 = arith.negf %311 : vector<8x128xf32>
    %313 = math.exp %312 : vector<8x128xf32>
    %cst_100 = arith.constant 1.000000e+00 : f32
    %314 = vector.broadcast %cst_100 : f32 to vector<8x128xf32>
    %315 = arith.addf %314, %313 : vector<8x128xf32>
    %316 = arith.divf %314, %315 : vector<8x128xf32>
    %317 = vector.extract_strided_slice %305 {offsets = [0, 128], sizes = [8, 128], strides = [1, 1]} : vector<8x512xf32> to vector<8x128xf32>
    %318 = arith.negf %317 : vector<8x128xf32>
    %319 = math.exp %318 : vector<8x128xf32>
    %cst_101 = arith.constant 1.000000e+00 : f32
    %320 = vector.broadcast %cst_101 : f32 to vector<8x128xf32>
    %321 = arith.addf %320, %319 : vector<8x128xf32>
    %322 = arith.divf %320, %321 : vector<8x128xf32>
    %323 = vector.extract_strided_slice %305 {offsets = [0, 256], sizes = [8, 128], strides = [1, 1]} : vector<8x512xf32> to vector<8x128xf32>
    %324 = math.tanh %323 : vector<8x128xf32>
    %325 = vector.extract_strided_slice %305 {offsets = [0, 384], sizes = [8, 128], strides = [1, 1]} : vector<8x512xf32> to vector<8x128xf32>
    %326 = arith.negf %325 : vector<8x128xf32>
    %327 = math.exp %326 : vector<8x128xf32>
    %cst_102 = arith.constant 1.000000e+00 : f32
    %328 = vector.broadcast %cst_102 : f32 to vector<8x128xf32>
    %329 = arith.addf %328, %327 : vector<8x128xf32>
    %330 = arith.divf %328, %329 : vector<8x128xf32>
    %331 = arith.mulf %322, %310 : vector<8x128xf32>
    %332 = arith.mulf %316, %324 : vector<8x128xf32>
    %333 = arith.addf %331, %332 : vector<8x128xf32>
    %334 = math.tanh %333 : vector<8x128xf32>
    %335 = arith.mulf %330, %334 : vector<8x128xf32>
    %336 = vector.extract_strided_slice %293 {offsets = [0, 128], sizes = [8, 128], strides = [1, 1]} : vector<8x256xf32> to vector<8x128xf32>
    %337 = vector.extract_strided_slice %309 {offsets = [0, 0], sizes = [8, 128], strides = [1, 1]} : vector<8x512xf32> to vector<8x128xf32>
    %338 = arith.negf %337 : vector<8x128xf32>
    %339 = math.exp %338 : vector<8x128xf32>
    %cst_103 = arith.constant 1.000000e+00 : f32
    %340 = vector.broadcast %cst_103 : f32 to vector<8x128xf32>
    %341 = arith.addf %340, %339 : vector<8x128xf32>
    %342 = arith.divf %340, %341 : vector<8x128xf32>
    %343 = vector.extract_strided_slice %309 {offsets = [0, 128], sizes = [8, 128], strides = [1, 1]} : vector<8x512xf32> to vector<8x128xf32>
    %344 = arith.negf %343 : vector<8x128xf32>
    %345 = math.exp %344 : vector<8x128xf32>
    %cst_104 = arith.constant 1.000000e+00 : f32
    %346 = vector.broadcast %cst_104 : f32 to vector<8x128xf32>
    %347 = arith.addf %346, %345 : vector<8x128xf32>
    %348 = arith.divf %346, %347 : vector<8x128xf32>
    %349 = vector.extract_strided_slice %309 {offsets = [0, 256], sizes = [8, 128], strides = [1, 1]} : vector<8x512xf32> to vector<8x128xf32>
    %350 = math.tanh %349 : vector<8x128xf32>
    %351 = vector.extract_strided_slice %309 {offsets = [0, 384], sizes = [8, 128], strides = [1, 1]} : vector<8x512xf32> to vector<8x128xf32>
    %352 = arith.negf %351 : vector<8x128xf32>
    %353 = math.exp %352 : vector<8x128xf32>
    %cst_105 = arith.constant 1.000000e+00 : f32
    %354 = vector.broadcast %cst_105 : f32 to vector<8x128xf32>
    %355 = arith.addf %354, %353 : vector<8x128xf32>
    %356 = arith.divf %354, %355 : vector<8x128xf32>
    %357 = arith.mulf %348, %336 : vector<8x128xf32>
    %358 = arith.mulf %342, %350 : vector<8x128xf32>
    %359 = arith.addf %357, %358 : vector<8x128xf32>
    %360 = math.tanh %359 : vector<8x128xf32>
    %361 = arith.mulf %356, %360 : vector<8x128xf32>
    %362 = arith.index_cast %294 : i32 to index
    %c0_106 = arith.constant 0 : index
    %c0_107 = arith.constant 0 : index
    %363 = vector.load %arg2[%362, %c0_106, %c0_107] : memref<4x8x1xf32, #tpu.memory_space<vmem>>, vector<1x8x1xf32>
    %364 = vector.shape_cast %363 : vector<1x8x1xf32> to vector<8x1xf32>
    %cst_108 = arith.constant 0.000000e+00 : f32
    %365 = vector.broadcast %cst_108 : f32 to vector<8x1xf32>
    %366 = arith.cmpf ogt, %364, %365 : vector<8x1xf32>
    %cst_109 = arith.constant 0.000000e+00 : f32
    %367 = vector.shape_cast %366 : vector<8x1xi1> to vector<8x1xi1>
    %368 = vector.broadcast %367 : vector<8x1xi1> to vector<8x128xi1>
    %369 = vector.broadcast %cst_109 : f32 to vector<8x128xf32>
    %370 = arith.select %368, %361, %369 : vector<8x128xi1>, vector<8x128xf32>
    %cst_110 = arith.constant 0.000000e+00 : f32
    %371 = vector.shape_cast %366 : vector<8x1xi1> to vector<8x1xi1>
    %372 = vector.broadcast %371 : vector<8x1xi1> to vector<8x128xi1>
    %373 = vector.broadcast %cst_110 : f32 to vector<8x128xf32>
    %374 = arith.select %372, %359, %373 : vector<8x128xi1>, vector<8x128xf32>
    %375 = arith.index_cast %c3_i32_91 : i32 to index
    %c0_111 = arith.constant 0 : index
    %c0_112 = arith.constant 0 : index
    %376 = vector.load %arg10[%375, %c0_111, %c0_112] : memref<4x8x128xf32, #tpu.memory_space<vmem>>, vector<1x8x128xf32>
    %377 = vector.shape_cast %376 : vector<1x8x128xf32> to vector<8x128xf32>
    %378 = vector.shape_cast %335 : vector<8x128xf32> to vector<1x8x128xf32>
    tpu.vector_store %arg10[%375, %c0_111, %c0_112], %378 {strides = array<i32>} : memref<4x8x128xf32, #tpu.memory_space<vmem>>, vector<1x8x128xf32>,
    %379 = arith.index_cast %294 : i32 to index
    %c0_113 = arith.constant 0 : index
    %c0_114 = arith.constant 0 : index
    %380 = vector.load %arg11[%379, %c0_113, %c0_114] : memref<4x8x128xf32, #tpu.memory_space<vmem>>, vector<1x8x128xf32>
    %381 = vector.shape_cast %380 : vector<1x8x128xf32> to vector<8x128xf32>
    %382 = vector.shape_cast %370 : vector<8x128xf32> to vector<1x8x128xf32>
    tpu.vector_store %arg11[%379, %c0_113, %c0_114], %382 {strides = array<i32>} : memref<4x8x128xf32, #tpu.memory_space<vmem>>, vector<1x8x128xf32>,
    %383 = tpu.concatenate %335, %370 in 1 : vector<8x128xf32>, vector<8x128xf32> -> vector<8x256xf32>
    %384 = tpu.concatenate %333, %374 in 1 : vector<8x128xf32>, vector<8x128xf32> -> vector<8x256xf32>
    %c4_i32 = arith.constant 4 : i32
    %c0_115 = arith.constant 0 : index
    %c0_116 = arith.constant 0 : index
    %385 = vector.load %arg14[%c0_115, %c0_116] : memref<8x256xf32, #tpu.memory_space<vmem>>, vector<8x256xf32>
    tpu.vector_store %arg14[%c0_115, %c0_116], %383 {strides = array<i32>} : memref<8x256xf32, #tpu.memory_space<vmem>>, vector<8x256xf32>,
    %c0_117 = arith.constant 0 : index
    %c0_118 = arith.constant 0 : index
    %386 = vector.load %arg15[%c0_117, %c0_118] : memref<8x256xf32, #tpu.memory_space<vmem>>, vector<8x256xf32>
    tpu.vector_store %arg15[%c0_117, %c0_118], %384 {strides = array<i32>} : memref<8x256xf32, #tpu.memory_space<vmem>>, vector<8x256xf32>,
    return
  }
  func.func @transform_0(%arg0: i32, %arg1: i32) -> (i32, i32, i32) {
    %c1_i32 = arith.constant 1 : i32
    %0 = arith.subi %c1_i32, %arg1 : i32
    %c0_i32 = arith.constant 0 : i32
    %c0_i32_0 = arith.constant 0 : i32
    return %0, %arg0, %c0_i32 : i32, i32, i32
  }
  func.func @transform_1(%arg0: i32, %arg1: i32) -> (i32, i32, i32) {
    %c0_i32 = arith.constant 0 : i32
    %c0_i32_0 = arith.constant 0 : i32
    return %arg0, %arg1, %c0_i32 : i32, i32, i32
  }
  func.func @transform_2(%arg0: i32, %arg1: i32) -> (i32, i32, i32) {
    %c1_i32 = arith.constant 1 : i32
    %0 = arith.subi %c1_i32, %arg1 : i32
    %c0_i32 = arith.constant 0 : i32
    %c0_i32_0 = arith.constant 0 : i32
    return %arg0, %0, %c0_i32 : i32, i32, i32
  }
  func.func @transform_3(%arg0: i32, %arg1: i32) -> (i32, i32) {
    %c0_i32 = arith.constant 0 : i32
    %c0_i32_0 = arith.constant 0 : i32
    %c0_i32_1 = arith.constant 0 : i32
    return %c0_i32, %c0_i32_0 : i32, i32
  }
  func.func @transform_4(%arg0: i32, %arg1: i32) -> (i32, i32) {
    %c0_i32 = arith.constant 0 : i32
    %c0_i32_0 = arith.constant 0 : i32
    %c0_i32_1 = arith.constant 0 : i32
    return %c0_i32, %c0_i32_0 : i32, i32
  }
  func.func @transform_5(%arg0: i32, %arg1: i32) -> (i32, i32) {
    %c0_i32 = arith.constant 0 : i32
    %c0_i32_0 = arith.constant 0 : i32
    %c0_i32_1 = arith.constant 0 : i32
    return %c0_i32, %c0_i32_0 : i32, i32
  }
  func.func @transform_6(%arg0: i32, %arg1: i32) -> (i32, i32) {
    %c0_i32 = arith.constant 0 : i32
    %c0_i32_0 = arith.constant 0 : i32
    %c0_i32_1 = arith.constant 0 : i32
    return %c0_i32, %c0_i32_0 : i32, i32
  }
  func.func @transform_7(%arg0: i32, %arg1: i32) -> (i32, i32) {
    %c0_i32 = arith.constant 0 : i32
    %c0_i32_0 = arith.constant 0 : i32
    %c0_i32_1 = arith.constant 0 : i32
    return %c0_i32, %c0_i32_0 : i32, i32
  }
  func.func @transform_8(%arg0: i32, %arg1: i32) -> (i32, i32, i32) {
    %c0_i32 = arith.constant 0 : i32
    %c0_i32_0 = arith.constant 0 : i32
    return %arg1, %arg0, %c0_i32 : i32, i32, i32
  }
  func.func @transform_9(%arg0: i32, %arg1: i32) -> (i32, i32, i32) {
    %c1_i32 = arith.constant 1 : i32
    %0 = arith.subi %c1_i32, %arg1 : i32
    %c0_i32 = arith.constant 0 : i32
    %c0_i32_0 = arith.constant 0 : i32
    return %0, %arg0, %c0_i32 : i32, i32, i32
  }
}

</mosaic_0001>

<bundles_post_ra>
// kernel: _bilstm_time_major.1
= control target key start
LH: loop header
LB: loop body
LE: loop exit
PB: predicated region body
PF: predicated region fallthrough
CT: control target
= control target key end

     0   :  { %s7467_s0 = inlined_call_operand.vmem [shape: f32[8,8,1], index: 0, kind: input, shape index: {}]   ;;  %s7468_s1 = inlined_call_operand.vmem [shape: bf16[1,64,32], index: 1, kind: input, shape index: {}, may-alias: {1,2}]   ;;  %s7469_s2 = inlined_call_operand.vmem [shape: bf16[1,64,32], index: 2, kind: input, shape index: {}, may-alias: {1,2}]   ;;  %s7470_s3 = inlined_call_operand.vmem [shape: bf16[32,512], index: 3, kind: input, shape index: {}]   ;;  %s7471_s4 = inlined_call_operand.vmem [shape: bf16[32,512], index: 4, kind: input, shape index: {}]   ;;  %s7472_s5 = inlined_call_operand.hbm [shape: bf16[256,1024], index: 5, kind: input, shape index: {}]   ;;  %s7473_s6 = inlined_call_operand.vmem [shape: f32[1,512], index: 6, kind: input, shape index: {}]   ;;  %s7474_s7 = inlined_call_operand.vmem [shape: f32[1,512], index: 7, kind: input, shape index: {}]   ;;  %s7475_s8 = inlined_call_operand.hbm [shape: f32[8,8,128], index: 8, kind: output, shape index: {0}]   ;;  %s7476_s9 = inlined_call_operand.hbm [shape: f32[8,8,128], index: 9, kind: output, shape index: {1}]  }
   0x1   :  { %7572 = sst [smem:[#allocation125_spill]] %s7472_s5 }
   0x2   :  { %7573 = sst [smem:[#allocation126_spill]] %s7476_s9 }
   0x3   :  { %15 = vsyncpa [#allocation7], 0 }
   0x4   :  { %16 = vsyncpa [#allocation8], 0 }
   0x5   :  { %18 = vsyncpa [#allocation8 + $0x1], 0 }
   0x6   :  { %19 = vsyncpa [#allocation11], 0 }
   0x7   :  { %21 = vsyncpa [#allocation11 + $0x1], 0  ;;  %s6306_s30 = smov 0   ;;  %s6308_s10 = smov 0  }
   0x8   :  { %s6310_s11 = smov 0   ;;  %s6312_s12 = smov 0  }
   0x9   :  { %s6314_s13 = smov 0   ;;  %s6316_s14 = smov 0  }
   0xa   :  { %s6318_s15 = smov 0   ;;  %s6320_s16 = smov 0  }
   0xb   :  { %s6322_s17 = smov 0  }
   0xc LB: > { %7574 = sst [smem:[#allocation15_spill]] %s6213_s30  ;;  %s5185_s18 = sadd.s32 4294967295, %s6245_s17   ;;  %s6245_s17 = sphi %s6322_s17, %s27_s17   ;;  %s6241_s16 = sphi %s6320_s16, %s7818_s16   ;;  %s6237_s15 = sphi %s6318_s15, %s7817_s15   ;;  %s6233_s14 = sphi %s6316_s14, %s7816_s14   ;;  %s6229_s13 = sphi %s6314_s13, %s7822_s13   ;;  %s6225_s12 = sphi %s6312_s12, %s7821_s12   ;;  %s6221_s11 = sphi %s6310_s11, %s7814_s11   ;;  %s6217_s10 = sphi %s6308_s10, %s7820_s10   ;;  %s6213_s30 = sphi %s6306_s30, %s7819_s30  }
   0xd   : > { %7575 = sst [smem:[#allocation16_spill]] %s6221_s11  ;;  %s5186_s19 = sadd.s32 4294967294, %s6245_s17  }
   0xe   : > { %7576 = sst [smem:[#allocation17_spill]] %s6225_s12  ;;  %s36_s20 = sadd.s32 1, %s6241_s16 }
   0xf   : > { %7577 = sst [smem:[#allocation18_spill]] %s6233_s14  ;;  %s241_s21 = sadd.s32 1, %s6233_s14 }
  0x10   : > { %7578 = sst [smem:[#allocation19_spill]] %s6241_s16  ;;  %p37_p0 = scmp.ge.s32.totalorder %s36_s20, 2 }
  0x11   : > { %p251_p1 = scmp.ne.s32.totalorder %s6233_s14, %s6229_s13  ;;  %p6357_p2 = scmp.eq.s32.totalorder %s5185_s18, 1 }
  0x12   : > { %p257_p3 = scmp.ne.s32.totalorder %s6229_s13, %s6225_s12  ;;  %s7824_s20 = smov (%p37_p0, %s36_s20), 0 }
  0x13   : > { %7580 = sst [smem:[#allocation20_spill]] %s7824_s20  ;;  %p6367_p4 = por %p6357_p2, %p251_p1 }
  0x14   : > { %p6371_p5 = scmp.eq.s32.totalorder %s5186_s19, 1  ;;  %s236_s25 = ssub.s32 %s6241_s16, %s7824_s20 }
  0x15   : > { %s7581_s23 = scalar_select %p6367_p4, 1, 0 }
  0x16   : > { %s264_s26 = ssub.s32 1, %s6241_s16  ;;  %p239_p6 = scmp.eq.s32.totalorder %s236_s25, 0 }
  0x17   : > { %p6380_p7 = por %p6371_p5, %p257_p3  ;;  %s265_s28 = ssub.s32 1, %s7824_s20 }
  0x18   : > { %s271_s29 = sadd.s32 1, %s6221_s11  ;;  %s266_s9 = ssub.s32 %s264_s26, %s265_s28 }
  0x19   : > { %s7583_s27 = scalar_select %p6380_p7, 1, 0 }
  0x1a   : > { %s6387_s12 = scalar_select %p239_p6, %s6233_s14, %s241_s21  }
  0x1b   : > { %7584 = sst [smem:[#allocation21_spill]] %s7583_s27  ;;  %p281_p8 = scmp.ne.s32.totalorder %s6221_s11, %s6217_s10 }
  0x1c   : > { %7585 = sst [smem:[#allocation22_spill]] %s6387_s12  ;;  %p269_p9 = scmp.eq.s32.totalorder %s266_s9, 0 }
  0x1d   : > { %p287_p10 = scmp.ne.s32.totalorder %s6217_s10, %s6213_s30  ;;  %p6395_p11 = por %p281_p8, %p6357_p2 }
  0x1e   : > { %p5187_p12 = scmp.ge.s32.totalorder %s6245_s17, 1  ;;  %p295_p0 = scmp.lt.s32.totalorder %s6245_s17, 3 }
  0x1f   : > { %s7586_s19 = scalar_select %p6395_p11, 1, 0 }
  0x20   : > { %s6401_s25 = scalar_select %p269_p9, %s6221_s11, %s271_s29  }
  0x21   : > { %p6405_p13 = por %p287_p10, %p6371_p5  ;;  %p6410_p1 = scmp.eq.s32.totalorder %s5185_s18, 0 }
  0x22   : > { %7587 = sst [smem:[#allocation23_spill]] %s6401_s25  ;;  %p6414_p3 = pnand %p5187_p12, %p295_p0 }
  0x23   : > { %s7588_s16 = scalar_select %p6405_p13, 1, 0 }
  0x24   : > { %s7590_s21 = scalar_select %p6410_p1, 1, 0 }
  0x25   : > { %7589 = sst [smem:[#allocation24_spill]] %s7588_s16  ;;  %s6247_s22 = smov [#allocation6]  }
  0x26   : > { %s7591_s9 = scalar_select %p6414_p3, 1, 0 }
  0x27   : > { %s313_s26 = sshll.u32 %s6247_s22, 4  ;;  %p5828_p2 = pneg %p6414_p3  ;;  %s314_s26 = int_to_ptr.vmem [resolvable:$true] %s313_s26 }
  0x28   : > { %s7593_s5 = sld [smem:[#allocation125_spill]] }
  0x29   : > { %p6422_p5 = pnand %p6410_p1, %p5828_p2 }
  0x2b   : > { %p6081_p8 = pneg %p6422_p5 }
  0x2e   : > { %s6079_s29 = scalar_lea.hbm %s7593_s5, 16384 }
  0x2f   : > { %p6080_p6 = scmp.ne.s32.totalorder %s7593_s5, %s6079_s29  ;;  %p6086_p12 = scmp.lt.u32.totalorder %s6079_s29, %s7593_s5 }
  0x31   : > { %p6082_p9 = pnand %p6081_p8, %p6080_p6 }
  0x33   : > { %p6083_p10 = pneg %p6082_p9 }
  0x35   : > { %p6088_p0 = pnand %p6086_p12, %p6083_p10 }
  0x37   : > { %6091 = shalt.err (!%p6088_p0)
}
  0x38   : > { %s6092_s25 = scalar_lea.vmem %s314_s26, 16384  ;;  %p6100_p11 = scmp.lt.s32.totalorder %s314_s26, %s314_s26 }
  0x39   : > { %p6093_p2 = scmp.ne.s32.totalorder %s314_s26, %s6092_s25  ;;  %p6101_p4 = scmp.lt.s32.totalorder %s6092_s25, %s6092_s25 }
  0x3b   : > { %p6095_p13 = pnand %p6093_p2, %p6081_p8  ;;  %p6102_p1 = por %p6101_p4, %p6100_p11 }
  0x3d   : > { %p6096_p7 = pneg %p6095_p13 }
  0x3f   : > { %p6103_p3 = pnand %p6102_p1, %p6096_p7 }
  0x41   : > { %6106 = shalt.err (!%p6103_p3)
}
  0x42   : > { %s6248_s12 = smov 512   ;;  %s6249_s20 = smov 32  }
  0x43   : > { %5831 = dma.hbm_to_vmem [thread:$0]  (!%p6422_p5), %s7593_s5, 16384, %s314_s26, [#allocation7], %s6248_s12, %s6248_s12, %s6249_s20  }
  0x44   : > { %p7594_p6 = scmp.ne.s32.totalorder %s7591_s9, 0 }
  0x46   : > { %377 = sbr.rel (%p7594_p6) target bundleno = 1500 (0x5dc), region = 52 }
  0x4d   : > { %p7595_p9 = scmp.ne.s32.totalorder %s7590_s21, 0 }
  0x4f   : > { %6200 = dma.done.wait (%p7595_p9), [#allocation7], 16384  }
  0x50   : > { %6202 = vsyncadd (%p7595_p9), [#allocation7], 4294950912  ;;  %s7488_s14 = sand.u32 1, %s6229_s13   ;;  %s7489_s25 = sand.u32 1, %s6217_s10  }
  0x51   : > { %s5192_s26 = sshll.u32 %s7488_s14, 5  ;;  %s5193_s9 = sshll.u32 %s7489_s25, 5 }
  0x52   : > { %s7492_s24 = ssub.s32 1, %s6237_s15  ;;  %s5196_s29 = sshll.u32 %s6237_s15, 2 }
  0x53   : > { %s5194_s22 = sshll.u32 %s7492_s24, 2  ;;  %p455_p4 = scmp.lt.s32.totalorder %s5196_s29, 7 }
  0x54   : > { %p443_p7 = scmp.lt.s32.totalorder %s5194_s22, 7  ;;  %s6473_s27 = scalar_lea.vmem [#allocation9], %s5192_s26 }
  0x55   : > { %s7826_s29 = smov (!%p455_p4, %s5196_s29), 7  ;;  %p5200_p11 = scmp.ne.s32.totalorder %s6237_s15, 0 }
  0x56   : > { %s7828_s22 = smov (!%p443_p7, %s5194_s22), 7  ;;  %s5197_s21 = sshll.u32 %s7826_s29, 2  ;;  %v6250_v0 = vmov (!%p5200_p11), 0.0  }
  0x57   : > { %s5195_s12 = sshll.u32 %s7828_s22, 3  ;;  %s6461_s28 = scalar_lea.vmem %s7468_s1, %s5197_s21  ;;  %482 = vst [vmem:[#allocation4] sm:$0xff] (!%p5200_p11), %v6250_v0  ;;  %483 = vst [vmem:[#allocation4 + $0x8] sm:$0xff] (!%p5200_p11), %v6250_v0 }
  0x58   : > { %s6466_s14 = scalar_lea.vmem %s7467_s0, %s5195_s12  ;;  %s5199_s25 = sshll.u32 %s7828_s22, 2  ;;  %484 = vst [vmem:[#allocation5] sm:$0xff] (!%p5200_p11), %v6250_v0  ;;  %485 = vst [vmem:[#allocation5 + $0x8] sm:$0xff] (!%p5200_p11), %v6250_v0 }
  0x59   : > { %s6471_s24 = scalar_lea.vmem %s7469_s2, %s5199_s25  ;;  %s6475_s29 = scalar_lea.vmem [#allocation10], %s5193_s9 }
  0x5a   : > { %481 = sbr.rel (%p5200_p11) target bundleno = 97 (0x61), region = 60 }
  0x61 PF: > { %v5923_v1 = vld [vmem:[%s7470_s3 + $0x4] ss:$16 sps:$4 sm:$0xff]   ;;  %v5925_v2 = vld [vmem:[%s7470_s3 + $0xc] ss:$16 sps:$4 sm:$0xff]   ;;  %v7494_v3 = vmov 0   ;;  %vm570_vm0 = vcmask 261120  }
  0x62   : > { %609 = vmatprep.mubr.bf16.mxu0 %v7494_v3  ;;  %662 = vmatprep.mubr.bf16.mxu1 %v7494_v3  ;;  %v5927_v4 = vld [vmem:[%s7470_s3] ss:$16 sps:$4 sm:$0xff]   ;;  %v5928_v5 = vld [vmem:[%s7470_s3 + $0x8] ss:$16 sps:$4 sm:$0xff]   ;;  %v5929_v6 = vld [vmem:[%s7470_s3 + $0x24] ss:$16 sps:$4 sm:$0xff]  }
  0x63   : > { %577 = vmatprep.subr.bf16.mxu0 %v5923_v1  ;;  %5921 = vset.pattern.permute.xlu0 %v7494_v3  ;;  %v5931_v7 = vld [vmem:[%s7470_s3 + $0x2c] ss:$16 sps:$4 sm:$0xff]   ;;  %v5933_v8 = vld [vmem:[%s7470_s3 + $0x20] ss:$16 sps:$4 sm:$0xff]   ;;  %v5934_v9 = vld [vmem:[%s7470_s3 + $0x28] ss:$16 sps:$4 sm:$0xff]  }
  0x64   : > { %630 = vmatprep.subr.bf16.mxu1 %v5925_v2  ;;  %5922 = vset.pattern.permute.xlu1 %v7494_v3  ;;  %v5935_v10 = vld [vmem:[%s6461_s28] sm:$0xff]   ;;  %v5941_v13 = vld [vmem:[%s7471_s4 + $0xc] ss:$16 sps:$4 sm:$0xff]   ;;  %v5939_v14 = vld [vmem:[%s7471_s4 + $0x8] ss:$16 sps:$4 sm:$0xff]   ;;  %s5004_s20 = sshll.u32 %s6473_s27, 4  ;;  %s7354_s20 = int_to_ptr.vmem [resolvable:$true] %s5004_s20 }
  0x65   : > { %578 = vmatpush1.bf16.msra.mxu0 %v5927_v4  ;;  %631 = vmatpush1.bf16.msra.mxu1 %v5928_v5  ;;  %v5938_v11 = vld [vmem:[%s7471_s4 + $0x4] ss:$16 sps:$4 sm:$0xff]   ;;  %v5936_v12 = vld [vmem:[%s7471_s4] ss:$16 sps:$4 sm:$0xff]   ;;  %v5948_v17 = vld [vmem:[%s7471_s4 + $0x2c] ss:$16 sps:$4 sm:$0xff]  }
  0x66   : > { %579 = vmatprep.subr.bf16.mxu0 %v5929_v6  ;;  %632 = vmatprep.subr.bf16.mxu1 %v5931_v7  ;;  %v5945_v15 = vld [vmem:[%s7471_s4 + $0x24] ss:$16 sps:$4 sm:$0xff]   ;;  %v5943_v16 = vld [vmem:[%s7471_s4 + $0x20] ss:$16 sps:$4 sm:$0xff]   ;;  %v5946_v19 = vld [vmem:[%s7471_s4 + $0x28] ss:$16 sps:$4 sm:$0xff]  }
  0x67   : > { %v917_v18 = vld [vmem:[#allocation6] sm:$0xff]  ;;  %v918_v21 = vld [vmem:[#allocation6 + $0x8] sm:$0xff]  ;;  %s7797_s30 = sand.u32 1, %s6229_s13   ;;  %s6107_s25 = scalar_lea.vmem %s7354_s20, 512 }
  0x68   : > { %v921_v20 = vld [vmem:[#allocation6 + $0x20] sm:$0xff]  ;;  %v922_v23 = vld [vmem:[#allocation6 + $0x28] sm:$0xff]  ;;  %s7359_s16 = scalar_lea.sflag [#allocation8], %s7797_s30  ;;  %p6108_p13 = scmp.ne.s32.totalorder %s7354_s20, %s6107_s25 }
  0x69   : > { %580 = vmatpush1.bf16.msra.mxu0 %v5933_v8  ;;  %633 = vmatpush1.bf16.msra.mxu1 %v5934_v9  ;;  %v5230_v22 = vcombine.high %v917_v18, %v921_v20  ;;  %v5942_v24 = vld [vmem:[%s6461_s28 + $0x8] sm:$0xff]   ;;  %v5232_v25 = vcombine.high %v918_v21, %v922_v23  ;;  %v925_v26 = vld [vmem:[#allocation6 + $0x40] sm:$0xff]  ;;  %v5229_v31 = vcombine.low %v917_v18, %v921_v20  ;;  %p7798_p1 = scmp.ne.s32.totalorder %s7581_s23, 0  ;;  %s6252_s26 = smov [#allocation9]  }
  0x6a   : > { %789 = vmatprep.subr.bf16.mxu0 %v5938_v11  ;;  %842 = vmatprep.subr.bf16.mxu1 %v5941_v13  ;;  %v929_v27 = vld [vmem:[#allocation6 + $0x60] sm:$0xff]  ;;  %v926_v28 = vld [vmem:[#allocation6 + $0x48] sm:$0xff]  ;;  %v5231_v32 = vcombine.low %v918_v21, %v922_v23  ;;  %s6111_s9 = sshll.u32 %s6252_s26, 4  ;;  %s6112_s9 = int_to_ptr.vmem [resolvable:$false] %s6111_s9 }
  0x6b   : > { %v930_v29 = vld [vmem:[#allocation6 + $0x68] sm:$0xff]  ;;  %v5949_v30 = vld [vmem:[%s6471_s24] sm:$0xff]   ;;  %v5238_v33 = vcombine.high %v925_v26, %v929_v27  ;;  %v5237_v39 = vcombine.low %v925_v26, %v929_v27  ;;  %p6109_p3 = pnand %p6108_p13, %p7798_p1  ;;  %s6113_s22 = scalar_lea.vmem %s6112_s9, 1024 }
  0x6c   : > { %5211 = vmatmul.mubr.msk.bf16.vlgmr.msra.gmra.mrb[0].mxu0 %vm570_vm0, %v5935_v10  ;;  %5213 = vmatmul.mubr.msk.bf16.vlgmr.msra.gmra.mrb[0].mxu1 %vm570_vm0, %v5935_v10  ;;  %v5240_v34 = vcombine.high %v926_v28, %v930_v29  ;;  %v933_v35 = vld [vmem:[#allocation6 + $0x80] sm:$0xff]  ;;  %v934_v37 = vld [vmem:[#allocation6 + $0x88] sm:$0xff]  ;;  %v5239_v40 = vcombine.low %v926_v28, %v930_v29  ;;  %p6114_p8 = scmp.lt.s32.totalorder %s7354_s20, %s6112_s9  ;;  %p6115_p10 = scmp.lt.s32.totalorder %s6113_s22, %s6107_s25 }
  0x6d   : > { %790 = vmatpush1.bf16.msra.mxu0 %v5936_v12  ;;  %619 = vmatprep.mubr.bf16.mxu0 %v7494_v3  ;;  %v937_v36 = vld [vmem:[#allocation6 + $0xa0] sm:$0xff]  ;;  %v938_v38 = vld [vmem:[#allocation6 + $0xa8] sm:$0xff]  ;;  %p6110_p5 = pneg %p6109_p3 }
  0x6e   : > { %672 = vmatprep.mubr.bf16.mxu1 %v7494_v3  ;;  %791 = vmatprep.subr.bf16.mxu0 %v5945_v15  ;;  %v5246_v41 = vcombine.high %v933_v35, %v937_v36  ;;  %v5248_v42 = vcombine.high %v934_v37, %v938_v38  ;;  %v941_v43 = vld [vmem:[#allocation6 + $0xc0] sm:$0xff]  ;;  %v942_v45 = vld [vmem:[#allocation6 + $0xc8] sm:$0xff]  ;;  %v5245_v47 = vcombine.low %v933_v35, %v937_v36  ;;  %p6116_p12 = por %p6115_p10, %p6114_p8 }
  0x6f   : > { %843 = vmatpush1.bf16.msra.mxu1 %v5939_v14  ;;  %v945_v44 = vld [vmem:[#allocation6 + $0xe0] sm:$0xff]  ;;  %v946_v46 = vld [vmem:[#allocation6 + $0xe8] sm:$0xff]  ;;  %v5247_v48 = vcombine.low %v934_v37, %v938_v38 }
  0x70   : > { %844 = vmatprep.subr.bf16.mxu1 %v5948_v17  ;;  %v5254_v49 = vcombine.high %v941_v43, %v945_v44  ;;  %v5256_v50 = vcombine.high %v942_v45, %v946_v46  ;;  %v949_v51 = vld [vmem:[#allocation6 + $0x100] sm:$0xff]  ;;  %v5950_v52 = vld [vmem:[%s6471_s24 + $0x8] sm:$0xff]   ;;  %v5253_v56 = vcombine.low %v941_v43, %v945_v44  ;;  %v5255_v57 = vcombine.low %v942_v45, %v946_v46  ;;  %p6117_p0 = pnand %p6116_p12, %p6110_p5 }
  0x71   : > { %792 = vmatpush1.bf16.msra.mxu0 %v5943_v16  ;;  %v953_v53 = vld [vmem:[#allocation6 + $0x120] sm:$0xff]  ;;  %v950_v54 = vld [vmem:[#allocation6 + $0x108] sm:$0xff] }
  0x72   : > { %1685 = vmatprep.subr.bf16.mxu0 %v5230_v22  ;;  %v954_v55 = vld [vmem:[#allocation6 + $0x128] sm:$0xff]  ;;  %v5262_v59 = vcombine.high %v949_v51, %v953_v53  ;;  %v957_v61 = vld [vmem:[#allocation6 + $0x140] sm:$0xff]  ;;  %v5261_v2 = vcombine.low %v949_v51, %v953_v53 }
  0x73   : > { %845 = vmatpush1.bf16.msra.mxu1 %v5946_v19  ;;  %v912_v58 = vld [vmem:[#allocation4 + $0x8] sm:$0xff]  ;;  %v5264_v60 = vcombine.high %v950_v54, %v954_v55  ;;  %v961_v63 = vld [vmem:[#allocation6 + $0x160] sm:$0xff]  ;;  %v5263_v4 = vcombine.low %v950_v54, %v954_v55 }
  0x74   : > { %5212 = vmatmul.mubr.msk.bf16.gmra.mrb[4].mxu0 %vm570_vm0, %v5942_v24  ;;  %5214 = vmatmul.mubr.msk.bf16.gmra.mrb[4].mxu1 %vm570_vm0, %v5942_v24  ;;  %v6548_v62 = vpack.c.bf16 %v912_v58, %v912_v58  ;;  %v958_v0 = vld [vmem:[#allocation6 + $0x148] sm:$0xff]  ;;  %v5270_v5 = vcombine.high %v957_v61, %v961_v63  ;;  %v965_v7 = vld [vmem:[#allocation6 + $0x180] sm:$0xff]  ;;  %v5269_v11 = vcombine.low %v957_v61, %v961_v63 }
  0x75   : > { %821 = vmatprep.mubr.bf16.mxu0 %v7494_v3  ;;  %874 = vmatprep.mubr.bf16.mxu1 %v7494_v3  ;;  %v962_v1 = vld [vmem:[#allocation6 + $0x168] sm:$0xff]  ;;  %v969_v8 = vld [vmem:[#allocation6 + $0x1a0] sm:$0xff] }
  0x76   : > { %1726 = vmatprep.subr.bf16.mxu1 %v5232_v25  ;;  %v5272_v6 = vcombine.high %v958_v0, %v962_v1  ;;  %v966_v9 = vld [vmem:[#allocation6 + $0x188] sm:$0xff]  ;;  %v5271_v12 = vcombine.low %v958_v0, %v962_v1  ;;  %v5278_v13 = vcombine.high %v965_v7, %v969_v8  ;;  %v973_v15 = vld [vmem:[#allocation6 + $0x1c0] sm:$0xff]  ;;  %v5277_v19 = vcombine.low %v965_v7, %v969_v8 }
  0x77   : > { %v970_v10 = vld [vmem:[#allocation6 + $0x1a8] sm:$0xff]  ;;  %v977_v16 = vld [vmem:[#allocation6 + $0x1e0] sm:$0xff] }
  0x78   : > { %v5280_v14 = vcombine.high %v966_v9, %v970_v10  ;;  %v974_v17 = vld [vmem:[#allocation6 + $0x1c8] sm:$0xff]  ;;  %v5279_v20 = vcombine.low %v966_v9, %v970_v10  ;;  %v5286_v21 = vcombine.high %v973_v15, %v977_v16  ;;  %v981_v23 = vld [vmem:[#allocation6 + $0x200] sm:$0xff]  ;;  %v5285_v27 = vcombine.low %v973_v15, %v977_v16 }
  0x79   : > { %v978_v18 = vld [vmem:[#allocation6 + $0x1e8] sm:$0xff]  ;;  %v985_v24 = vld [vmem:[#allocation6 + $0x220] sm:$0xff] }
  0x7a   : > { %v5288_v22 = vcombine.high %v974_v17, %v978_v18  ;;  %v982_v25 = vld [vmem:[#allocation6 + $0x208] sm:$0xff]  ;;  %v5287_v28 = vcombine.low %v974_v17, %v978_v18  ;;  %v5294_v29 = vcombine.high %v981_v23, %v985_v24  ;;  %v5293_v35 = vcombine.low %v981_v23, %v985_v24  ;;  %v1013_v55 = vld [vmem:[#allocation6 + $0x300] sm:$0xff] }
  0x7b   : > { %v986_v26 = vld [vmem:[#allocation6 + $0x228] sm:$0xff]  ;;  %v1021_v0 = vld [vmem:[#allocation6 + $0x340] sm:$0xff] }
  0x7c   : > { %5225 = vmatmul.mubr.msk.bf16.vlgmr.msra.gmra.mrb[8].mxu0 %vm570_vm0, %v5949_v30  ;;  %5227 = vmatmul.mubr.msk.bf16.vlgmr.msra.gmra.mrb[8].mxu1 %vm570_vm0, %v5949_v30  ;;  %v5296_v30 = vcombine.high %v982_v25, %v986_v26  ;;  %v5295_v36 = vcombine.low %v982_v25, %v986_v26  ;;  %v1018_v58 = vld [vmem:[#allocation6 + $0x328] sm:$0xff]  ;;  %v1025_v1 = vld [vmem:[#allocation6 + $0x360] sm:$0xff]  ;;  %v919_v25 = vld [vmem:[#allocation6 + $0x10] sm:$0xff] }
  0x7d   : > { %1686 = vmatpush1.bf16.msra.mxu0 %v5229_v31  ;;  %1727 = vmatpush1.bf16.msra.mxu1 %v5231_v32  ;;  %v989_v31 = vld [vmem:[#allocation6 + $0x240] sm:$0xff]  ;;  %v5334_v7 = vcombine.high %v1021_v0, %v1025_v1  ;;  %v923_v26 = vld [vmem:[#allocation6 + $0x30] sm:$0xff] }
  0x7e   : > { %1687 = vmatprep.subr.bf16.mxu0 %v5238_v33  ;;  %1728 = vmatprep.subr.bf16.mxu1 %v5240_v34  ;;  %v993_v32 = vld [vmem:[#allocation6 + $0x260] sm:$0xff]  ;;  %v990_v33 = vld [vmem:[#allocation6 + $0x248] sm:$0xff] }
  0x7f   : > { %831 = vmatprep.mubr.bf16.mxu0 %v7494_v3  ;;  %884 = vmatprep.mubr.bf16.mxu1 %v7494_v3  ;;  %v994_v34 = vld [vmem:[#allocation6 + $0x268] sm:$0xff]  ;;  %v5302_v37 = vcombine.high %v989_v31, %v993_v32  ;;  %v5301_v43 = vcombine.low %v989_v31, %v993_v32  ;;  %v1029_v9 = vld [vmem:[#allocation6 + $0x380] sm:$0xff]  ;;  %v5234_v32 = vcombine.high %v919_v25, %v923_v26 }
  0x80   : > { %v5304_v38 = vcombine.high %v990_v33, %v994_v34  ;;  %v5303_v44 = vcombine.low %v990_v33, %v994_v34  ;;  %v1033_v10 = vld [vmem:[#allocation6 + $0x3a0] sm:$0xff]  ;;  %v927_v34 = vld [vmem:[#allocation6 + $0x50] sm:$0xff] }
  0x81   : > { %1688 = vmatpush1.bf16.msra.mxu0 %v5237_v39  ;;  %1729 = vmatpush1.bf16.msra.mxu1 %v5239_v40  ;;  %v997_v39 = vld [vmem:[#allocation6 + $0x280] sm:$0xff]  ;;  %v5342_v15 = vcombine.high %v1029_v9, %v1033_v10 }
  0x82   : > { %1689 = vmatprep.subr.bf16.mxu0 %v5246_v41  ;;  %1730 = vmatprep.subr.bf16.mxu1 %v5248_v42  ;;  %v1001_v40 = vld [vmem:[#allocation6 + $0x2a0] sm:$0xff]  ;;  %v998_v41 = vld [vmem:[#allocation6 + $0x288] sm:$0xff] }
  0x83   : > { %v1002_v42 = vld [vmem:[#allocation6 + $0x2a8] sm:$0xff]  ;;  %v5310_v45 = vcombine.high %v997_v39, %v1001_v40  ;;  %v5309_v51 = vcombine.low %v997_v39, %v1001_v40  ;;  %v1037_v17 = vld [vmem:[#allocation6 + $0x3c0] sm:$0xff]  ;;  %v5233_v39 = vcombine.low %v919_v25, %v923_v26 }
  0x84   : > { %5226 = vmatmul.mubr.msk.bf16.gmra.mrb[12].mxu0 %vm570_vm0, %v5950_v52  ;;  %5228 = vmatmul.mubr.msk.bf16.gmra.mrb[12].mxu1 %vm570_vm0, %v5950_v52  ;;  %v5312_v46 = vcombine.high %v998_v41, %v1002_v42  ;;  %v5311_v52 = vcombine.low %v998_v41, %v1002_v42  ;;  %v1041_v18 = vld [vmem:[#allocation6 + $0x3e0] sm:$0xff] }
  0x85   : > { %1690 = vmatpush1.bf16.msra.mxu0 %v5245_v47  ;;  %1731 = vmatpush1.bf16.msra.mxu1 %v5247_v48  ;;  %v1005_v47 = vld [vmem:[#allocation6 + $0x2c0] sm:$0xff]  ;;  %v5350_v23 = vcombine.high %v1037_v17, %v1041_v18 }
  0x86   : > { %1691 = vmatprep.subr.bf16.mxu0 %v5254_v49  ;;  %1732 = vmatprep.subr.bf16.mxu1 %v5256_v50  ;;  %v1009_v48 = vld [vmem:[#allocation6 + $0x2e0] sm:$0xff]  ;;  %v1006_v49 = vld [vmem:[#allocation6 + $0x2c8] sm:$0xff] }
  0x87   : > { %1717 = vmatprep.mubr.bf16.mxu0 %v6548_v62  ;;  %1758 = vmatprep.mubr.bf16.mxu1 %v6548_v62  ;;  %v1010_v50 = vld [vmem:[#allocation6 + $0x2e8] sm:$0xff]  ;;  %v5318_v53 = vcombine.high %v1005_v47, %v1009_v48  ;;  %v911_v31 = vld [vmem:[#allocation4] sm:$0xff] }
  0x88   : > { %v5320_v54 = vcombine.high %v1006_v49, %v1010_v50 }
  0x89   : > { %1692 = vmatpush1.bf16.msra.mxu0 %v5253_v56  ;;  %1733 = vmatpush1.bf16.msra.mxu1 %v5255_v57  ;;  %v1017_v56 = vld [vmem:[#allocation6 + $0x320] sm:$0xff]  ;;  %v1014_v57 = vld [vmem:[#allocation6 + $0x308] sm:$0xff] }
  0x8a   : > { %1693 = vmatprep.subr.bf16.mxu0 %v5262_v59  ;;  %1734 = vmatprep.subr.bf16.mxu1 %v5264_v60  ;;  %v5317_v59 = vcombine.low %v1005_v47, %v1009_v48  ;;  %v5319_v60 = vcombine.low %v1006_v49, %v1010_v50  ;;  %v5326_v61 = vcombine.high %v1013_v55, %v1017_v56 }
  0x8b   : > { %v5328_v63 = vcombine.high %v1014_v57, %v1018_v58 }
  0x8d   : > { %1694 = vmatpush1.bf16.msra.mxu0 %v5261_v2  ;;  %1735 = vmatpush1.bf16.msra.mxu1 %v5263_v4  ;;  %v1022_v2 = vld [vmem:[#allocation6 + $0x348] sm:$0xff] }
  0x8e   : > { %1695 = vmatprep.subr.bf16.mxu0 %v5270_v5  ;;  %1736 = vmatprep.subr.bf16.mxu1 %v5272_v6  ;;  %v1026_v4 = vld [vmem:[#allocation6 + $0x368] sm:$0xff]  ;;  %v5325_v5 = vcombine.low %v1013_v55, %v1017_v56  ;;  %v5327_v6 = vcombine.low %v1014_v57, %v1018_v58 }
  0x8f   : > { %v5336_v8 = vcombine.high %v1022_v2, %v1026_v4 }
  0x91   : > { %1696 = vmatpush1.bf16.msra.mxu0 %v5269_v11  ;;  %1737 = vmatpush1.bf16.msra.mxu1 %v5271_v12  ;;  %v1030_v11 = vld [vmem:[#allocation6 + $0x388] sm:$0xff] }
  0x92   : > { %1697 = vmatprep.subr.bf16.mxu0 %v5278_v13  ;;  %1738 = vmatprep.subr.bf16.mxu1 %v5280_v14  ;;  %v1034_v12 = vld [vmem:[#allocation6 + $0x3a8] sm:$0xff]  ;;  %v5333_v13 = vcombine.low %v1021_v0, %v1025_v1  ;;  %v5335_v14 = vcombine.low %v1022_v2, %v1026_v4  ;;  %v959_v4 = vld [vmem:[#allocation6 + $0x150] sm:$0xff] }
  0x93   : > { %v5344_v16 = vcombine.high %v1030_v11, %v1034_v12 }
  0x95   : > { %1698 = vmatpush1.bf16.msra.mxu0 %v5277_v19  ;;  %1739 = vmatpush1.bf16.msra.mxu1 %v5279_v20  ;;  %v1038_v19 = vld [vmem:[#allocation6 + $0x3c8] sm:$0xff] }
  0x96   : > { %1699 = vmatprep.subr.bf16.mxu0 %v5286_v21  ;;  %1740 = vmatprep.subr.bf16.mxu1 %v5288_v22  ;;  %v1042_v20 = vld [vmem:[#allocation6 + $0x3e8] sm:$0xff]  ;;  %v5341_v21 = vcombine.low %v1029_v9, %v1033_v10  ;;  %v5343_v22 = vcombine.low %v1030_v11, %v1034_v12  ;;  %v967_v12 = vld [vmem:[#allocation6 + $0x190] sm:$0xff] }
  0x97   : > { %v5352_v24 = vcombine.high %v1038_v19, %v1042_v20 }
  0x99   : > { %1700 = vmatpush1.bf16.msra.mxu0 %v5285_v27  ;;  %1741 = vmatpush1.bf16.msra.mxu1 %v5287_v28  ;;  %v920_v27 = vld [vmem:[#allocation6 + $0x18] sm:$0xff] }
  0x9a   : > { %1701 = vmatprep.subr.bf16.mxu0 %v5294_v29  ;;  %1742 = vmatprep.subr.bf16.mxu1 %v5296_v30  ;;  %v924_v28 = vld [vmem:[#allocation6 + $0x38] sm:$0xff]  ;;  %v5349_v29 = vcombine.low %v1037_v17, %v1041_v18  ;;  %v5351_v30 = vcombine.low %v1038_v19, %v1042_v20  ;;  %v975_v20 = vld [vmem:[#allocation6 + $0x1d0] sm:$0xff] }
  0x9b   : > { %v5236_v33 = vcombine.high %v920_v27, %v924_v28  ;;  %v5235_v40 = vcombine.low %v920_v27, %v924_v28  ;;  %v983_v28 = vld [vmem:[#allocation6 + $0x210] sm:$0xff] }
  0x9d   : > { %1702 = vmatpush1.bf16.msra.mxu0 %v5293_v35  ;;  %1743 = vmatpush1.bf16.msra.mxu1 %v5295_v36  ;;  %v931_v35 = vld [vmem:[#allocation6 + $0x70] sm:$0xff]  ;;  %v928_v36 = vld [vmem:[#allocation6 + $0x58] sm:$0xff] }
  0x9e   : > { %1703 = vmatprep.subr.bf16.mxu0 %v5302_v37  ;;  %1744 = vmatprep.subr.bf16.mxu1 %v5304_v38  ;;  %v932_v37 = vld [vmem:[#allocation6 + $0x78] sm:$0xff]  ;;  %v6552_v38 = vpack.c.bf16 %v911_v31, %v911_v31  ;;  %v5242_v41 = vcombine.high %v927_v34, %v931_v35  ;;  %v5241_v47 = vcombine.low %v927_v34, %v931_v35 }
  0x9f   : > { %v5244_v42 = vcombine.high %v928_v36, %v932_v37  ;;  %v5243_v48 = vcombine.low %v928_v36, %v932_v37  ;;  %v988_v31 = vld [vmem:[#allocation6 + $0x238] sm:$0xff] }
  0xa1   : > { %1704 = vmatpush1.bf16.msra.mxu0 %v5301_v43  ;;  %1745 = vmatpush1.bf16.msra.mxu1 %v5303_v44  ;;  %v935_v43 = vld [vmem:[#allocation6 + $0x90] sm:$0xff] }
  0xa2   : > { %1705 = vmatprep.subr.bf16.mxu0 %v5310_v45  ;;  %1746 = vmatprep.subr.bf16.mxu1 %v5312_v46  ;;  %v939_v44 = vld [vmem:[#allocation6 + $0xb0] sm:$0xff]  ;;  %v936_v45 = vld [vmem:[#allocation6 + $0x98] sm:$0xff] }
  0xa3   : > { %v940_v46 = vld [vmem:[#allocation6 + $0xb8] sm:$0xff]  ;;  %v5250_v49 = vcombine.high %v935_v43, %v939_v44  ;;  %v5249_v55 = vcombine.low %v935_v43, %v939_v44 }
  0xa4   : > { %v5252_v50 = vcombine.high %v936_v45, %v940_v46  ;;  %v5251_v56 = vcombine.low %v936_v45, %v940_v46  ;;  %v996_v43 = vld [vmem:[#allocation6 + $0x278] sm:$0xff] }
  0xa5   : > { %1706 = vmatpush1.bf16.msra.mxu0 %v5309_v51  ;;  %1747 = vmatpush1.bf16.msra.mxu1 %v5311_v52  ;;  %v943_v51 = vld [vmem:[#allocation6 + $0xd0] sm:$0xff] }
  0xa6   : > { %1707 = vmatprep.subr.bf16.mxu0 %v5318_v53  ;;  %1748 = vmatprep.subr.bf16.mxu1 %v5320_v54  ;;  %v947_v52 = vld [vmem:[#allocation6 + $0xf0] sm:$0xff]  ;;  %v944_v53 = vld [vmem:[#allocation6 + $0xd8] sm:$0xff] }
  0xa7   : > { %v948_v54 = vld [vmem:[#allocation6 + $0xf8] sm:$0xff]  ;;  %v5258_v57 = vcombine.high %v943_v51, %v947_v52  ;;  %v5257_v0 = vcombine.low %v943_v51, %v947_v52 }
  0xa8   : > { %v5260_v58 = vcombine.high %v944_v53, %v948_v54  ;;  %v5259_v1 = vcombine.low %v944_v53, %v948_v54  ;;  %v1000_v51 = vld [vmem:[#allocation6 + $0x298] sm:$0xff] }
  0xa9   : > { %1708 = vmatpush1.bf16.msra.mxu0 %v5317_v59  ;;  %1749 = vmatpush1.bf16.msra.mxu1 %v5319_v60  ;;  %v951_v59 = vld [vmem:[#allocation6 + $0x110] sm:$0xff]  ;;  %v1004_v52 = vld [vmem:[#allocation6 + $0x2b8] sm:$0xff] }
  0xaa   : > { %1709 = vmatprep.subr.bf16.mxu0 %v5326_v61  ;;  %1750 = vmatprep.subr.bf16.mxu1 %v5328_v63  ;;  %v955_v60 = vld [vmem:[#allocation6 + $0x130] sm:$0xff]  ;;  %v952_v61 = vld [vmem:[#allocation6 + $0x118] sm:$0xff] }
  0xab   : > { %v956_v63 = vld [vmem:[#allocation6 + $0x138] sm:$0xff]  ;;  %v5266_v2 = vcombine.high %v951_v59, %v955_v60 }
  0xac   : > { %v5267_v9 = vcombine.low %v952_v61, %v956_v63 }
  0xad   : > { %1710 = vmatpush1.bf16.msra.mxu0 %v5325_v5  ;;  %1751 = vmatpush1.bf16.msra.mxu1 %v5327_v6  ;;  %v963_v5 = vld [vmem:[#allocation6 + $0x170] sm:$0xff]  ;;  %v960_v6 = vld [vmem:[#allocation6 + $0x158] sm:$0xff] }
  0xae   : > { %1711 = vmatprep.subr.bf16.mxu0 %v5334_v7  ;;  %1752 = vmatprep.subr.bf16.mxu1 %v5336_v8  ;;  %v964_v7 = vld [vmem:[#allocation6 + $0x178] sm:$0xff]  ;;  %v5265_v8 = vcombine.low %v951_v59, %v955_v60  ;;  %v5274_v10 = vcombine.high %v959_v4, %v963_v5 }
  0xaf   : > { %v5276_v11 = vcombine.high %v960_v6, %v964_v7  ;;  %v5275_v17 = vcombine.low %v960_v6, %v964_v7  ;;  %v1008_v59 = vld [vmem:[#allocation6 + $0x2d8] sm:$0xff] }
  0xb0   : > { %v1012_v60 = vld [vmem:[#allocation6 + $0x2f8] sm:$0xff] }
  0xb1   : > { %1712 = vmatpush1.bf16.msra.mxu0 %v5333_v13  ;;  %1753 = vmatpush1.bf16.msra.mxu1 %v5335_v14  ;;  %v971_v13 = vld [vmem:[#allocation6 + $0x1b0] sm:$0xff]  ;;  %v968_v14 = vld [vmem:[#allocation6 + $0x198] sm:$0xff]  ;;  %v5323_v7 = vcombine.low %v1008_v59, %v1012_v60 }
  0xb2   : > { %1713 = vmatprep.subr.bf16.mxu0 %v5342_v15  ;;  %1754 = vmatprep.subr.bf16.mxu1 %v5344_v16  ;;  %v972_v15 = vld [vmem:[#allocation6 + $0x1b8] sm:$0xff]  ;;  %v5273_v16 = vcombine.low %v959_v4, %v963_v5  ;;  %v5282_v18 = vcombine.high %v967_v12, %v971_v13 }
  0xb3   : > { %v5284_v19 = vcombine.high %v968_v14, %v972_v15  ;;  %v5283_v25 = vcombine.low %v968_v14, %v972_v15  ;;  %v1016_v4 = vld [vmem:[#allocation6 + $0x318] sm:$0xff] }
  0xb4   : > { %v1020_v5 = vld [vmem:[#allocation6 + $0x338] sm:$0xff] }
  0xb5   : > { %1714 = vmatpush1.bf16.msra.mxu0 %v5341_v21  ;;  %1755 = vmatpush1.bf16.msra.mxu1 %v5343_v22  ;;  %v979_v21 = vld [vmem:[#allocation6 + $0x1f0] sm:$0xff]  ;;  %v976_v22 = vld [vmem:[#allocation6 + $0x1d8] sm:$0xff]  ;;  %v5331_v15 = vcombine.low %v1016_v4, %v1020_v5 }
  0xb6   : > { %1715 = vmatprep.subr.bf16.mxu0 %v5350_v23  ;;  %1756 = vmatprep.subr.bf16.mxu1 %v5352_v24  ;;  %v980_v23 = vld [vmem:[#allocation6 + $0x1f8] sm:$0xff]  ;;  %v5281_v24 = vcombine.low %v967_v12, %v971_v13  ;;  %v5290_v26 = vcombine.high %v975_v20, %v979_v21  ;;  %v5289_v34 = vcombine.low %v975_v20, %v979_v21 }
  0xb7   : > { %v5292_v27 = vcombine.high %v976_v22, %v980_v23  ;;  %v5291_v35 = vcombine.low %v976_v22, %v980_v23  ;;  %v1024_v12 = vld [vmem:[#allocation6 + $0x358] sm:$0xff] }
  0xb8   : > { %v1028_v13 = vld [vmem:[#allocation6 + $0x378] sm:$0xff] }
  0xb9   : > { %1716 = vmatpush1.bf16.msra.mxu0 %v5349_v29  ;;  %1757 = vmatpush1.bf16.msra.mxu1 %v5351_v30  ;;  %v987_v29 = vld [vmem:[#allocation6 + $0x230] sm:$0xff]  ;;  %v984_v30 = vld [vmem:[#allocation6 + $0x218] sm:$0xff]  ;;  %v5339_v23 = vcombine.low %v1024_v12, %v1028_v13 }
  0xba   : > { %1767 = vmatprep.subr.bf16.mxu0 %v5234_v32  ;;  %1808 = vmatprep.subr.bf16.mxu1 %v5236_v33  ;;  %v5363_v32 = vld [vmem:[%s6466_s14 + $0x18] sm:$0xff]  ;;  %v5511_v33 = vld [vmem:[%s6466_s14 + $0x10] sm:$0xff]  ;;  %v5298_v37 = vcombine.high %v983_v28, %v987_v29  ;;  %v5297_v45 = vcombine.low %v983_v28, %v987_v29  ;;  %v5299_v46 = vcombine.low %v984_v30, %v988_v31 }
  0xbb   : > { %vm1921_vm1 = vcmp.gt.f32.partialorder %v5363_v32, 0.0  ;;  %vm2938_vm2 = vcmp.gt.f32.partialorder %v5511_v33, 0.0  ;;  %v1032_v20 = vld [vmem:[#allocation6 + $0x398] sm:$0xff] }
  0xbc   : > { %1718 = vmatmul.mubr.bf16.vlgmr.msra.gmra.mrb[16].mxu0 %v6552_v38  ;;  %1759 = vmatmul.mubr.bf16.vlgmr.msra.gmra.mrb[16].mxu1 %v6552_v38  ;;  %v1922_v36 = vsel %vm1921_vm1, 1, %v7494_v3  ;;  %v2939_v44 = vsel %vm2938_vm2, 1, %v7494_v3  ;;  %v1036_v21 = vld [vmem:[#allocation6 + $0x3b8] sm:$0xff] }
  0xbd   : > { %1768 = vmatpush1.bf16.msra.mxu0 %v5233_v39  ;;  %1809 = vmatpush1.bf16.msra.mxu1 %v5235_v40  ;;  %v5300_v39 = vcombine.high %v984_v30, %v988_v31  ;;  %v991_v40 = vld [vmem:[#allocation6 + $0x250] sm:$0xff]  ;;  %v1040_v28 = vld [vmem:[#allocation6 + $0x3d8] sm:$0xff]  ;;  %v5347_v31 = vcombine.low %v1032_v20, %v1036_v21 }
  0xbe   : > { %1769 = vmatprep.subr.bf16.mxu0 %v5242_v41  ;;  %1810 = vmatprep.subr.bf16.mxu1 %v5244_v42  ;;  %v995_v41 = vld [vmem:[#allocation6 + $0x270] sm:$0xff]  ;;  %v992_v42 = vld [vmem:[#allocation6 + $0x258] sm:$0xff] }
  0xbf   : > { %1799 = vmatprep.mubr.bf16.mxu0 %v6548_v62  ;;  %1840 = vmatprep.mubr.bf16.mxu1 %v6548_v62  ;;  %v5268_v62 = vcombine.high %v952_v61, %v956_v63  ;;  %v5305_v53 = vcombine.low %v991_v40, %v995_v41  ;;  %v5307_v54 = vcombine.low %v992_v42, %v996_v43  ;;  %v1044_v29 = vld [vmem:[#allocation6 + $0x3f8] sm:$0xff] }
  0xc0   : > { %1924 = vperm.xlu0 %5921, %v1922_v36   ;;  %v5315_v63 = vcombine.low %v1000_v51, %v1004_v52  ;;  %v5356_v33 = vcombine.high %v1040_v28, %v1044_v29  ;;  %v1934_v36 = vld [vmem:[#allocation6] sm:$0xff] }
  0xc1   : > { %1770 = vmatpush1.bf16.msra.mxu0 %v5241_v47  ;;  %1811 = vmatpush1.bf16.msra.mxu1 %v5243_v48  ;;  %v5306_v47 = vcombine.high %v991_v40, %v995_v41  ;;  %v5308_v48 = vcombine.high %v992_v42, %v996_v43  ;;  %v1939_v42 = vld [vmem:[#allocation6 + $0x28] sm:$0xff]  ;;  %v1942_v43 = vld [vmem:[#allocation6 + $0x40] sm:$0xff] }
  0xc2   : > { %1771 = vmatprep.subr.bf16.mxu0 %v5250_v49  ;;  %1812 = vmatprep.subr.bf16.mxu1 %v5252_v50  ;;  %v999_v49 = vld [vmem:[#allocation6 + $0x290] sm:$0xff] }
  0xc3   : > { %v1003_v50 = vld [vmem:[#allocation6 + $0x2b0] sm:$0xff] }
  0xc4   : > { %2941 = vperm.xlu0 %5921, %v2939_v44   ;;  %v5313_v61 = vcombine.low %v999_v49, %v1003_v50  ;;  %v1946_v44 = vld [vmem:[#allocation6 + $0x60] sm:$0xff] }
  0xc5   : > { %1772 = vmatpush1.bf16.msra.mxu0 %v5249_v55  ;;  %1813 = vmatpush1.bf16.msra.mxu1 %v5251_v56  ;;  %v5314_v55 = vcombine.high %v999_v49, %v1003_v50  ;;  %v5316_v56 = vcombine.high %v1000_v51, %v1004_v52  ;;  %v1947_v49 = vld [vmem:[#allocation6 + $0x68] sm:$0xff]  ;;  %v1950_v50 = vld [vmem:[#allocation6 + $0x80] sm:$0xff] }
  0xc6   : > { %1773 = vmatprep.subr.bf16.mxu0 %v5258_v57  ;;  %1814 = vmatprep.subr.bf16.mxu1 %v5260_v58  ;;  %v1007_v57 = vld [vmem:[#allocation6 + $0x2d0] sm:$0xff]  ;;  %v1954_v52 = vld [vmem:[#allocation6 + $0xa0] sm:$0xff] }
  0xc7   : > { %v1011_v58 = vld [vmem:[#allocation6 + $0x2f0] sm:$0xff] }
  0xc8   : > { %v5321_v6 = vcombine.low %v1007_v57, %v1011_v58 }
  0xc9   : > { %1774 = vmatpush1.bf16.msra.mxu0 %v5257_v0  ;;  %1815 = vmatpush1.bf16.msra.mxu1 %v5259_v1  ;;  %v5322_v0 = vcombine.high %v1007_v57, %v1011_v58  ;;  %v5324_v1 = vcombine.high %v1008_v59, %v1012_v60  ;;  %v6585_v57 = vcombine.high %v1950_v50, %v1954_v52  ;;  %v1958_v59 = vld [vmem:[#allocation6 + $0xc0] sm:$0xff] }
  0xca   : > { %1775 = vmatprep.subr.bf16.mxu0 %v5266_v2  ;;  %1816 = vmatprep.subr.bf16.mxu1 %v5268_v62  ;;  %v1015_v2 = vld [vmem:[#allocation6 + $0x310] sm:$0xff]  ;;  %v1962_v60 = vld [vmem:[#allocation6 + $0xe0] sm:$0xff] }
  0xcb   : > { %v1019_v62 = vld [vmem:[#allocation6 + $0x330] sm:$0xff] }
  0xcc   : > { %v5329_v14 = vcombine.low %v1015_v2, %v1019_v62 }
  0xcd   : > { %1776 = vmatpush1.bf16.msra.mxu0 %v5265_v8  ;;  %1817 = vmatpush1.bf16.msra.mxu1 %v5267_v9  ;;  %v5330_v8 = vcombine.high %v1015_v2, %v1019_v62  ;;  %v5332_v9 = vcombine.high %v1016_v4, %v1020_v5  ;;  %v6597_v4 = vcombine.high %v1958_v59, %v1962_v60 }
  0xce   : > { %1777 = vmatprep.subr.bf16.mxu0 %v5274_v10  ;;  %1818 = vmatprep.subr.bf16.mxu1 %v5276_v11  ;;  %v1023_v10 = vld [vmem:[#allocation6 + $0x350] sm:$0xff] }
  0xcf   : > { %v1027_v11 = vld [vmem:[#allocation6 + $0x370] sm:$0xff] }
  0xd0   : > { %v5337_v22 = vcombine.low %v1023_v10, %v1027_v11 }
  0xd1   : > { %1778 = vmatpush1.bf16.msra.mxu0 %v5273_v16  ;;  %1819 = vmatpush1.bf16.msra.mxu1 %v5275_v17  ;;  %v5338_v16 = vcombine.high %v1023_v10, %v1027_v11  ;;  %v5340_v17 = vcombine.high %v1024_v12, %v1028_v13  ;;  %v6606_v10 = vcombine.low %v1958_v59, %v1962_v60  ;;  %v1966_v59 = vld [vmem:[#allocation6 + $0x100] sm:$0xff] }
  0xd2   : > { %1779 = vmatprep.subr.bf16.mxu0 %v5282_v18  ;;  %1820 = vmatprep.subr.bf16.mxu1 %v5284_v19  ;;  %v1031_v18 = vld [vmem:[#allocation6 + $0x390] sm:$0xff]  ;;  %v1970_v60 = vld [vmem:[#allocation6 + $0x120] sm:$0xff] }
  0xd3   : > { %v1035_v19 = vld [vmem:[#allocation6 + $0x3b0] sm:$0xff] }
  0xd4   : > { %v5345_v30 = vcombine.low %v1031_v18, %v1035_v19 }
  0xd5   : > { %1780 = vmatpush1.bf16.msra.mxu0 %v5281_v24  ;;  %1821 = vmatpush1.bf16.msra.mxu1 %v5283_v25  ;;  %v5346_v24 = vcombine.high %v1031_v18, %v1035_v19  ;;  %v5348_v25 = vcombine.high %v1032_v20, %v1036_v21 }
  0xd6   : > { %1781 = vmatprep.subr.bf16.mxu0 %v5290_v26  ;;  %1822 = vmatprep.subr.bf16.mxu1 %v5292_v27  ;;  %v1039_v26 = vld [vmem:[#allocation6 + $0x3d0] sm:$0xff] }
  0xd7   : > { %v1043_v27 = vld [vmem:[#allocation6 + $0x3f0] sm:$0xff] }
  0xd8   : > { %v5354_v32 = vcombine.high %v1039_v26, %v1043_v27 }
  0xd9   : > { %1782 = vmatpush1.bf16.msra.mxu0 %v5289_v34  ;;  %1823 = vmatpush1.bf16.msra.mxu1 %v5291_v35  ;;  %v5353_v34 = vcombine.low %v1039_v26, %v1043_v27  ;;  %v5355_v35 = vcombine.low %v1040_v28, %v1044_v29 }
  0xda   : > { %1783 = vmatprep.subr.bf16.mxu0 %v5298_v37  ;;  %1824 = vmatprep.subr.bf16.mxu1 %v5300_v39  ;;  %v1938_v37 = vld [vmem:[#allocation6 + $0x20] sm:$0xff]  ;;  %v1935_v39 = vld [vmem:[#allocation6 + $0x8] sm:$0xff] }
  0xdb   : > { %v6564_v40 = vcombine.low %v1934_v36, %v1938_v37  ;;  %v6566_v41 = vcombine.high %v1934_v36, %v1938_v37  ;;  %v711_v36 = vld [vmem:[%s7474_s7] sm:$0xf] }
  0xdd   : > { %1784 = vmatpush1.bf16.msra.mxu0 %v5297_v45  ;;  %1825 = vmatpush1.bf16.msra.mxu1 %v5299_v46  ;;  %v6568_v45 = vcombine.low %v1935_v39, %v1939_v42  ;;  %v6570_v46 = vcombine.high %v1935_v39, %v1939_v42 }
  0xde   : > { %1785 = vmatprep.subr.bf16.mxu0 %v5306_v47  ;;  %1826 = vmatprep.subr.bf16.mxu1 %v5308_v48  ;;  %v6572_v47 = vcombine.high %v1942_v43, %v1946_v44  ;;  %v1943_v48 = vld [vmem:[#allocation6 + $0x48] sm:$0xff] }
  0xdf   : > { %v6575_v51 = vcombine.high %v1943_v48, %v1947_v49 }
  0xe1   : > { %1786 = vmatpush1.bf16.msra.mxu0 %v5305_v53  ;;  %1827 = vmatpush1.bf16.msra.mxu1 %v5307_v54  ;;  %v1951_v53 = vld [vmem:[#allocation6 + $0x88] sm:$0xff] }
  0xe2   : > { %1787 = vmatprep.subr.bf16.mxu0 %v5314_v55  ;;  %1828 = vmatprep.subr.bf16.mxu1 %v5316_v56  ;;  %v1955_v54 = vld [vmem:[#allocation6 + $0xa8] sm:$0xff]  ;;  %v6579_v55 = vcombine.low %v1942_v43, %v1946_v44  ;;  %v6583_v56 = vcombine.low %v1943_v48, %v1947_v49 }
  0xe3   : > { %v6588_v58 = vcombine.high %v1951_v53, %v1955_v54  ;;  %v6595_v62 = vcombine.low %v1951_v53, %v1955_v54 }
  0xe5   : > { %1788 = vmatpush1.bf16.msra.mxu0 %v5313_v61  ;;  %1829 = vmatpush1.bf16.msra.mxu1 %v5315_v63  ;;  %v1959_v63 = vld [vmem:[#allocation6 + $0xc8] sm:$0xff] }
  0xe6   : > { %1789 = vmatprep.subr.bf16.mxu0 %v5322_v0  ;;  %1830 = vmatprep.subr.bf16.mxu1 %v5324_v1  ;;  %v1963_v0 = vld [vmem:[#allocation6 + $0xe8] sm:$0xff]  ;;  %v6591_v1 = vcombine.low %v1950_v50, %v1954_v52 }
  0xe7   : > { %v6612_v12 = vcombine.low %v1959_v63, %v1963_v0 }
  0xe9   : > { %1790 = vmatpush1.bf16.msra.mxu0 %v5321_v6  ;;  %1831 = vmatpush1.bf16.msra.mxu1 %v5323_v7  ;;  %v6600_v6 = vcombine.high %v1959_v63, %v1963_v0 }
  0xea   : > { %1791 = vmatprep.subr.bf16.mxu0 %v5330_v8  ;;  %1832 = vmatprep.subr.bf16.mxu1 %v5332_v9  ;;  %v498_v8 = vld [vmem:[%s7473_s6] sm:$0xf] }
  0xed   : > { %1792 = vmatpush1.bf16.msra.mxu0 %v5329_v14  ;;  %1833 = vmatpush1.bf16.msra.mxu1 %v5331_v15 }
  0xee   : > { %1793 = vmatprep.subr.bf16.mxu0 %v5338_v16  ;;  %1834 = vmatprep.subr.bf16.mxu1 %v5340_v17 }
  0xf1   : > { %1794 = vmatpush1.bf16.msra.mxu0 %v5337_v22  ;;  %1835 = vmatpush1.bf16.msra.mxu1 %v5339_v23 }
  0xf2   : > { %1795 = vmatprep.subr.bf16.mxu0 %v5346_v24  ;;  %1836 = vmatprep.subr.bf16.mxu1 %v5348_v25 }
  0xf5   : > { %1796 = vmatpush1.bf16.msra.mxu0 %v5345_v30  ;;  %1837 = vmatpush1.bf16.msra.mxu1 %v5347_v31 }
  0xf6   : > { %1797 = vmatprep.subr.bf16.mxu0 %v5354_v32  ;;  %1838 = vmatprep.subr.bf16.mxu1 %v5356_v33 }
  0xf9   : > { %1798 = vmatpush1.bf16.msra.mxu0 %v5353_v34  ;;  %1839 = vmatpush1.bf16.msra.mxu1 %v5355_v35 }
  0xfa   : > { %2702 = vmatprep.subr.bf16.mxu0 %v6566_v41  ;;  %2743 = vmatprep.subr.bf16.mxu1 %v6570_v46 }
  0xfc   : > { %1800 = vmatmul.mubr.bf16.vlgmr.msra.gmra.mrb[20].mxu0 %v6552_v38  ;;  %1841 = vmatmul.mubr.bf16.vlgmr.msra.gmra.mrb[20].mxu1 %v6552_v38  ;;  %v500_v38 = vlaneseq }
  0xfd   : > { %2703 = vmatpush1.bf16.msra.mxu0 %v6564_v40  ;;  %2744 = vmatpush1.bf16.msra.mxu1 %v6568_v45 }
  0xfe   : > { %2704 = vmatprep.subr.bf16.mxu0 %v6572_v47  ;;  %2745 = vmatprep.subr.bf16.mxu1 %v6575_v51  ;;  %v501_v61 = vshrl.u32 %v500_v38, 7 }
 0x100   : > { %v510_v2 = vsub.s32 2, %v501_v61  ;;  %v514_v5 = vsub.s32 3, %v501_v61  ;;  %v502_v7 = vsub.s32 0, %v501_v61  ;;  %v506_v9 = vsub.s32 1, %v501_v61  ;;  %v1967_v61 = vld [vmem:[#allocation6 + $0x108] sm:$0xff] }
 0x101   : > { %2705 = vmatpush1.bf16.msra.mxu0 %v6579_v55  ;;  %2746 = vmatpush1.bf16.msra.mxu1 %v6583_v56 }
 0x102   : > { %2706 = vmatprep.subr.bf16.mxu0 %v6585_v57  ;;  %2747 = vmatprep.subr.bf16.mxu1 %v6588_v58  ;;  %v6608_v11 = vrot.slane %v498_v8, %v510_v2  ;;  %v6618_v15 = vrot.slane %v498_v8, %v514_v5  ;;  %v6621_v16 = vrot.slane %v498_v8, %v502_v7 }
 0x103   : > { %v6627_v19 = vrot.slane %v498_v8, %v506_v9  ;;  %v6670_v38 = vrot.slane %v711_v36, %v502_v7  ;;  %v6672_v52 = vrot.slane %v711_v36, %v510_v2  ;;  %v6674_v53 = vrot.slane %v711_v36, %v506_v9 }
 0x104   : > { %v6676_v54 = vrot.slane %v711_v36, %v514_v5  ;;  %v6678_v8 = vcombine.high %v1966_v59, %v1970_v60  ;;  %v6686_v9 = vcombine.low %v1966_v59, %v1970_v60  ;;  %v1978_v59 = vld [vmem:[#allocation6 + $0x160] sm:$0xff]  ;;  %v1975_v60 = vld [vmem:[#allocation6 + $0x148] sm:$0xff] }
 0x105   : > { %2707 = vmatpush1.bf16.msra.mxu0 %v6591_v1  ;;  %2748 = vmatpush1.bf16.msra.mxu1 %v6595_v62 }
 0x106   : > { %2708 = vmatprep.subr.bf16.mxu0 %v6597_v4  ;;  %2749 = vmatprep.subr.bf16.mxu1 %v6600_v6 }
 0x109   : > { %2709 = vmatpush1.bf16.msra.mxu0 %v6606_v10  ;;  %2750 = vmatpush1.bf16.msra.mxu1 %v6612_v12 }
 0x10a   : > { %2710 = vmatprep.subr.bf16.mxu0 %v6678_v8 }
 0x10d   : > { %2711 = vmatpush1.bf16.msra.mxu0 %v6686_v9 }
 0x13f   : > { %v6614_v13 = vpop.f32.mrb[0].mxu0  ;;  %v6616_v14 = vpop.f32.mrb[0].mxu1 }
 0x140   : > { %v6623_v17 = vpop.f32.mrb[1].mxu0  ;;  %v6625_v18 = vpop.f32.mrb[1].mxu1 }
 0x141   : > { %v615_v20 = vpop.f32.mrb[2].mxu0  ;;  %v668_v21 = vpop.f32.mrb[2].mxu1 }
 0x142   : > { %v6631_v22 = vadd.f32 %v615_v20, %v6621_v16  ;;  %v617_v23 = vpop.f32.mrb[3].mxu0  ;;  %v6634_v24 = vadd.f32 %v668_v21, %v6608_v11  ;;  %v670_v25 = vpop.f32.mrb[3].mxu1  ;;  %v1971_v20 = vld [vmem:[#allocation6 + $0x128] sm:$0xff] }
 0x143   : > { %v6638_v26 = vadd.f32 %v617_v23, %v6627_v19  ;;  %v6641_v27 = vadd.f32 %v670_v25, %v6618_v15  ;;  %v6688_v5 = vcombine.low %v1967_v61, %v1971_v20 }
 0x144   : > { %7596 = vst [vmem:[#allocation25_spill] sm:$0xff] %v6631_v22  ;;  %7597 = vst [vmem:[#allocation26_spill] sm:$0xff] %v6634_v24  ;;  %v2023_v22 = vld [vmem:[#allocation6 + $0x2c8] sm:$0xff] }
 0x145   : > { %7598 = vst [vmem:[#allocation27_spill] sm:$0xff] %v6638_v26  ;;  %7599 = vst [vmem:[#allocation28_spill] sm:$0xff] %v6641_v27  ;;  %v2019_v27 = vld [vmem:[#allocation6 + $0x2a8] sm:$0xff]  ;;  %v2022_v26 = vld [vmem:[#allocation6 + $0x2c0] sm:$0xff] }
 0x147   : > { %v621_v28 = vpop.f32.mrb[4].mxu0  ;;  %v674_v29 = vpop.f32.mrb[4].mxu1 }
 0x148   : > { %v6644_v30 = vadd.f32 %v621_v28, %v6621_v16  ;;  %v623_v31 = vpop.f32.mrb[5].mxu0  ;;  %v6647_v32 = vadd.f32 %v674_v29, %v6608_v11  ;;  %v676_v33 = vpop.f32.mrb[5].mxu1 }
 0x149   : > { %v6650_v34 = vadd.f32 %v623_v31, %v6627_v19  ;;  %v625_v35 = vpop.f32.mrb[6].mxu0  ;;  %v6656_v37 = vadd.f32 %v676_v33, %v6618_v15  ;;  %v678_v39 = vpop.f32.mrb[6].mxu1  ;;  %v6697_v33 = vcombine.high %v1967_v61, %v1971_v20  ;;  %v1979_v20 = vld [vmem:[#allocation6 + $0x168] sm:$0xff] }
 0x14a   : > { %7600 = vst [vmem:[#allocation29_spill] sm:$0xff] %v6644_v30  ;;  %7601 = vst [vmem:[#allocation30_spill] sm:$0xff] %v6647_v32  ;;  %v6659_v42 = vadd.f32 %v625_v35, %v6621_v16  ;;  %v627_v43 = vpop.f32.mrb[7].mxu0  ;;  %v6662_v44 = vadd.f32 %v678_v39, %v6608_v11  ;;  %v680_v48 = vpop.f32.mrb[7].mxu1  ;;  %v2007_v32 = vld [vmem:[#allocation6 + $0x248] sm:$0xff] }
 0x14b   : > { %7602 = vst [vmem:[#allocation31_spill] sm:$0xff] %v6650_v34  ;;  %7603 = vst [vmem:[#allocation32_spill] sm:$0xff] %v6656_v37  ;;  %v6665_v49 = vadd.f32 %v627_v43, %v6627_v19  ;;  %v6668_v50 = vadd.f32 %v680_v48, %v6618_v15  ;;  %v1974_v48 = vld [vmem:[#allocation6 + $0x140] sm:$0xff]  ;;  %2751 = vmatprep.subr.bf16.mxu1 %v6697_v33 }
 0x14c   : > { %7604 = vst [vmem:[#allocation33_spill] sm:$0xff] %v6659_v42  ;;  %7605 = vst [vmem:[#allocation34_spill] sm:$0xff] %v6662_v44  ;;  %v6713_v61 = vcombine.high %v1974_v48, %v1978_v59  ;;  %2752 = vmatpush1.bf16.msra.mxu1 %v6688_v5  ;;  %v2010_v34 = vld [vmem:[#allocation6 + $0x260] sm:$0xff] }
 0x14d   : > { %7606 = vst [vmem:[#allocation35_spill] sm:$0xff] %v6665_v49  ;;  %7607 = vst [vmem:[#allocation36_spill] sm:$0xff] %v6668_v50 }
 0x14e   : > { %2712 = vmatprep.subr.bf16.mxu0 %v6713_v61 }
 0x14f   : > { %v823_v63 = vpop.f32.mrb[8].mxu0  ;;  %v876_v0 = vpop.f32.mrb[8].mxu1 }
 0x150   : > { %v6681_v21 = vadd.f32 %v823_v63, %v6670_v38  ;;  %v825_v23 = vpop.f32.mrb[9].mxu0  ;;  %v6684_v7 = vadd.f32 %v876_v0, %v6672_v52  ;;  %v878_v2 = vpop.f32.mrb[9].mxu1 }
 0x151   : > { %v6691_v25 = vadd.f32 %v825_v23, %v6674_v53  ;;  %v827_v28 = vpop.f32.mrb[10].mxu0  ;;  %v6694_v29 = vadd.f32 %v878_v2, %v6676_v54  ;;  %v880_v31 = vpop.f32.mrb[10].mxu1  ;;  %v6716_v23 = vcombine.low %v1974_v48, %v1978_v59  ;;  %v6718_v2 = vcombine.low %v1975_v60, %v1979_v20 }
 0x152   : > { %7608 = vst [vmem:[#allocation37_spill] sm:$0xff] %v6681_v21  ;;  %7609 = vst [vmem:[#allocation38_spill] sm:$0xff] %v6684_v7  ;;  %v6700_v35 = vadd.f32 %v827_v28, %v6670_v38  ;;  %v829_v36 = vpop.f32.mrb[11].mxu0  ;;  %v6703_v39 = vadd.f32 %v880_v31, %v6672_v52  ;;  %v882_v43 = vpop.f32.mrb[11].mxu1  ;;  %v6720_v28 = vcombine.high %v1975_v60, %v1979_v20  ;;  %v1982_v31 = vld [vmem:[#allocation6 + $0x180] sm:$0xff]  ;;  %v1987_v7 = vld [vmem:[#allocation6 + $0x1a8] sm:$0xff] }
 0x153   : > { %7610 = vst [vmem:[#allocation39_spill] sm:$0xff] %v6691_v25  ;;  %7611 = vst [vmem:[#allocation40_spill] sm:$0xff] %v6694_v29  ;;  %v6707_v63 = vadd.f32 %v829_v36, %v6674_v53  ;;  %v6710_v0 = vadd.f32 %v882_v43, %v6676_v54  ;;  %2713 = vmatpush1.bf16.msra.mxu0 %v6716_v23  ;;  %v1986_v36 = vld [vmem:[#allocation6 + $0x1a0] sm:$0xff]  ;;  %v1983_v43 = vld [vmem:[#allocation6 + $0x188] sm:$0xff] }
 0x154   : > { %7612 = vst [vmem:[#allocation41_spill] sm:$0xff] %v6700_v35  ;;  %7613 = vst [vmem:[#allocation42_spill] sm:$0xff] %v6703_v39  ;;  %2753 = vmatprep.subr.bf16.mxu1 %v6720_v28  ;;  %v6725_v25 = vcombine.high %v1982_v31, %v1986_v36  ;;  %v6734_v21 = vcombine.low %v1982_v31, %v1986_v36  ;;  %v6736_v50 = vcombine.low %v1983_v43, %v1987_v7  ;;  %v1994_v39 = vld [vmem:[#allocation6 + $0x1e0] sm:$0xff]  ;;  %v1991_v35 = vld [vmem:[#allocation6 + $0x1c8] sm:$0xff] }
 0x155   : > { %7614 = vst [vmem:[#allocation43_spill] sm:$0xff] %v6707_v63  ;;  %7615 = vst [vmem:[#allocation44_spill] sm:$0xff] %v6710_v0  ;;  %2754 = vmatpush1.bf16.msra.mxu1 %v6718_v2  ;;  %v6745_v0 = vcombine.high %v1983_v43, %v1987_v7 }
 0x156   : > { %2714 = vmatprep.subr.bf16.mxu0 %v6725_v25 }
 0x157   : > { %v833_v3 = vpop.f32.mrb[12].mxu0  ;;  %v886_v29 = vpop.f32.mrb[12].mxu1  ;;  %2715 = vmatpush1.bf16.msra.mxu0 %v6734_v21  ;;  %2755 = vmatprep.subr.bf16.mxu1 %v6745_v0 }
 0x158   : > { %v6728_v48 = vadd.f32 %v833_v3, %v6670_v38  ;;  %v835_v59 = vpop.f32.mrb[13].mxu0  ;;  %v6731_v60 = vadd.f32 %v886_v29, %v6672_v52  ;;  %v888_v20 = vpop.f32.mrb[13].mxu1 }
 0x159   : > { %v6739_v49 = vadd.f32 %v835_v59, %v6674_v53  ;;  %v837_v44 = vpop.f32.mrb[14].mxu0  ;;  %v6742_v42 = vadd.f32 %v888_v20, %v6676_v54  ;;  %v890_v3 = vpop.f32.mrb[14].mxu1  ;;  %v1990_v59 = vld [vmem:[#allocation6 + $0x1c0] sm:$0xff]  ;;  %2756 = vmatpush1.bf16.msra.mxu1 %v6736_v50 }
 0x15a   : > { %7616 = vst [vmem:[#allocation45_spill] sm:$0xff] %v6728_v48  ;;  %7617 = vst [vmem:[#allocation46_spill] sm:$0xff] %v6731_v60  ;;  %v6748_v29 = vadd.f32 %v837_v44, %v6670_v38  ;;  %v839_v63 = vpop.f32.mrb[15].mxu0  ;;  %v6751_v31 = vadd.f32 %v890_v3, %v6672_v52  ;;  %v892_v36 = vpop.f32.mrb[15].mxu1  ;;  %v6761_v44 = vcombine.high %v1990_v59, %v1994_v39  ;;  %v1995_v38 = vld [vmem:[#allocation6 + $0x1e8] sm:$0xff] }
 0x15b   : > { %7618 = vst [vmem:[#allocation47_spill] sm:$0xff] %v6739_v49  ;;  %7619 = vst [vmem:[#allocation48_spill] sm:$0xff] %v6742_v42  ;;  %v6755_v20 = vadd.f32 %v839_v63, %v6674_v53  ;;  %v6758_v37 = vadd.f32 %v892_v36, %v6676_v54  ;;  %v6764_v52 = vcombine.low %v1990_v59, %v1994_v39  ;;  %v1998_v53 = vld [vmem:[#allocation6 + $0x200] sm:$0xff]  ;;  %v1999_v63 = vld [vmem:[#allocation6 + $0x208] sm:$0xff] }
 0x15c   : > { %v6766_v7 = vcombine.low %v1991_v35, %v1995_v38  ;;  %v6768_v43 = vcombine.high %v1991_v35, %v1995_v38  ;;  %2716 = vmatprep.subr.bf16.mxu0 %v6761_v44  ;;  %v2002_v54 = vld [vmem:[#allocation6 + $0x220] sm:$0xff]  ;;  %v2003_v36 = vld [vmem:[#allocation6 + $0x228] sm:$0xff] }
 0x15d   : > { %2717 = vmatpush1.bf16.msra.mxu0 %v6764_v52  ;;  %v6773_v3 = vcombine.high %v1998_v53, %v2002_v54  ;;  %v6776_v39 = vcombine.low %v1998_v53, %v2002_v54  ;;  %v6778_v59 = vcombine.low %v1999_v63, %v2003_v36  ;;  %v6780_v35 = vcombine.high %v1999_v63, %v2003_v36  ;;  %v2006_v38 = vld [vmem:[#allocation6 + $0x240] sm:$0xff]  ;;  %v2011_v49 = vld [vmem:[#allocation6 + $0x268] sm:$0xff] }
 0x15e   : > { %2757 = vmatprep.subr.bf16.mxu1 %v6768_v43  ;;  %v6785_v30 = vcombine.low %v2006_v38, %v2010_v34  ;;  %v6787_v42 = vcombine.high %v2006_v38, %v2010_v34  ;;  %v2014_v53 = vld [vmem:[#allocation6 + $0x280] sm:$0xff]  ;;  %v6790_v63 = vcombine.low %v2007_v32, %v2011_v49  ;;  %v6792_v36 = vcombine.high %v2007_v32, %v2011_v49  ;;  %v2015_v48 = vld [vmem:[#allocation6 + $0x288] sm:$0xff] }
 0x15f   : > { %2758 = vmatpush1.bf16.msra.mxu1 %v6766_v7  ;;  %7620 = vst [vmem:[#allocation49_spill] sm:$0xff] %v6778_v59  ;;  %2718 = vmatprep.subr.bf16.mxu0 %v6773_v3  ;;  %v2018_v54 = vld [vmem:[#allocation6 + $0x2a0] sm:$0xff]  ;;  %v6797_v24 = vcombine.high %v2015_v48, %v2019_v27  ;;  %v6807_v49 = vcombine.low %v2015_v48, %v2019_v27 }
 0x160   : > { %2759 = vmatprep.subr.bf16.mxu1 %v6780_v35  ;;  %7621 = vst [vmem:[#allocation50_spill] sm:$0xff] %v6785_v30  ;;  %7622 = vst [vmem:[#allocation51_spill] sm:$0xff] %v6787_v42  ;;  %v6794_v60 = vcombine.high %v2014_v53, %v2018_v54  ;;  %v2026_v34 = vld [vmem:[#allocation6 + $0x2e0] sm:$0xff]  ;;  %v6801_v38 = vcombine.low %v2014_v53, %v2018_v54  ;;  %v2031_v54 = vld [vmem:[#allocation6 + $0x308] sm:$0xff] }
 0x161   : > { %2719 = vmatpush1.bf16.msra.mxu0 %v6776_v39  ;;  %7623 = vst [vmem:[#allocation52_spill] sm:$0xff] %v6790_v63  ;;  %7624 = vst [vmem:[#allocation53_spill] sm:$0xff] %v6792_v36  ;;  %v6804_v32 = vcombine.high %v2022_v26, %v2026_v34  ;;  %v2030_v27 = vld [vmem:[#allocation6 + $0x300] sm:$0xff] }
 0x162   : > { %7625 = vst [vmem:[#allocation54_spill] sm:$0xff] %v6794_v60  ;;  %2720 = vmatprep.subr.bf16.mxu0 %v6787_v42  ;;  %7626 = vst [vmem:[#allocation55_spill] sm:$0xff] %v6797_v24  ;;  %v2034_v48 = vld [vmem:[#allocation6 + $0x320] sm:$0xff] }
 0x163   : > { %2760 = vmatpush1.bf16.msra.mxu1 %v6778_v59  ;;  %7627 = vst [vmem:[#allocation56_spill] sm:$0xff] %v6801_v38  ;;  %v2027_v59 = vld [vmem:[#allocation6 + $0x2e8] sm:$0xff]  ;;  %7628 = vst [vmem:[#allocation57_spill] sm:$0xff] %v6804_v32 }
 0x164   : > { %2761 = vmatprep.subr.bf16.mxu1 %v6792_v36  ;;  %7629 = vst [vmem:[#allocation58_spill] sm:$0xff] %v6807_v49  ;;  %v6810_v42 = vcombine.high %v2023_v22, %v2027_v59  ;;  %v6813_v36 = vcombine.low %v2022_v26, %v2026_v34  ;;  %v6817_v53 = vcombine.low %v2023_v22, %v2027_v59  ;;  %v2038_v22 = vld [vmem:[#allocation6 + $0x340] sm:$0xff] }
 0x165   : > { %2721 = vmatpush1.bf16.msra.mxu0 %v6785_v30  ;;  %v6824_v26 = vcombine.low %v2030_v27, %v2034_v48  ;;  %v2042_v59 = vld [vmem:[#allocation6 + $0x360] sm:$0xff] }
 0x166   : > { %2722 = vmatprep.subr.bf16.mxu0 %v6794_v60  ;;  %7630 = vst [vmem:[#allocation59_spill] sm:$0xff] %v6810_v42  ;;  %7631 = vst [vmem:[#allocation60_spill] sm:$0xff] %v6813_v36  ;;  %v2035_v60 = vld [vmem:[#allocation6 + $0x328] sm:$0xff] }
 0x167   : > { %2762 = vmatpush1.bf16.msra.mxu1 %v6790_v63  ;;  %7632 = vst [vmem:[#allocation61_spill] sm:$0xff] %v6817_v53  ;;  %7634 = vst [vmem:[#allocation63_spill] sm:$0xff] %v6824_v26  ;;  %v6826_v34 = vcombine.low %v2031_v54, %v2035_v60 }
 0x168   : > { %2763 = vmatprep.subr.bf16.mxu1 %v6797_v24  ;;  %v6821_v24 = vcombine.high %v2030_v27, %v2034_v48  ;;  %v6836_v27 = vcombine.low %v2038_v22, %v2042_v59 }
 0x169   : > { %2723 = vmatpush1.bf16.msra.mxu0 %v6801_v38  ;;  %7635 = vst [vmem:[#allocation64_spill] sm:$0xff] %v6826_v34 }
 0x16a   : > { %2724 = vmatprep.subr.bf16.mxu0 %v6804_v32  ;;  %7633 = vst [vmem:[#allocation62_spill] sm:$0xff] %v6821_v24  ;;  %v6828_v32 = vcombine.high %v2031_v54, %v2035_v60  ;;  %7638 = vst [vmem:[#allocation67_spill] sm:$0xff] %v6836_v27  ;;  %v2046_v54 = vld [vmem:[#allocation6 + $0x380] sm:$0xff] }
 0x16b   : > { %2764 = vmatpush1.bf16.msra.mxu1 %v6807_v49  ;;  %v2043_v49 = vld [vmem:[#allocation6 + $0x368] sm:$0xff] }
 0x16c   : > { %2765 = vmatprep.subr.bf16.mxu1 %v6810_v42  ;;  %7636 = vst [vmem:[#allocation65_spill] sm:$0xff] %v6828_v32  ;;  %v6833_v42 = vcombine.high %v2038_v22, %v2042_v59 }
 0x16d   : > { %2725 = vmatpush1.bf16.msra.mxu0 %v6813_v36  ;;  %v2039_v36 = vld [vmem:[#allocation6 + $0x348] sm:$0xff] }
 0x16e   : > { %2726 = vmatprep.subr.bf16.mxu0 %v6821_v24  ;;  %7637 = vst [vmem:[#allocation66_spill] sm:$0xff] %v6833_v42  ;;  %v6838_v48 = vcombine.low %v2039_v36, %v2043_v49  ;;  %v6840_v60 = vcombine.high %v2039_v36, %v2043_v49  ;;  %v2054_v49 = vld [vmem:[#allocation6 + $0x3c0] sm:$0xff] }
 0x16f   : > { %2766 = vmatpush1.bf16.msra.mxu1 %v6817_v53  ;;  %v2051_v53 = vld [vmem:[#allocation6 + $0x3a8] sm:$0xff] }
 0x170   : > { %2767 = vmatprep.subr.bf16.mxu1 %v6828_v32  ;;  %7639 = vst [vmem:[#allocation68_spill] sm:$0xff] %v6838_v48  ;;  %7640 = vst [vmem:[#allocation69_spill] sm:$0xff] %v6840_v60  ;;  %v2047_v32 = vld [vmem:[#allocation6 + $0x388] sm:$0xff] }
 0x171   : > { %2727 = vmatpush1.bf16.msra.mxu0 %v6824_v26  ;;  %v2050_v26 = vld [vmem:[#allocation6 + $0x3a0] sm:$0xff]  ;;  %v6850_v59 = vcombine.low %v2047_v32, %v2051_v53  ;;  %v6852_v36 = vcombine.high %v2047_v32, %v2051_v53  ;;  %v1936_v53 = vld [vmem:[#allocation6 + $0x10] sm:$0xff] }
 0x172   : > { %2728 = vmatprep.subr.bf16.mxu0 %v6833_v42  ;;  %v6845_v24 = vcombine.high %v2046_v54, %v2050_v26  ;;  %v6848_v22 = vcombine.low %v2046_v54, %v2050_v26 }
 0x173   : > { %2768 = vmatpush1.bf16.msra.mxu1 %v6826_v34  ;;  %7643 = vst [vmem:[#allocation72_spill] sm:$0xff] %v6850_v59  ;;  %7644 = vst [vmem:[#allocation73_spill] sm:$0xff] %v6852_v36  ;;  %v2059_v34 = vld [vmem:[#allocation6 + $0x3e8] sm:$0xff] }
 0x174   : > { %2769 = vmatprep.subr.bf16.mxu1 %v6840_v60  ;;  %7641 = vst [vmem:[#allocation70_spill] sm:$0xff] %v6845_v24  ;;  %7642 = vst [vmem:[#allocation71_spill] sm:$0xff] %v6848_v22  ;;  %v2055_v60 = vld [vmem:[#allocation6 + $0x3c8] sm:$0xff] }
 0x175   : > { %2729 = vmatpush1.bf16.msra.mxu0 %v6836_v27  ;;  %v2058_v27 = vld [vmem:[#allocation6 + $0x3e0] sm:$0xff]  ;;  %v6862_v54 = vcombine.low %v2055_v60, %v2059_v34  ;;  %v6864_v32 = vcombine.high %v2055_v60, %v2059_v34  ;;  %v612_v60 = vadd.f32 %v6614_v13, %v6621_v16 }
 0x176   : > { %2730 = vmatprep.subr.bf16.mxu0 %v6845_v24  ;;  %v6857_v42 = vcombine.high %v2054_v49, %v2058_v27  ;;  %v6860_v26 = vcombine.low %v2054_v49, %v2058_v27 }
 0x177   : > { %2770 = vmatpush1.bf16.msra.mxu1 %v6838_v48  ;;  %7647 = vst [vmem:[#allocation76_spill] sm:$0xff] %v6862_v54  ;;  %7648 = vst [vmem:[#allocation77_spill] sm:$0xff] %v6864_v32  ;;  %v1941_v48 = vld [vmem:[#allocation6 + $0x38] sm:$0xff] }
 0x178   : > { %2771 = vmatprep.subr.bf16.mxu1 %v6852_v36  ;;  %7645 = vst [vmem:[#allocation74_spill] sm:$0xff] %v6857_v42  ;;  %7646 = vst [vmem:[#allocation75_spill] sm:$0xff] %v6860_v26  ;;  %v1937_v36 = vld [vmem:[#allocation6 + $0x18] sm:$0xff] }
 0x179   : > { %2731 = vmatpush1.bf16.msra.mxu0 %v6848_v22  ;;  %v1940_v22 = vld [vmem:[#allocation6 + $0x30] sm:$0xff]  ;;  %v6874_v49 = vcombine.low %v1937_v36, %v1941_v48  ;;  %v6876_v34 = vcombine.high %v1937_v36, %v1941_v48 }
 0x17a   : > { %2732 = vmatprep.subr.bf16.mxu0 %v6857_v42  ;;  %v6869_v24 = vcombine.high %v1936_v53, %v1940_v22  ;;  %v6872_v27 = vcombine.low %v1936_v53, %v1940_v22  ;;  %v667_v22 = vadd.f32 %v6625_v18, %v6618_v15 }
 0x17b   : > { %2772 = vmatpush1.bf16.msra.mxu1 %v6850_v59  ;;  %7650 = vst [vmem:[#allocation79_spill] sm:$0xff] %v6876_v34 }
 0x17c   : > { %2773 = vmatprep.subr.bf16.mxu1 %v6864_v32  ;;  %7649 = vst [vmem:[#allocation78_spill] sm:$0xff] %v6869_v24  ;;  %v614_v32 = vadd.f32 %v6623_v17, %v6627_v19 }
 0x17d   : > { %2733 = vmatpush1.bf16.msra.mxu0 %v6860_v26  ;;  %v665_v26 = vadd.f32 %v6616_v14, %v6608_v11 }
 0x17e   : > { %2784 = vmatprep.subr.bf16.mxu0 %v6869_v24 }
 0x17f   : > { %2774 = vmatpush1.bf16.msra.mxu1 %v6862_v54 }
 0x180   : > { %2825 = vmatprep.subr.bf16.mxu1 %v6876_v34 }
 0x18f   : > { %v1719_v53 = vpop.f32.mrb[16].mxu0  ;;  %v1760_v54 = vpop.f32.mrb[16].mxu1 }
 0x190   : > { %v1856_v48 = vadd.f32 %v1719_v53, %v612_v60  ;;  %v1858_v36 = vadd.f32 %v1760_v54, %v665_v26  ;;  %v1721_v42 = vpop.f32.mrb[17].mxu0  ;;  %v1762_v24 = vpop.f32.mrb[17].mxu1 }
 0x191   : > { %v1857_v59 = vadd.f32 %v1721_v42, %v614_v32  ;;  %v1859_v34 = vadd.f32 %v1762_v24, %v667_v22  ;;  %v1723_v38 = vpop.f32.mrb[18].mxu0  ;;  %v1764_v63 = vpop.f32.mrb[18].mxu1 }
 0x192   : > { %v5357_v13 = vmul.f32 -1.442695, %v1856_v48  ;;  %v1724_v16 = vpop.f32.mrb[19].mxu0  ;;  %v1765_v30 = vpop.f32.mrb[19].mxu1  ;;  %v913_v38 = vld [vmem:[#allocation5] sm:$0xff] }
 0x193   : > { %v5358_v11 = vmul.f32 -1.442695, %v1857_v59  ;;  %v5359_v14 = vmul.f32 -1.442695, %v1859_v34 }
 0x194   : > { %5951 = vpow2.f32 %v5357_v13 }
 0x195   : > { %5953 = vpow2.f32 %v5358_v11 }
 0x196   : > { %5955 = vpow2.f32 %v5359_v14 }
 0x197   : > { %5957 = vtanh.f32 %v1858_v36 }
 0x19e   : > { %v5952_v17 = vpop.eup %5951 }
 0x19f   : > { %v5954_v19 = vpop.eup %5953  ;;  %v1874_v15 = vadd.f32 1.0, %v5952_v17 }
 0x1a0   : > { %v1880_v18 = vadd.f32 1.0, %v5954_v19  ;;  %v5956_v42 = vpop.eup %5955 }
 0x1a1   : > { %5959 = vrcp.f32 %v1874_v15  ;;  %v5958_v24 = vpop.eup %5957  ;;  %v1887_v30 = vadd.f32 1.0, %v5956_v42 }
 0x1a2   : > { %5961 = vrcp.f32 %v1880_v18 }
 0x1a3   : > { %5963 = vrcp.f32 %v1887_v30 }
 0x1ab   : > { %v5960_v63 = vpop.eup %5959 }
 0x1ac   : > { %v5962_v26 = vpop.eup %5961  ;;  %v1891_v54 = vmul.f32 %v5960_v63, %v5958_v24 }
 0x1ad   : > { %v1890_v59 = vmul.f32 %v5962_v26, %v913_v38  ;;  %v5964_v34 = vpop.eup %5963 }
 0x1af   : > { %v6888_v32 = vadd.f32 %v1891_v54, %v1890_v59 }
 0x1b1   : > { %5965 = vtanh.f32 %v6888_v32 }
 0x1bb   : > { %v5966_v60 = vpop.eup %5965 }
 0x1bc   : > { %v1894_v22 = vmul.f32 %v5966_v60, %v5964_v34 }
 0x1be   : > { %1929 = vst [vmem:[%s6473_s27] sm:$0xff] %v1894_v22 }
 0x1cf   : > { %v1801_v53 = vpop.f32.mrb[20].mxu0  ;;  %v1842_v48 = vpop.f32.mrb[20].mxu1 }
 0x1d0   : > { %v1867_v36 = vadd.f32 %v1801_v53, %v6748_v29  ;;  %v1869_v13 = vadd.f32 %v1842_v48, %v6751_v31  ;;  %v1803_v16 = vpop.f32.mrb[21].mxu0  ;;  %v1844_v11 = vpop.f32.mrb[21].mxu1 }
 0x1d1   : > { %v1868_v14 = vadd.f32 %v1803_v16, %v6755_v20  ;;  %v1870_v17 = vadd.f32 %v1844_v11, %v6758_v37  ;;  %v1805_v19 = vpop.f32.mrb[22].mxu0  ;;  %v1846_v15 = vpop.f32.mrb[22].mxu1  ;;  %v914_v37 = vld [vmem:[#allocation5 + $0x8] sm:$0xff] }
 0x1d2   : > { %v5360_v18 = vmul.f32 -1.442695, %v1867_v36  ;;  %v1806_v42 = vpop.f32.mrb[23].mxu0  ;;  %v1847_v24 = vpop.f32.mrb[23].mxu1  ;;  %v1944_v19 = vld [vmem:[#allocation6 + $0x50] sm:$0xff] }
 0x1d3   : > { %v5361_v38 = vmul.f32 -1.442695, %v1868_v14  ;;  %v5362_v63 = vmul.f32 -1.442695, %v1870_v17  ;;  %v6899_v16 = vpop.permute.xlu0 %1924  ;;  %v1948_v15 = vld [vmem:[#allocation6 + $0x70] sm:$0xff]  ;;  %v1949_v42 = vld [vmem:[#allocation6 + $0x78] sm:$0xff] }
 0x1d4   : > { %5967 = vpow2.f32 %v5360_v18  ;;  %vm1926_vm3 = vcmp.eq.s32.totalorder %v6899_v16, 1  ;;  %v1945_v18 = vld [vmem:[#allocation6 + $0x58] sm:$0xff] }
 0x1d5   : > { %5969 = vpow2.f32 %v5361_v38  ;;  %vm6905_vm4 = vmpackc.low %vm1926_vm3, %vm1926_vm3 }
 0x1d6   : > { %5971 = vpow2.f32 %v5362_v63  ;;  %v6912_v63 = vpack.c.bf16 %v1894_v22, %v1894_v22  ;;  %v6926_v22 = vcombine.low %v1944_v19, %v1948_v15 }
 0x1d7   : > { %5973 = vtanh.f32 %v1869_v13 }
 0x1de   : > { %v5968_v26 = vpop.eup %5967 }
 0x1df   : > { %v5970_v54 = vpop.eup %5969  ;;  %v1898_v29 = vadd.f32 1.0, %v5968_v26  ;;  %v1952_v26 = vld [vmem:[#allocation6 + $0x90] sm:$0xff] }
 0x1e0   : > { %v1904_v31 = vadd.f32 1.0, %v5970_v54  ;;  %v5972_v20 = vpop.eup %5971  ;;  %v6918_v54 = vcombine.high %v1944_v19, %v1948_v15  ;;  %v1968_v15 = vld [vmem:[#allocation6 + $0x110] sm:$0xff] }
 0x1e1   : > { %5975 = vrcp.f32 %v1898_v29  ;;  %v5974_v30 = vpop.eup %5973  ;;  %v1911_v60 = vadd.f32 1.0, %v5972_v20  ;;  %v6920_v29 = vcombine.high %v1945_v18, %v1949_v42  ;;  %v1953_v20 = vld [vmem:[#allocation6 + $0x98] sm:$0xff] }
 0x1e2   : > { %5977 = vrcp.f32 %v1904_v31  ;;  %v1956_v31 = vld [vmem:[#allocation6 + $0xb0] sm:$0xff] }
 0x1e3   : > { %5979 = vrcp.f32 %v1911_v60  ;;  %v1960_v60 = vld [vmem:[#allocation6 + $0xd0] sm:$0xff] }
 0x1eb   : > { %v5976_v59 = vpop.eup %5975 }
 0x1ec   : > { %v5978_v34 = vpop.eup %5977  ;;  %v1915_v53 = vmul.f32 %v5976_v59, %v5974_v30  ;;  %v1957_v30 = vld [vmem:[#allocation6 + $0xb8] sm:$0xff]  ;;  %v6934_v59 = vcombine.high %v1952_v26, %v1956_v31 }
 0x1ed   : > { %v1914_v48 = vmul.f32 %v5978_v34, %v914_v37  ;;  %v5980_v13 = vpop.eup %5979  ;;  %v6928_v37 = vcombine.low %v1945_v18, %v1949_v42  ;;  %v6936_v34 = vcombine.high %v1953_v20, %v1957_v30  ;;  %v1972_v18 = vld [vmem:[#allocation6 + $0x130] sm:$0xff]  ;;  %v1969_v42 = vld [vmem:[#allocation6 + $0x118] sm:$0xff] }
 0x1ee   : > { %7654 = vst [vmem:[#allocation81_spill] sm:$0xff] %v6934_v59 }
 0x1ef   : > { %v6896_v36 = vadd.f32 %v1915_v53, %v1914_v48  ;;  %7653 = vst [vmem:[#allocation80_spill] sm:$0xff] %v6928_v37  ;;  %7655 = vst [vmem:[#allocation82_spill] sm:$0xff] %v6936_v34  ;;  %v1964_v53 = vld [vmem:[#allocation6 + $0xf0] sm:$0xff]  ;;  %v1961_v48 = vld [vmem:[#allocation6 + $0xd8] sm:$0xff] }
 0x1f0   : > { %v6948_v17 = vcombine.high %v1960_v60, %v1964_v53 }
 0x1f1   : > { %5981 = vtanh.f32 %v6896_v36 }
 0x1f2   : > { %7658 = vst [vmem:[#allocation85_spill] sm:$0xff] %v6948_v17 }
 0x1fb   : > { %v5982_v11 = vpop.eup %5981 }
 0x1fc   : > { %v1918_v14 = vmul.f32 %v5982_v11, %v5980_v13  ;;  %v1965_v13 = vld [vmem:[#allocation6 + $0xf8] sm:$0xff]  ;;  %v6942_v11 = vcombine.low %v1952_v26, %v1956_v31  ;;  %v6960_v31 = vcombine.high %v1968_v15, %v1972_v18 }
 0x1fd   : > { %v6950_v19 = vcombine.high %v1961_v48, %v1965_v13  ;;  %v6956_v26 = vcombine.low %v1961_v48, %v1965_v13 }
 0x1fe   : > { %v1927_v24 = vsel %vm1926_vm3, %v1918_v14, 0.0  ;;  %v5494_v38 = vpack.c.bf16 %v1918_v14, %v1918_v14  ;;  %7656 = vst [vmem:[#allocation83_spill] sm:$0xff] %v6942_v11  ;;  %v6944_v14 = vcombine.low %v1953_v20, %v1957_v30  ;;  %7662 = vst [vmem:[#allocation89_spill] sm:$0xff] %v6960_v31  ;;  %v1976_v30 = vld [vmem:[#allocation6 + $0x150] sm:$0xff] }
 0x1ff   : > { %5364 = vst [vmem:[%s6475_s29 + $0x18] sm:$0xff] %v1927_v24  ;;  %7659 = vst [vmem:[#allocation86_spill] sm:$0xff] %v6950_v19  ;;  %v1973_v24 = vld [vmem:[#allocation6 + $0x138] sm:$0xff] }
 0x200   : > { %5495 = vmatprep.mubr.msk.bf16.mxu0 %vm6905_vm4, %v5494_v38  ;;  %5498 = vmatprep.mubr.msk.bf16.mxu1 %vm6905_vm4, %v5494_v38  ;;  %7657 = vst [vmem:[#allocation84_spill] sm:$0xff] %v6944_v14  ;;  %7661 = vst [vmem:[#allocation88_spill] sm:$0xff] %v6956_v26  ;;  %v6962_v20 = vcombine.high %v1969_v42, %v1973_v24 }
 0x201   : > { %2735 = vmatmul.mubr.bf16.vlgmr.msra.gmra.mrb[24].mxu0 %v6912_v63  ;;  %2776 = vmatmul.mubr.bf16.vlgmr.msra.gmra.mrb[24].mxu1 %v6912_v63 }
 0x202   : > { %2785 = vmatpush1.bf16.msra.mxu0 %v6872_v27  ;;  %2826 = vmatpush1.bf16.msra.mxu1 %v6874_v49  ;;  %7663 = vst [vmem:[#allocation90_spill] sm:$0xff] %v6962_v20 }
 0x203   : > { %5501 = vmatprep.mubr.msk.bf16.mxu0 %vm6905_vm4, %v5494_v38  ;;  %5504 = vmatprep.mubr.msk.bf16.mxu1 %vm6905_vm4, %v5494_v38  ;;  %v6954_v38 = vcombine.low %v1960_v60, %v1964_v53  ;;  %v6966_v60 = vcombine.low %v1968_v15, %v1972_v18  ;;  %v6968_v53 = vcombine.low %v1969_v42, %v1973_v24 }
 0x204   : > { %2786 = vmatprep.subr.bf16.mxu0 %v6918_v54  ;;  %2827 = vmatprep.subr.bf16.mxu1 %v6920_v29 }
 0x205   : > { %7660 = vst [vmem:[#allocation87_spill] sm:$0xff] %v6954_v38  ;;  %7664 = vst [vmem:[#allocation91_spill] sm:$0xff] %v6966_v60 }
 0x206   : > { %2787 = vmatpush1.bf16.msra.mxu0 %v6926_v22  ;;  %2828 = vmatpush1.bf16.msra.mxu1 %v6928_v37  ;;  %v1981_v37 = vld [vmem:[#allocation6 + $0x178] sm:$0xff]  ;;  %7665 = vst [vmem:[#allocation92_spill] sm:$0xff] %v6968_v53 }
 0x207   : > { %2788 = vmatprep.subr.bf16.mxu0 %v6934_v59  ;;  %2829 = vmatprep.subr.bf16.mxu1 %v6936_v34  ;;  %v1980_v34 = vld [vmem:[#allocation6 + $0x170] sm:$0xff]  ;;  %v1977_v59 = vld [vmem:[#allocation6 + $0x158] sm:$0xff] }
 0x208   : > { %v6972_v48 = vcombine.high %v1976_v30, %v1980_v34  ;;  %v6974_v13 = vcombine.high %v1977_v59, %v1981_v37  ;;  %v6978_v15 = vcombine.low %v1976_v30, %v1980_v34  ;;  %v6980_v18 = vcombine.low %v1977_v59, %v1981_v37 }
 0x20a   : > { %2789 = vmatpush1.bf16.msra.mxu0 %v6942_v11  ;;  %2830 = vmatpush1.bf16.msra.mxu1 %v6944_v14  ;;  %7666 = vst [vmem:[#allocation93_spill] sm:$0xff] %v6972_v48  ;;  %7667 = vst [vmem:[#allocation94_spill] sm:$0xff] %v6974_v13  ;;  %v1985_v14 = vld [vmem:[#allocation6 + $0x198] sm:$0xff] }
 0x20b   : > { %2790 = vmatprep.subr.bf16.mxu0 %v6948_v17  ;;  %2831 = vmatprep.subr.bf16.mxu1 %v6950_v19  ;;  %v1984_v19 = vld [vmem:[#allocation6 + $0x190] sm:$0xff]  ;;  %v1989_v11 = vld [vmem:[#allocation6 + $0x1b8] sm:$0xff]  ;;  %7668 = vst [vmem:[#allocation95_spill] sm:$0xff] %v6978_v15  ;;  %7669 = vst [vmem:[#allocation96_spill] sm:$0xff] %v6980_v18 }
 0x20c   : > { %v1988_v17 = vld [vmem:[#allocation6 + $0x1b0] sm:$0xff]  ;;  %v6986_v24 = vcombine.high %v1985_v14, %v1989_v11  ;;  %v6992_v37 = vcombine.low %v1985_v14, %v1989_v11 }
 0x20d   : > { %v6984_v42 = vcombine.high %v1984_v19, %v1988_v17  ;;  %v6990_v34 = vcombine.low %v1984_v19, %v1988_v17 }
 0x20e   : > { %2791 = vmatpush1.bf16.msra.mxu0 %v6954_v38  ;;  %2832 = vmatpush1.bf16.msra.mxu1 %v6956_v26  ;;  %7671 = vst [vmem:[#allocation98_spill] sm:$0xff] %v6986_v24  ;;  %v1993_v26 = vld [vmem:[#allocation6 + $0x1d8] sm:$0xff]  ;;  %7673 = vst [vmem:[#allocation100_spill] sm:$0xff] %v6992_v37 }
 0x20f   : > { %2792 = vmatprep.subr.bf16.mxu0 %v6960_v31  ;;  %2833 = vmatprep.subr.bf16.mxu1 %v6962_v20  ;;  %7670 = vst [vmem:[#allocation97_spill] sm:$0xff] %v6984_v42  ;;  %v1992_v20 = vld [vmem:[#allocation6 + $0x1d0] sm:$0xff]  ;;  %v1997_v38 = vld [vmem:[#allocation6 + $0x1f8] sm:$0xff]  ;;  %7672 = vst [vmem:[#allocation99_spill] sm:$0xff] %v6990_v34 }
 0x210   : > { %v1996_v31 = vld [vmem:[#allocation6 + $0x1f0] sm:$0xff]  ;;  %v6998_v30 = vcombine.high %v1993_v26, %v1997_v38  ;;  %v7004_v11 = vcombine.low %v1993_v26, %v1997_v38 }
 0x211   : > { %v6996_v59 = vcombine.high %v1992_v20, %v1996_v31  ;;  %v7002_v17 = vcombine.low %v1992_v20, %v1996_v31 }
 0x212   : > { %2793 = vmatpush1.bf16.msra.mxu0 %v6966_v60  ;;  %2834 = vmatpush1.bf16.msra.mxu1 %v6968_v53  ;;  %7675 = vst [vmem:[#allocation102_spill] sm:$0xff] %v6998_v30  ;;  %v2001_v53 = vld [vmem:[#allocation6 + $0x218] sm:$0xff]  ;;  %7677 = vst [vmem:[#allocation104_spill] sm:$0xff] %v7004_v11 }
 0x213   : > { %2794 = vmatprep.subr.bf16.mxu0 %v6972_v48  ;;  %2835 = vmatprep.subr.bf16.mxu1 %v6974_v13  ;;  %7674 = vst [vmem:[#allocation101_spill] sm:$0xff] %v6996_v59  ;;  %v2000_v13 = vld [vmem:[#allocation6 + $0x210] sm:$0xff]  ;;  %v2005_v60 = vld [vmem:[#allocation6 + $0x238] sm:$0xff]  ;;  %7676 = vst [vmem:[#allocation103_spill] sm:$0xff] %v7002_v17 }
 0x214   : > { %v2004_v48 = vld [vmem:[#allocation6 + $0x230] sm:$0xff]  ;;  %v7010_v19 = vcombine.high %v2001_v53, %v2005_v60  ;;  %v7016_v38 = vcombine.low %v2001_v53, %v2005_v60 }
 0x215   : > { %v7008_v14 = vcombine.high %v2000_v13, %v2004_v48  ;;  %v7014_v31 = vcombine.low %v2000_v13, %v2004_v48 }
 0x216   : > { %2795 = vmatpush1.bf16.msra.mxu0 %v6978_v15  ;;  %2836 = vmatpush1.bf16.msra.mxu1 %v6980_v18  ;;  %7679 = vst [vmem:[#allocation106_spill] sm:$0xff] %v7010_v19  ;;  %v2009_v18 = vld [vmem:[#allocation6 + $0x258] sm:$0xff]  ;;  %7681 = vst [vmem:[#allocation108_spill] sm:$0xff] %v7016_v38 }
 0x217   : > { %2796 = vmatprep.subr.bf16.mxu0 %v6984_v42  ;;  %2837 = vmatprep.subr.bf16.mxu1 %v6986_v24  ;;  %7678 = vst [vmem:[#allocation105_spill] sm:$0xff] %v7008_v14  ;;  %v2008_v24 = vld [vmem:[#allocation6 + $0x250] sm:$0xff]  ;;  %v2013_v15 = vld [vmem:[#allocation6 + $0x278] sm:$0xff]  ;;  %7680 = vst [vmem:[#allocation107_spill] sm:$0xff] %v7014_v31 }
 0x218   : > { %v2012_v42 = vld [vmem:[#allocation6 + $0x270] sm:$0xff]  ;;  %v7022_v20 = vcombine.high %v2009_v18, %v2013_v15  ;;  %v7028_v60 = vcombine.low %v2009_v18, %v2013_v15 }
 0x219   : > { %v7020_v26 = vcombine.high %v2008_v24, %v2012_v42  ;;  %v7026_v48 = vcombine.low %v2008_v24, %v2012_v42 }
 0x21a   : > { %2797 = vmatpush1.bf16.msra.mxu0 %v6990_v34  ;;  %2838 = vmatpush1.bf16.msra.mxu1 %v6992_v37  ;;  %7683 = vst [vmem:[#allocation110_spill] sm:$0xff] %v7022_v20  ;;  %v2017_v37 = vld [vmem:[#allocation6 + $0x298] sm:$0xff]  ;;  %7685 = vst [vmem:[#allocation112_spill] sm:$0xff] %v7028_v60 }
 0x21b   : > { %2798 = vmatprep.subr.bf16.mxu0 %v6996_v59  ;;  %2839 = vmatprep.subr.bf16.mxu1 %v6998_v30  ;;  %7682 = vst [vmem:[#allocation109_spill] sm:$0xff] %v7020_v26  ;;  %v2016_v30 = vld [vmem:[#allocation6 + $0x290] sm:$0xff]  ;;  %v2021_v34 = vld [vmem:[#allocation6 + $0x2b8] sm:$0xff]  ;;  %7684 = vst [vmem:[#allocation111_spill] sm:$0xff] %v7026_v48 }
 0x21c   : > { %v2020_v59 = vld [vmem:[#allocation6 + $0x2b0] sm:$0xff]  ;;  %v7034_v13 = vcombine.high %v2017_v37, %v2021_v34  ;;  %v7040_v15 = vcombine.low %v2017_v37, %v2021_v34 }
 0x21d   : > { %v7032_v53 = vcombine.high %v2016_v30, %v2020_v59  ;;  %v7038_v42 = vcombine.low %v2016_v30, %v2020_v59 }
 0x21e   : > { %2799 = vmatpush1.bf16.msra.mxu0 %v7002_v17  ;;  %2840 = vmatpush1.bf16.msra.mxu1 %v7004_v11  ;;  %7687 = vst [vmem:[#allocation114_spill] sm:$0xff] %v7034_v13  ;;  %v2025_v11 = vld [vmem:[#allocation6 + $0x2d8] sm:$0xff]  ;;  %7689 = vst [vmem:[#allocation116_spill] sm:$0xff] %v7040_v15 }
 0x21f   : > { %2800 = vmatprep.subr.bf16.mxu0 %v7008_v14  ;;  %2841 = vmatprep.subr.bf16.mxu1 %v7010_v19  ;;  %7686 = vst [vmem:[#allocation113_spill] sm:$0xff] %v7032_v53  ;;  %v2024_v19 = vld [vmem:[#allocation6 + $0x2d0] sm:$0xff]  ;;  %v2029_v17 = vld [vmem:[#allocation6 + $0x2f8] sm:$0xff]  ;;  %7688 = vst [vmem:[#allocation115_spill] sm:$0xff] %v7038_v42 }
 0x220   : > { %v2028_v14 = vld [vmem:[#allocation6 + $0x2f0] sm:$0xff]  ;;  %v7046_v24 = vcombine.high %v2025_v11, %v2029_v17  ;;  %v7052_v34 = vcombine.low %v2025_v11, %v2029_v17 }
 0x221   : > { %v7044_v18 = vcombine.high %v2024_v19, %v2028_v14  ;;  %v7050_v59 = vcombine.low %v2024_v19, %v2028_v14 }
 0x222   : > { %2801 = vmatpush1.bf16.msra.mxu0 %v7014_v31  ;;  %2842 = vmatpush1.bf16.msra.mxu1 %v7016_v38  ;;  %7691 = vst [vmem:[#allocation118_spill] sm:$0xff] %v7046_v24  ;;  %v2033_v38 = vld [vmem:[#allocation6 + $0x318] sm:$0xff]  ;;  %7693 = vst [vmem:[#allocation120_spill] sm:$0xff] %v7052_v34 }
 0x223   : > { %2802 = vmatprep.subr.bf16.mxu0 %v7020_v26  ;;  %2843 = vmatprep.subr.bf16.mxu1 %v7022_v20  ;;  %7690 = vst [vmem:[#allocation117_spill] sm:$0xff] %v7044_v18  ;;  %v2032_v20 = vld [vmem:[#allocation6 + $0x310] sm:$0xff]  ;;  %v2037_v31 = vld [vmem:[#allocation6 + $0x338] sm:$0xff]  ;;  %7692 = vst [vmem:[#allocation119_spill] sm:$0xff] %v7050_v59 }
 0x224   : > { %v2036_v26 = vld [vmem:[#allocation6 + $0x330] sm:$0xff]  ;;  %v7058_v30 = vcombine.high %v2033_v38, %v2037_v31  ;;  %v7064_v17 = vcombine.low %v2033_v38, %v2037_v31 }
 0x225   : > { %v7056_v37 = vcombine.high %v2032_v20, %v2036_v26  ;;  %v7062_v14 = vcombine.low %v2032_v20, %v2036_v26 }
 0x226   : > { %2803 = vmatpush1.bf16.msra.mxu0 %v7026_v48  ;;  %2844 = vmatpush1.bf16.msra.mxu1 %v7028_v60  ;;  %7695 = vst [vmem:[#allocation122_spill] sm:$0xff] %v7058_v30  ;;  %v2041_v60 = vld [vmem:[#allocation6 + $0x358] sm:$0xff] }
 0x227   : > { %2804 = vmatprep.subr.bf16.mxu0 %v7032_v53  ;;  %2845 = vmatprep.subr.bf16.mxu1 %v7034_v13  ;;  %7694 = vst [vmem:[#allocation121_spill] sm:$0xff] %v7056_v37  ;;  %v2040_v13 = vld [vmem:[#allocation6 + $0x350] sm:$0xff]  ;;  %v2045_v48 = vld [vmem:[#allocation6 + $0x378] sm:$0xff] }
 0x228   : > { %v2044_v53 = vld [vmem:[#allocation6 + $0x370] sm:$0xff]  ;;  %v7070_v19 = vcombine.high %v2041_v60, %v2045_v48  ;;  %v7076_v31 = vcombine.low %v2041_v60, %v2045_v48 }
 0x229   : > { %v7068_v11 = vcombine.high %v2040_v13, %v2044_v53  ;;  %v7074_v26 = vcombine.low %v2040_v13, %v2044_v53 }
 0x22a   : > { %2805 = vmatpush1.bf16.msra.mxu0 %v7038_v42  ;;  %2846 = vmatpush1.bf16.msra.mxu1 %v7040_v15  ;;  %7696 = vst [vmem:[#allocation123_spill] sm:$0xff] %v7070_v19  ;;  %v2049_v15 = vld [vmem:[#allocation6 + $0x398] sm:$0xff] }
 0x22b   : > { %2806 = vmatprep.subr.bf16.mxu0 %v7044_v18  ;;  %2847 = vmatprep.subr.bf16.mxu1 %v7046_v24  ;;  %v2048_v24 = vld [vmem:[#allocation6 + $0x390] sm:$0xff]  ;;  %v2053_v42 = vld [vmem:[#allocation6 + $0x3b8] sm:$0xff]  ;;  %7697 = vst [vmem:[#allocation124_spill] sm:$0xff] %v7074_v26 }
 0x22c   : > { %v2052_v18 = vld [vmem:[#allocation6 + $0x3b0] sm:$0xff]  ;;  %v7082_v20 = vcombine.high %v2049_v15, %v2053_v42  ;;  %v7088_v48 = vcombine.low %v2049_v15, %v2053_v42 }
 0x22d   : > { %v7080_v38 = vcombine.high %v2048_v24, %v2052_v18  ;;  %v7086_v53 = vcombine.low %v2048_v24, %v2052_v18  ;;  %v7731_v24 = vld [vmem:[#allocation27_spill] sm:$0xff] }
 0x22e   : > { %2807 = vmatpush1.bf16.msra.mxu0 %v7050_v59  ;;  %2848 = vmatpush1.bf16.msra.mxu1 %v7052_v34  ;;  %v2057_v34 = vld [vmem:[#allocation6 + $0x3d8] sm:$0xff] }
 0x22f   : > { %2808 = vmatprep.subr.bf16.mxu0 %v7056_v37  ;;  %2849 = vmatprep.subr.bf16.mxu1 %v7058_v30  ;;  %v2056_v30 = vld [vmem:[#allocation6 + $0x3d0] sm:$0xff]  ;;  %v2061_v59 = vld [vmem:[#allocation6 + $0x3f8] sm:$0xff] }
 0x230   : > { %v2060_v37 = vld [vmem:[#allocation6 + $0x3f0] sm:$0xff]  ;;  %v7094_v13 = vcombine.high %v2057_v34, %v2061_v59 }
 0x231   : > { %v7092_v60 = vcombine.high %v2056_v30, %v2060_v37 }
 0x232   : > { %2809 = vmatpush1.bf16.msra.mxu0 %v7062_v14  ;;  %2850 = vmatpush1.bf16.msra.mxu1 %v7064_v17 }
 0x233   : > { %2810 = vmatprep.subr.bf16.mxu0 %v7068_v11  ;;  %2851 = vmatprep.subr.bf16.mxu1 %v7070_v19  ;;  %v7098_v19 = vcombine.low %v2056_v30, %v2060_v37 }
 0x236   : > { %2811 = vmatpush1.bf16.msra.mxu0 %v7074_v26  ;;  %2852 = vmatpush1.bf16.msra.mxu1 %v7076_v31  ;;  %v7100_v26 = vcombine.low %v2057_v34, %v2061_v59  ;;  %v7732_v34 = vld [vmem:[#allocation28_spill] sm:$0xff] }
 0x237   : > { %2812 = vmatprep.subr.bf16.mxu0 %v7080_v38  ;;  %2853 = vmatprep.subr.bf16.mxu1 %v7082_v20 }
 0x23a   : > { %2813 = vmatpush1.bf16.msra.mxu0 %v7086_v53  ;;  %2854 = vmatpush1.bf16.msra.mxu1 %v7088_v48 }
 0x23b   : > { %2814 = vmatprep.subr.bf16.mxu0 %v7092_v60  ;;  %2855 = vmatprep.subr.bf16.mxu1 %v7094_v13 }
 0x23e   : > { %2815 = vmatpush1.bf16.msra.mxu0 %v7098_v19  ;;  %2856 = vmatpush1.bf16.msra.mxu1 %v7100_v26 }
 0x23f   : > { %3720 = vmatprep.subr.bf16.mxu0 %v6566_v41  ;;  %3761 = vmatprep.subr.bf16.mxu1 %v6570_v46  ;;  %v7699_v41 = vld [vmem:[#allocation51_spill] sm:$0xff]  ;;  %v7701_v46 = vld [vmem:[#allocation50_spill] sm:$0xff] }
 0x241   : > { %2817 = vmatmul.mubr.bf16.vlgmr.msra.gmra.mrb[28].mxu0 %v6912_v63  ;;  %2858 = vmatmul.mubr.bf16.vlgmr.msra.gmra.mrb[28].mxu1 %v6912_v63  ;;  %v7730_v63 = vld [vmem:[#allocation26_spill] sm:$0xff] }
 0x242   : > { %3721 = vmatpush1.bf16.msra.mxu0 %v6564_v40  ;;  %3762 = vmatpush1.bf16.msra.mxu1 %v6568_v45  ;;  %v7698_v40 = vld [vmem:[#allocation49_spill] sm:$0xff] }
 0x243   : > { %3722 = vmatprep.subr.bf16.mxu0 %v6572_v47  ;;  %3763 = vmatprep.subr.bf16.mxu1 %v6575_v51  ;;  %v7700_v45 = vld [vmem:[#allocation53_spill] sm:$0xff]  ;;  %v7702_v47 = vld [vmem:[#allocation52_spill] sm:$0xff]  ;;  %v7703_v51 = vld [vmem:[#allocation54_spill] sm:$0xff] }
 0x246   : > { %3723 = vmatpush1.bf16.msra.mxu0 %v6579_v55  ;;  %3764 = vmatpush1.bf16.msra.mxu1 %v6583_v56  ;;  %v7704_v55 = vld [vmem:[#allocation55_spill] sm:$0xff]  ;;  %v7705_v56 = vld [vmem:[#allocation56_spill] sm:$0xff] }
 0x247   : > { %3724 = vmatprep.subr.bf16.mxu0 %v6585_v57  ;;  %3765 = vmatprep.subr.bf16.mxu1 %v6588_v58  ;;  %v7706_v57 = vld [vmem:[#allocation58_spill] sm:$0xff]  ;;  %v7707_v58 = vld [vmem:[#allocation57_spill] sm:$0xff] }
 0x24a   : > { %3725 = vmatpush1.bf16.msra.mxu0 %v6591_v1  ;;  %3766 = vmatpush1.bf16.msra.mxu1 %v6595_v62  ;;  %v7708_v1 = vld [vmem:[#allocation59_spill] sm:$0xff]  ;;  %v7709_v62 = vld [vmem:[#allocation60_spill] sm:$0xff] }
 0x24b   : > { %3726 = vmatprep.subr.bf16.mxu0 %v6597_v4  ;;  %3767 = vmatprep.subr.bf16.mxu1 %v6600_v6  ;;  %v7710_v4 = vld [vmem:[#allocation61_spill] sm:$0xff]  ;;  %v7711_v6 = vld [vmem:[#allocation62_spill] sm:$0xff] }
 0x24e   : > { %3727 = vmatpush1.bf16.msra.mxu0 %v6606_v10  ;;  %3768 = vmatpush1.bf16.msra.mxu1 %v6612_v12  ;;  %v7712_v10 = vld [vmem:[#allocation65_spill] sm:$0xff]  ;;  %v7713_v12 = vld [vmem:[#allocation63_spill] sm:$0xff] }
 0x24f   : > { %3728 = vmatprep.subr.bf16.mxu0 %v6678_v8  ;;  %3769 = vmatprep.subr.bf16.mxu1 %v6697_v33  ;;  %v7715_v8 = vld [vmem:[#allocation66_spill] sm:$0xff]  ;;  %v7720_v33 = vld [vmem:[#allocation73_spill] sm:$0xff] }
 0x252   : > { %3729 = vmatpush1.bf16.msra.mxu0 %v6686_v9  ;;  %3770 = vmatpush1.bf16.msra.mxu1 %v6688_v5  ;;  %v7717_v9 = vld [vmem:[#allocation67_spill] sm:$0xff]  ;;  %v7718_v5 = vld [vmem:[#allocation68_spill] sm:$0xff] }
 0x253   : > { %3730 = vmatprep.subr.bf16.mxu0 %v6713_v61  ;;  %3771 = vmatprep.subr.bf16.mxu1 %v6720_v28  ;;  %v7722_v61 = vld [vmem:[#allocation72_spill] sm:$0xff]  ;;  %v7725_v28 = vld [vmem:[#allocation75_spill] sm:$0xff] }
 0x256   : > { %3731 = vmatpush1.bf16.msra.mxu0 %v6716_v23  ;;  %3772 = vmatpush1.bf16.msra.mxu1 %v6718_v2  ;;  %v7723_v23 = vld [vmem:[#allocation74_spill] sm:$0xff]  ;;  %v7724_v2 = vld [vmem:[#allocation77_spill] sm:$0xff] }
 0x257   : > { %3732 = vmatprep.subr.bf16.mxu0 %v6725_v25  ;;  %3773 = vmatprep.subr.bf16.mxu1 %v6745_v0  ;;  %v7719_v25 = vld [vmem:[#allocation70_spill] sm:$0xff]  ;;  %v7721_v0 = vld [vmem:[#allocation71_spill] sm:$0xff] }
 0x25a   : > { %3733 = vmatpush1.bf16.msra.mxu0 %v6734_v21  ;;  %3774 = vmatpush1.bf16.msra.mxu1 %v6736_v50  ;;  %v7714_v50 = vld [vmem:[#allocation64_spill] sm:$0xff]  ;;  %v7716_v21 = vld [vmem:[#allocation69_spill] sm:$0xff] }
 0x25b   : > { %3734 = vmatprep.subr.bf16.mxu0 %v6761_v44  ;;  %3775 = vmatprep.subr.bf16.mxu1 %v6768_v43  ;;  %v7726_v44 = vld [vmem:[#allocation76_spill] sm:$0xff] }
 0x25e   : > { %3735 = vmatpush1.bf16.msra.mxu0 %v6764_v52  ;;  %3776 = vmatpush1.bf16.msra.mxu1 %v6766_v7  ;;  %v7727_v52 = vld [vmem:[#allocation78_spill] sm:$0xff]  ;;  %v7728_v7 = vld [vmem:[#allocation79_spill] sm:$0xff] }
 0x25f   : > { %3736 = vmatprep.subr.bf16.mxu0 %v6773_v3  ;;  %3777 = vmatprep.subr.bf16.mxu1 %v6780_v35 }
 0x262   : > { %3737 = vmatpush1.bf16.msra.mxu0 %v6776_v39  ;;  %3778 = vmatpush1.bf16.msra.mxu1 %v7698_v40  ;;  %v7729_v39 = vld [vmem:[#allocation25_spill] sm:$0xff] }
 0x263   : > { %3738 = vmatprep.subr.bf16.mxu0 %v7699_v41  ;;  %3779 = vmatprep.subr.bf16.mxu1 %v7700_v45 }
 0x266   : > { %3739 = vmatpush1.bf16.msra.mxu0 %v7701_v46  ;;  %3780 = vmatpush1.bf16.msra.mxu1 %v7702_v47 }
 0x267   : > { %3740 = vmatprep.subr.bf16.mxu0 %v7703_v51  ;;  %3781 = vmatprep.subr.bf16.mxu1 %v7704_v55 }
 0x26a   : > { %3741 = vmatpush1.bf16.msra.mxu0 %v7705_v56  ;;  %3782 = vmatpush1.bf16.msra.mxu1 %v7706_v57 }
 0x26b   : > { %3742 = vmatprep.subr.bf16.mxu0 %v7707_v58  ;;  %3783 = vmatprep.subr.bf16.mxu1 %v7708_v1 }
 0x26e   : > { %3743 = vmatpush1.bf16.msra.mxu0 %v7709_v62  ;;  %3784 = vmatpush1.bf16.msra.mxu1 %v7710_v4 }
 0x26f   : > { %3744 = vmatprep.subr.bf16.mxu0 %v7711_v6  ;;  %3785 = vmatprep.subr.bf16.mxu1 %v7712_v10 }
 0x272   : > { %3745 = vmatpush1.bf16.msra.mxu0 %v7713_v12  ;;  %3786 = vmatpush1.bf16.msra.mxu1 %v7714_v50 }
 0x273   : > { %3746 = vmatprep.subr.bf16.mxu0 %v7715_v8  ;;  %3787 = vmatprep.subr.bf16.mxu1 %v7716_v21 }
 0x276   : > { %3747 = vmatpush1.bf16.msra.mxu0 %v7717_v9  ;;  %3788 = vmatpush1.bf16.msra.mxu1 %v7718_v5 }
 0x277   : > { %3748 = vmatprep.subr.bf16.mxu0 %v7719_v25  ;;  %3789 = vmatprep.subr.bf16.mxu1 %v7720_v33  ;;  %v5660_v25 = vld [vmem:[%s6466_s14 + $0x8] sm:$0xff]  ;;  %v4968_v33 = vld [vmem:[%s6466_s14] sm:$0xff]  ;;  %s5818_s14 = sshll.u32 %s6237_s15, 9 }
 0x278   : > { %vm3954_vm5 = vcmp.gt.f32.partialorder %v5660_v25, 0.0  ;;  %vm4969_vm6 = vcmp.gt.f32.partialorder %v4968_v33, 0.0  ;;  %v7740_v25 = vld [vmem:[#allocation82_spill] sm:$0xff]  ;;  %v7741_v33 = vld [vmem:[#allocation83_spill] sm:$0xff]  ;;  %s7352_s11 = scalar_lea.hbm %s7475_s8, %s5818_s14 }
 0x27a   : > { %3749 = vmatpush1.bf16.msra.mxu0 %v7721_v0  ;;  %3790 = vmatpush1.bf16.msra.mxu1 %v7722_v61  ;;  %v7733_v0 = vmov 0  }
 0x27b   : > { %3750 = vmatprep.subr.bf16.mxu0 %v7723_v23  ;;  %3791 = vmatprep.subr.bf16.mxu1 %v7724_v2  ;;  %v3955_v61 = vsel %vm3954_vm5, 1, %v7733_v0  ;;  %v4970_v23 = vsel %vm4969_vm6, 1, %v7733_v0  ;;  %v7742_v0 = vld [vmem:[#allocation84_spill] sm:$0xff] }
 0x27c   : > { %3957 = vperm.xlu1 %5922, %v3955_v61   ;;  %v7745_v61 = vld [vmem:[#allocation87_spill] sm:$0xff] }
 0x27e   : > { %3751 = vmatpush1.bf16.msra.mxu0 %v7725_v28  ;;  %3792 = vmatpush1.bf16.msra.mxu1 %v7726_v44  ;;  %v7734_v28 = vld [vmem:[#allocation45_spill] sm:$0xff] }
 0x27f   : > { %3802 = vmatprep.subr.bf16.mxu0 %v7727_v52  ;;  %3843 = vmatprep.subr.bf16.mxu1 %v7728_v7  ;;  %v7735_v52 = vld [vmem:[#allocation46_spill] sm:$0xff] }
 0x280   : > { %4972 = vperm.xlu1 %5922, %v4970_v23   ;;  %v7749_v23 = vld [vmem:[#allocation91_spill] sm:$0xff] }
 0x2d4   : > { %v2736_v43 = vpop.f32.mrb[24].mxu0  ;;  %v2777_v3 = vpop.f32.mrb[24].mxu1 }
 0x2d5   : > { %v2873_v35 = vadd.f32 %v2736_v43, %v7729_v39  ;;  %v2875_v42 = vadd.f32 %v2777_v3, %v7730_v63  ;;  %v2738_v15 = vpop.f32.mrb[25].mxu0  ;;  %v2779_v18 = vpop.f32.mrb[25].mxu1  ;;  %v7736_v39 = vld [vmem:[#allocation47_spill] sm:$0xff]  ;;  %v7737_v63 = vld [vmem:[#allocation48_spill] sm:$0xff] }
 0x2d6   : > { %v2874_v59 = vadd.f32 %v2738_v15, %v7731_v24  ;;  %v2876_v37 = vadd.f32 %v2779_v18, %v7732_v34  ;;  %v2740_v30 = vpop.f32.mrb[26].mxu0  ;;  %v2781_v40 = vpop.f32.mrb[26].mxu1 }
 0x2d7   : > { %v5505_v41 = vmul.f32 -1.442695, %v2873_v35  ;;  %v2741_v45 = vpop.f32.mrb[27].mxu0  ;;  %v2782_v46 = vpop.f32.mrb[27].mxu1 }
 0x2d8   : > { %v5506_v47 = vmul.f32 -1.442695, %v2874_v59  ;;  %v5507_v51 = vmul.f32 -1.442695, %v2876_v37 }
 0x2d9   : > { %5983 = vpow2.f32 %v5505_v41 }
 0x2da   : > { %5985 = vpow2.f32 %v5506_v47 }
 0x2db   : > { %5987 = vpow2.f32 %v5507_v51 }
 0x2dc   : > { %5989 = vtanh.f32 %v2875_v42 }
 0x2e3   : > { %v5984_v55 = vpop.eup %5983 }
 0x2e4   : > { %v5986_v56 = vpop.eup %5985  ;;  %v2891_v57 = vadd.f32 1.0, %v5984_v55 }
 0x2e5   : > { %v2897_v58 = vadd.f32 1.0, %v5986_v56  ;;  %v5988_v1 = vpop.eup %5987 }
 0x2e6   : > { %5991 = vrcp.f32 %v2891_v57  ;;  %v5990_v62 = vpop.eup %5989  ;;  %v2904_v12 = vadd.f32 1.0, %v5988_v1  ;;  %v1928_v57 = vsel %vm1926_vm3, %v6896_v36, 0.0 }
 0x2e7   : > { %5993 = vrcp.f32 %v2897_v58 }
 0x2e8   : > { %5995 = vrcp.f32 %v2904_v12 }
 0x2f0   : > { %v5992_v4 = vpop.eup %5991 }
 0x2f1   : > { %v5994_v6 = vpop.eup %5993  ;;  %v2908_v10 = vmul.f32 %v5992_v4, %v5990_v62 }
 0x2f2   : > { %v2907_v50 = vmul.f32 %v5994_v6, %v6888_v32  ;;  %v5996_v21 = vpop.eup %5995  ;;  %v7197_v6 = vpop.permute.xlu0 %2941 }
 0x2f3   : > { %vm2943_vm7 = vcmp.eq.s32.totalorder %v7197_v6, 1  ;;  %v3978_v6 = vld [vmem:[#allocation6 + $0x50] sm:$0xff] }
 0x2f4   : > { %v7179_v8 = vadd.f32 %v2908_v10, %v2907_v50  ;;  %vm5642_vm8 = vmpackc.low %vm2943_vm7, %vm2943_vm7 }
 0x2f6   : > { %5997 = vtanh.f32 %v7179_v8 }
 0x300   : > { %v5998_v9 = vpop.eup %5997 }
 0x301   : > { %v2911_v5 = vmul.f32 %v5998_v9, %v5996_v21  ;;  %v7738_v9 = vld [vmem:[#allocation80_spill] sm:$0xff] }
 0x303   : > { %5512 = vst [vmem:[%s6473_s27 + $0x8] sm:$0xff] %v2911_v5  ;;  %v7206_v36 = vpack.c.bf16 %v2911_v5, %v2911_v5  ;;  %v7739_v5 = vld [vmem:[#allocation81_spill] sm:$0xff] }
 0x314   : > { %v2818_v32 = vpop.f32.mrb[28].mxu0  ;;  %v2859_v2 = vpop.f32.mrb[28].mxu1 }
 0x315   : > { %v2884_v44 = vadd.f32 %v2818_v32, %v7734_v28  ;;  %v2886_v7 = vadd.f32 %v2859_v2, %v7735_v52  ;;  %v2820_v43 = vpop.f32.mrb[29].mxu0  ;;  %v2861_v3 = vpop.f32.mrb[29].mxu1  ;;  %v7750_v32 = vld [vmem:[#allocation92_spill] sm:$0xff]  ;;  %v7751_v2 = vld [vmem:[#allocation93_spill] sm:$0xff]  ;;  %v7752_v28 = vld [vmem:[#allocation94_spill] sm:$0xff] }
 0x316   : > { %v2885_v35 = vadd.f32 %v2820_v43, %v7736_v39  ;;  %v2887_v42 = vadd.f32 %v2861_v3, %v7737_v63  ;;  %v2822_v15 = vpop.f32.mrb[30].mxu0  ;;  %v2863_v18 = vpop.f32.mrb[30].mxu1  ;;  %v7754_v52 = vld [vmem:[#allocation96_spill] sm:$0xff]  ;;  %v7756_v43 = vld [vmem:[#allocation98_spill] sm:$0xff]  ;;  %v7757_v3 = vld [vmem:[#allocation99_spill] sm:$0xff] }
 0x317   : > { %v5508_v24 = vmul.f32 -1.442695, %v2884_v44  ;;  %v2823_v59 = vpop.f32.mrb[31].mxu0  ;;  %v2864_v34 = vpop.f32.mrb[31].mxu1  ;;  %v7753_v44 = vld [vmem:[#allocation95_spill] sm:$0xff]  ;;  %v7758_v39 = vld [vmem:[#allocation100_spill] sm:$0xff] }
 0x318   : > { %v5509_v37 = vmul.f32 -1.442695, %v2885_v35  ;;  %v5510_v30 = vmul.f32 -1.442695, %v2887_v42  ;;  %v7759_v35 = vld [vmem:[#allocation101_spill] sm:$0xff]  ;;  %v7760_v63 = vld [vmem:[#allocation102_spill] sm:$0xff] }
 0x319   : > { %5999 = vpow2.f32 %v5508_v24  ;;  %v7761_v42 = vld [vmem:[#allocation103_spill] sm:$0xff]  ;;  %v7762_v15 = vld [vmem:[#allocation104_spill] sm:$0xff]  ;;  %v7763_v18 = vld [vmem:[#allocation105_spill] sm:$0xff] }
 0x31a   : > { %6001 = vpow2.f32 %v5509_v37  ;;  %v7764_v24 = vld [vmem:[#allocation106_spill] sm:$0xff]  ;;  %v7765_v59 = vld [vmem:[#allocation107_spill] sm:$0xff]  ;;  %v7766_v34 = vld [vmem:[#allocation108_spill] sm:$0xff] }
 0x31b   : > { %6003 = vpow2.f32 %v5510_v30  ;;  %v7767_v37 = vld [vmem:[#allocation109_spill] sm:$0xff]  ;;  %v7768_v30 = vld [vmem:[#allocation110_spill] sm:$0xff] }
 0x31c   : > { %6005 = vtanh.f32 %v2886_v7  ;;  %v7755_v7 = vld [vmem:[#allocation97_spill] sm:$0xff] }
 0x323   : > { %v6000_v40 = vpop.eup %5999 }
 0x324   : > { %v6002_v41 = vpop.eup %6001  ;;  %v2915_v45 = vadd.f32 1.0, %v6000_v40  ;;  %v7769_v40 = vld [vmem:[#allocation111_spill] sm:$0xff] }
 0x325   : > { %v2921_v46 = vadd.f32 1.0, %v6002_v41  ;;  %v6004_v47 = vpop.eup %6003  ;;  %v7770_v41 = vld [vmem:[#allocation112_spill] sm:$0xff] }
 0x326   : > { %6007 = vrcp.f32 %v2915_v45  ;;  %v6006_v51 = vpop.eup %6005  ;;  %v2928_v1 = vadd.f32 1.0, %v6004_v47  ;;  %v7771_v45 = vld [vmem:[#allocation113_spill] sm:$0xff]  ;;  %v7773_v47 = vld [vmem:[#allocation115_spill] sm:$0xff] }
 0x327   : > { %6009 = vrcp.f32 %v2921_v46  ;;  %v7772_v46 = vld [vmem:[#allocation114_spill] sm:$0xff] }
 0x328   : > { %6011 = vrcp.f32 %v2928_v1  ;;  %v7779_v1 = vld [vmem:[#allocation121_spill] sm:$0xff] }
 0x330   : > { %v6008_v55 = vpop.eup %6007 }
 0x331   : > { %v6010_v56 = vpop.eup %6009  ;;  %v2932_v58 = vmul.f32 %v6008_v55, %v6006_v51  ;;  %v7774_v51 = vld [vmem:[#allocation116_spill] sm:$0xff]  ;;  %v7775_v55 = vld [vmem:[#allocation117_spill] sm:$0xff] }
 0x332   : > { %v2931_v62 = vmul.f32 %v6010_v56, %v1928_v57  ;;  %v6012_v10 = vpop.eup %6011  ;;  %v7776_v56 = vld [vmem:[#allocation118_spill] sm:$0xff]  ;;  %v7777_v57 = vld [vmem:[#allocation119_spill] sm:$0xff] }
 0x334   : > { %v7194_v4 = vadd.f32 %v2932_v58, %v2931_v62  ;;  %v7778_v58 = vld [vmem:[#allocation120_spill] sm:$0xff]  ;;  %v7780_v62 = vld [vmem:[#allocation122_spill] sm:$0xff] }
 0x336   : > { %6013 = vtanh.f32 %v7194_v4 }
 0x340   : > { %v6014_v12 = vpop.eup %6013 }
 0x341   : > { %v2935_v50 = vmul.f32 %v6014_v12, %v6012_v10  ;;  %v7781_v10 = vld [vmem:[#allocation123_spill] sm:$0xff]  ;;  %v7782_v12 = vld [vmem:[#allocation124_spill] sm:$0xff] }
 0x343   : > { %v2944_v16 = vsel %vm2943_vm7, %v2935_v50, 0.0  ;;  %v5643_v21 = vpack.c.bf16 %v2935_v50, %v2935_v50 }
 0x344   : > { %5513 = vst [vmem:[%s6475_s29 + $0x10] sm:$0xff] %v2944_v16 }
 0x345   : > { %5644 = vmatprep.mubr.msk.bf16.mxu0 %vm5642_vm8, %v5643_v21  ;;  %5647 = vmatprep.mubr.msk.bf16.mxu1 %vm5642_vm8, %v5643_v21 }
 0x346   : > { %3753 = vmatmul.mubr.bf16.vlgmr.msra.gmra.mrb[32].mxu0 %v7206_v36  ;;  %3794 = vmatmul.mubr.bf16.vlgmr.msra.gmra.mrb[32].mxu1 %v7206_v36 }
 0x347   : > { %3803 = vmatpush1.bf16.msra.mxu0 %v6872_v27  ;;  %3844 = vmatpush1.bf16.msra.mxu1 %v6874_v49  ;;  %v7743_v27 = vld [vmem:[#allocation85_spill] sm:$0xff]  ;;  %v7744_v49 = vld [vmem:[#allocation86_spill] sm:$0xff] }
 0x348   : > { %5650 = vmatprep.mubr.msk.bf16.mxu0 %vm5642_vm8, %v5643_v21  ;;  %5653 = vmatprep.mubr.msk.bf16.mxu1 %vm5642_vm8, %v5643_v21  ;;  %v3981_v21 = vld [vmem:[#allocation6 + $0x68] sm:$0xff] }
 0x349   : > { %3804 = vmatprep.subr.bf16.mxu0 %v6918_v54  ;;  %3845 = vmatprep.subr.bf16.mxu1 %v6920_v29  ;;  %v7746_v54 = vld [vmem:[#allocation88_spill] sm:$0xff]  ;;  %v7747_v29 = vld [vmem:[#allocation89_spill] sm:$0xff] }
 0x34b   : > { %3805 = vmatpush1.bf16.msra.mxu0 %v6926_v22  ;;  %3846 = vmatpush1.bf16.msra.mxu1 %v7738_v9  ;;  %v7748_v22 = vld [vmem:[#allocation90_spill] sm:$0xff]  ;;  %v3988_v9 = vld [vmem:[#allocation6 + $0xa0] sm:$0xff] }
 0x34c   : > { %3806 = vmatprep.subr.bf16.mxu0 %v7739_v5  ;;  %3847 = vmatprep.subr.bf16.mxu1 %v7740_v25  ;;  %v3985_v5 = vld [vmem:[#allocation6 + $0x88] sm:$0xff] }
 0x34d   : > { %v3989_v25 = vld [vmem:[#allocation6 + $0xa8] sm:$0xff] }
 0x34f   : > { %3807 = vmatpush1.bf16.msra.mxu0 %v7741_v33  ;;  %3848 = vmatpush1.bf16.msra.mxu1 %v7742_v0 }
 0x350   : > { %3808 = vmatprep.subr.bf16.mxu0 %v7743_v27  ;;  %3849 = vmatprep.subr.bf16.mxu1 %v7744_v49  ;;  %v5682_v27 = vcombine.high %v3985_v5, %v3989_v25  ;;  %v3992_v49 = vld [vmem:[#allocation6 + $0xc0] sm:$0xff] }
 0x353   : > { %3809 = vmatpush1.bf16.msra.mxu0 %v7745_v61  ;;  %3850 = vmatpush1.bf16.msra.mxu1 %v7746_v54  ;;  %v3996_v61 = vld [vmem:[#allocation6 + $0xe0] sm:$0xff]  ;;  %v3993_v54 = vld [vmem:[#allocation6 + $0xc8] sm:$0xff] }
 0x354   : > { %3810 = vmatprep.subr.bf16.mxu0 %v7747_v29  ;;  %3851 = vmatprep.subr.bf16.mxu1 %v7748_v22  ;;  %v3997_v29 = vld [vmem:[#allocation6 + $0xe8] sm:$0xff] }
 0x357   : > { %3811 = vmatpush1.bf16.msra.mxu0 %v7749_v23  ;;  %3852 = vmatpush1.bf16.msra.mxu1 %v7750_v32  ;;  %v5681_v23 = vcombine.low %v3985_v5, %v3989_v25  ;;  %v5688_v32 = vcombine.high %v3992_v49, %v3996_v61  ;;  %v4045_v5 = vld [vmem:[#allocation6 + $0x268] sm:$0xff]  ;;  %v4048_v25 = vld [vmem:[#allocation6 + $0x280] sm:$0xff] }
 0x358   : > { %3812 = vmatprep.subr.bf16.mxu0 %v7751_v2  ;;  %3853 = vmatprep.subr.bf16.mxu1 %v7752_v28  ;;  %v5690_v2 = vcombine.high %v3993_v54, %v3997_v29  ;;  %v5687_v28 = vcombine.low %v3992_v49, %v3996_v61  ;;  %v4049_v49 = vld [vmem:[#allocation6 + $0x288] sm:$0xff] }
 0x359   : > { %v4053_v61 = vld [vmem:[#allocation6 + $0x2a8] sm:$0xff] }
 0x35b   : > { %3813 = vmatpush1.bf16.msra.mxu0 %v7753_v44  ;;  %3854 = vmatpush1.bf16.msra.mxu1 %v7754_v52  ;;  %v5689_v44 = vcombine.low %v3993_v54, %v3997_v29  ;;  %v4000_v52 = vld [vmem:[#allocation6 + $0x100] sm:$0xff]  ;;  %v5746_v29 = vcombine.high %v4049_v49, %v4053_v61 }
 0x35c   : > { %3814 = vmatprep.subr.bf16.mxu0 %v7755_v7  ;;  %3855 = vmatprep.subr.bf16.mxu1 %v7756_v43  ;;  %v4004_v7 = vld [vmem:[#allocation6 + $0x120] sm:$0xff]  ;;  %v4001_v43 = vld [vmem:[#allocation6 + $0x108] sm:$0xff] }
 0x35d   : > { %v4056_v54 = vld [vmem:[#allocation6 + $0x2c0] sm:$0xff] }
 0x35f   : > { %3815 = vmatpush1.bf16.msra.mxu0 %v7757_v3  ;;  %3856 = vmatpush1.bf16.msra.mxu1 %v7758_v39  ;;  %v5696_v3 = vcombine.high %v4000_v52, %v4004_v7  ;;  %v4005_v39 = vld [vmem:[#allocation6 + $0x128] sm:$0xff] }
 0x360   : > { %3816 = vmatprep.subr.bf16.mxu0 %v7759_v35  ;;  %3857 = vmatprep.subr.bf16.mxu1 %v7760_v63  ;;  %v5695_v35 = vcombine.low %v4000_v52, %v4004_v7  ;;  %v5697_v63 = vcombine.low %v4001_v43, %v4005_v39 }
 0x363   : > { %3817 = vmatpush1.bf16.msra.mxu0 %v7761_v42  ;;  %3858 = vmatpush1.bf16.msra.mxu1 %v7762_v15  ;;  %v5698_v42 = vcombine.high %v4001_v43, %v4005_v39  ;;  %v4008_v15 = vld [vmem:[#allocation6 + $0x140] sm:$0xff] }
 0x364   : > { %3818 = vmatprep.subr.bf16.mxu0 %v7763_v18  ;;  %3859 = vmatprep.subr.bf16.mxu1 %v7764_v24  ;;  %v4012_v18 = vld [vmem:[#allocation6 + $0x160] sm:$0xff]  ;;  %v4009_v24 = vld [vmem:[#allocation6 + $0x148] sm:$0xff] }
 0x365   : > { %v4068_v39 = vld [vmem:[#allocation6 + $0x320] sm:$0xff] }
 0x367   : > { %3819 = vmatpush1.bf16.msra.mxu0 %v7765_v59  ;;  %3860 = vmatpush1.bf16.msra.mxu1 %v7766_v34  ;;  %v5704_v59 = vcombine.high %v4008_v15, %v4012_v18  ;;  %v4013_v34 = vld [vmem:[#allocation6 + $0x168] sm:$0xff] }
 0x368   : > { %3820 = vmatprep.subr.bf16.mxu0 %v7767_v37  ;;  %3861 = vmatprep.subr.bf16.mxu1 %v7768_v30  ;;  %v5703_v37 = vcombine.low %v4008_v15, %v4012_v18  ;;  %v5705_v30 = vcombine.low %v4009_v24, %v4013_v34 }
 0x36b   : > { %3821 = vmatpush1.bf16.msra.mxu0 %v7769_v40  ;;  %3862 = vmatpush1.bf16.msra.mxu1 %v7770_v41  ;;  %v5706_v40 = vcombine.high %v4009_v24, %v4013_v34  ;;  %v4016_v41 = vld [vmem:[#allocation6 + $0x180] sm:$0xff] }
 0x36c   : > { %3822 = vmatprep.subr.bf16.mxu0 %v7771_v45  ;;  %3863 = vmatprep.subr.bf16.mxu1 %v7772_v46  ;;  %v4020_v45 = vld [vmem:[#allocation6 + $0x1a0] sm:$0xff]  ;;  %v4017_v46 = vld [vmem:[#allocation6 + $0x188] sm:$0xff] }
 0x36d   : > { %v4076_v34 = vld [vmem:[#allocation6 + $0x360] sm:$0xff] }
 0x36f   : > { %3823 = vmatpush1.bf16.msra.mxu0 %v7773_v47  ;;  %3864 = vmatpush1.bf16.msra.mxu1 %v7774_v51  ;;  %v5712_v47 = vcombine.high %v4016_v41, %v4020_v45  ;;  %v4021_v51 = vld [vmem:[#allocation6 + $0x1a8] sm:$0xff] }
 0x370   : > { %3824 = vmatprep.subr.bf16.mxu0 %v7775_v55  ;;  %3865 = vmatprep.subr.bf16.mxu1 %v7776_v56  ;;  %v5711_v55 = vcombine.low %v4016_v41, %v4020_v45  ;;  %v5713_v56 = vcombine.low %v4017_v46, %v4021_v51 }
 0x373   : > { %3825 = vmatpush1.bf16.msra.mxu0 %v7777_v57  ;;  %3866 = vmatpush1.bf16.msra.mxu1 %v7778_v58  ;;  %v5714_v57 = vcombine.high %v4017_v46, %v4021_v51  ;;  %v4024_v58 = vld [vmem:[#allocation6 + $0x1c0] sm:$0xff] }
 0x374   : > { %3826 = vmatprep.subr.bf16.mxu0 %v7779_v1  ;;  %3867 = vmatprep.subr.bf16.mxu1 %v7780_v62  ;;  %v4028_v1 = vld [vmem:[#allocation6 + $0x1e0] sm:$0xff]  ;;  %v4025_v62 = vld [vmem:[#allocation6 + $0x1c8] sm:$0xff] }
 0x375   : > { %v4084_v51 = vld [vmem:[#allocation6 + $0x3a0] sm:$0xff] }
 0x377   : > { %3827 = vmatpush1.bf16.msra.mxu0 %v7062_v14  ;;  %3868 = vmatpush1.bf16.msra.mxu1 %v7064_v17  ;;  %v3968_v14 = vld [vmem:[#allocation6] sm:$0xff] }
 0x378   : > { %3828 = vmatprep.subr.bf16.mxu0 %v7068_v11  ;;  %3869 = vmatprep.subr.bf16.mxu1 %v7781_v10  ;;  %v3972_v17 = vld [vmem:[#allocation6 + $0x20] sm:$0xff]  ;;  %v3969_v11 = vld [vmem:[#allocation6 + $0x8] sm:$0xff]  ;;  %v5720_v10 = vcombine.high %v4024_v58, %v4028_v1 }
 0x37b   : > { %3829 = vmatpush1.bf16.msra.mxu0 %v7782_v12  ;;  %3870 = vmatpush1.bf16.msra.mxu1 %v7076_v31  ;;  %v5663_v31 = vcombine.low %v3968_v14, %v3972_v17  ;;  %v4029_v12 = vld [vmem:[#allocation6 + $0x1e8] sm:$0xff] }
 0x37c   : > { %3830 = vmatprep.subr.bf16.mxu0 %v7080_v38  ;;  %3871 = vmatprep.subr.bf16.mxu1 %v7082_v20  ;;  %v5664_v38 = vcombine.high %v3968_v14, %v3972_v17  ;;  %v3973_v20 = vld [vmem:[#allocation6 + $0x28] sm:$0xff]  ;;  %v5719_v14 = vcombine.low %v4024_v58, %v4028_v1  ;;  %v5721_v17 = vcombine.low %v4025_v62, %v4029_v12 }
 0x37d   : > { %v5665_v50 = vcombine.low %v3969_v11, %v3973_v20 }
 0x37f   : > { %3831 = vmatpush1.bf16.msra.mxu0 %v7086_v53  ;;  %3872 = vmatpush1.bf16.msra.mxu1 %v7088_v48  ;;  %v3976_v53 = vld [vmem:[#allocation6 + $0x40] sm:$0xff] }
 0x380   : > { %3832 = vmatprep.subr.bf16.mxu0 %v7092_v60  ;;  %3873 = vmatprep.subr.bf16.mxu1 %v7094_v13  ;;  %v3980_v48 = vld [vmem:[#allocation6 + $0x60] sm:$0xff]  ;;  %v5666_v60 = vcombine.high %v3969_v11, %v3973_v20  ;;  %v3977_v13 = vld [vmem:[#allocation6 + $0x48] sm:$0xff]  ;;  %v5722_v11 = vcombine.high %v4025_v62, %v4029_v12 }
 0x381   : > { %v5672_v16 = vcombine.high %v3976_v53, %v3980_v48  ;;  %v5673_v33 = vcombine.low %v3977_v13, %v3981_v21  ;;  %v4033_v20 = vld [vmem:[#allocation6 + $0x208] sm:$0xff]  ;;  %v4092_v12 = vld [vmem:[#allocation6 + $0x3e0] sm:$0xff] }
 0x383   : > { %3833 = vmatpush1.bf16.msra.mxu0 %v7098_v19  ;;  %3874 = vmatpush1.bf16.msra.mxu1 %v7100_v26  ;;  %v3984_v19 = vld [vmem:[#allocation6 + $0x80] sm:$0xff]  ;;  %v5674_v26 = vcombine.high %v3977_v13, %v3981_v21 }
 0x384   : > { %4736 = vmatprep.subr.bf16.mxu0 %v5664_v38  ;;  %4777 = vmatprep.subr.bf16.mxu1 %v5666_v60  ;;  %v5680_v0 = vcombine.high %v3984_v19, %v3988_v9  ;;  %v5679_v22 = vcombine.low %v3984_v19, %v3988_v9  ;;  %v4036_v38 = vld [vmem:[#allocation6 + $0x220] sm:$0xff]  ;;  %v4041_v19 = vld [vmem:[#allocation6 + $0x248] sm:$0xff] }
 0x385   : > { %v4040_v13 = vld [vmem:[#allocation6 + $0x240] sm:$0xff] }
 0x386   : > { %3835 = vmatmul.mubr.bf16.vlgmr.msra.gmra.mrb[36].mxu0 %v7206_v36  ;;  %3876 = vmatmul.mubr.bf16.vlgmr.msra.gmra.mrb[36].mxu1 %v7206_v36  ;;  %v5671_v36 = vcombine.low %v3976_v53, %v3980_v48  ;;  %v4037_v48 = vld [vmem:[#allocation6 + $0x228] sm:$0xff]  ;;  %v4044_v21 = vld [vmem:[#allocation6 + $0x260] sm:$0xff] }
 0x387   : > { %4737 = vmatpush1.bf16.msra.mxu0 %v5663_v31  ;;  %4778 = vmatpush1.bf16.msra.mxu1 %v5665_v50  ;;  %v4032_v31 = vld [vmem:[#allocation6 + $0x200] sm:$0xff]  ;;  %v5729_v60 = vcombine.low %v4033_v20, %v4037_v48  ;;  %v5736_v9 = vcombine.high %v4040_v13, %v4044_v21 }
 0x388   : > { %4738 = vmatprep.subr.bf16.mxu0 %v5672_v16  ;;  %4779 = vmatprep.subr.bf16.mxu1 %v5674_v26  ;;  %v5728_v53 = vcombine.high %v4032_v31, %v4036_v38  ;;  %v5727_v50 = vcombine.low %v4032_v31, %v4036_v38  ;;  %v5730_v16 = vcombine.high %v4033_v20, %v4037_v48  ;;  %v7276_v48 = vld [vmem:[#allocation6 + $0x30] sm:$0xff] }
 0x389   : > { %v5735_v26 = vcombine.low %v4040_v13, %v4044_v21 }
 0x38b   : > { %4739 = vmatpush1.bf16.msra.mxu0 %v5671_v36  ;;  %4780 = vmatpush1.bf16.msra.mxu1 %v5673_v33  ;;  %v4052_v36 = vld [vmem:[#allocation6 + $0x2a0] sm:$0xff]  ;;  %v5737_v33 = vcombine.low %v4041_v19, %v4045_v5 }
 0x38c   : > { %4740 = vmatprep.subr.bf16.mxu0 %v5680_v0  ;;  %4781 = vmatprep.subr.bf16.mxu1 %v5682_v27  ;;  %v5738_v0 = vcombine.high %v4041_v19, %v4045_v5  ;;  %v5744_v27 = vcombine.high %v4048_v25, %v4052_v36  ;;  %v7783_v5 = vld [vmem:[#allocation29_spill] sm:$0xff] }
 0x38f   : > { %4741 = vmatpush1.bf16.msra.mxu0 %v5679_v22  ;;  %4782 = vmatpush1.bf16.msra.mxu1 %v5681_v23  ;;  %v4060_v22 = vld [vmem:[#allocation6 + $0x2e0] sm:$0xff]  ;;  %v4057_v23 = vld [vmem:[#allocation6 + $0x2c8] sm:$0xff] }
 0x390   : > { %4742 = vmatprep.subr.bf16.mxu0 %v5688_v32  ;;  %4783 = vmatprep.subr.bf16.mxu1 %v5690_v2  ;;  %v4061_v32 = vld [vmem:[#allocation6 + $0x2e8] sm:$0xff]  ;;  %v5743_v2 = vcombine.low %v4048_v25, %v4052_v36  ;;  %v5751_v7 = vcombine.low %v4056_v54, %v4060_v22 }
 0x391   : > { %v5754_v52 = vcombine.high %v4057_v23, %v4061_v32  ;;  %v5753_v43 = vcombine.low %v4057_v23, %v4061_v32  ;;  %v7784_v36 = vld [vmem:[#allocation30_spill] sm:$0xff] }
 0x393   : > { %4743 = vmatpush1.bf16.msra.mxu0 %v5687_v28  ;;  %4784 = vmatpush1.bf16.msra.mxu1 %v5689_v44  ;;  %v5745_v28 = vcombine.low %v4049_v49, %v4053_v61  ;;  %v5752_v44 = vcombine.high %v4056_v54, %v4060_v22  ;;  %v7785_v49 = vld [vmem:[#allocation31_spill] sm:$0xff]  ;;  %v7786_v54 = vld [vmem:[#allocation32_spill] sm:$0xff] }
 0x394   : > { %4744 = vmatprep.subr.bf16.mxu0 %v5696_v3  ;;  %4785 = vmatprep.subr.bf16.mxu1 %v5698_v42  ;;  %v4064_v3 = vld [vmem:[#allocation6 + $0x300] sm:$0xff]  ;;  %v4069_v42 = vld [vmem:[#allocation6 + $0x328] sm:$0xff] }
 0x395   : > { %v5759_v15 = vcombine.low %v4064_v3, %v4068_v39 }
 0x397   : > { %4745 = vmatpush1.bf16.msra.mxu0 %v5695_v35  ;;  %4786 = vmatpush1.bf16.msra.mxu1 %v5697_v63  ;;  %v4065_v35 = vld [vmem:[#allocation6 + $0x308] sm:$0xff]  ;;  %v5760_v63 = vcombine.high %v4064_v3, %v4068_v39 }
 0x398   : > { %4746 = vmatprep.subr.bf16.mxu0 %v5704_v59  ;;  %4787 = vmatprep.subr.bf16.mxu1 %v5706_v40  ;;  %v5761_v18 = vcombine.low %v4065_v35, %v4069_v42  ;;  %v5762_v24 = vcombine.high %v4065_v35, %v4069_v42  ;;  %v4072_v59 = vld [vmem:[#allocation6 + $0x340] sm:$0xff]  ;;  %v4077_v40 = vld [vmem:[#allocation6 + $0x368] sm:$0xff] }
 0x399   : > { %v5767_v41 = vcombine.low %v4072_v59, %v4076_v34 }
 0x39b   : > { %4747 = vmatpush1.bf16.msra.mxu0 %v5703_v37  ;;  %4788 = vmatpush1.bf16.msra.mxu1 %v5705_v30  ;;  %v4073_v37 = vld [vmem:[#allocation6 + $0x348] sm:$0xff]  ;;  %v5768_v30 = vcombine.high %v4072_v59, %v4076_v34 }
 0x39c   : > { %4748 = vmatprep.subr.bf16.mxu0 %v5712_v47  ;;  %4789 = vmatprep.subr.bf16.mxu1 %v5714_v57  ;;  %v5769_v45 = vcombine.low %v4073_v37, %v4077_v40  ;;  %v5770_v46 = vcombine.high %v4073_v37, %v4077_v40  ;;  %v4080_v47 = vld [vmem:[#allocation6 + $0x380] sm:$0xff]  ;;  %v4085_v57 = vld [vmem:[#allocation6 + $0x3a8] sm:$0xff] }
 0x39d   : > { %v5775_v58 = vcombine.low %v4080_v47, %v4084_v51 }
 0x39f   : > { %4749 = vmatpush1.bf16.msra.mxu0 %v5711_v55  ;;  %4790 = vmatpush1.bf16.msra.mxu1 %v5713_v56  ;;  %v4081_v55 = vld [vmem:[#allocation6 + $0x388] sm:$0xff]  ;;  %v5776_v56 = vcombine.high %v4080_v47, %v4084_v51 }
 0x3a0   : > { %4750 = vmatprep.subr.bf16.mxu0 %v5720_v10  ;;  %4791 = vmatprep.subr.bf16.mxu1 %v5722_v11  ;;  %v5777_v1 = vcombine.low %v4081_v55, %v4085_v57  ;;  %v5778_v62 = vcombine.high %v4081_v55, %v4085_v57  ;;  %v4088_v10 = vld [vmem:[#allocation6 + $0x3c0] sm:$0xff]  ;;  %v4093_v11 = vld [vmem:[#allocation6 + $0x3e8] sm:$0xff] }
 0x3a1   : > { %v5783_v31 = vcombine.low %v4088_v10, %v4092_v12  ;;  %v7788_v51 = vld [vmem:[#allocation42_spill] sm:$0xff] }
 0x3a3   : > { %4751 = vmatpush1.bf16.msra.mxu0 %v5719_v14  ;;  %4792 = vmatpush1.bf16.msra.mxu1 %v5721_v17  ;;  %v4089_v14 = vld [vmem:[#allocation6 + $0x3c8] sm:$0xff]  ;;  %v5784_v17 = vcombine.high %v4088_v10, %v4092_v12 }
 0x3a4   : > { %4752 = vmatprep.subr.bf16.mxu0 %v5728_v53  ;;  %4793 = vmatprep.subr.bf16.mxu1 %v5730_v16  ;;  %v5785_v38 = vcombine.low %v4089_v14, %v4093_v11  ;;  %v5786_v20 = vcombine.high %v4089_v14, %v4093_v11  ;;  %v7274_v53 = vld [vmem:[#allocation6 + $0x10] sm:$0xff]  ;;  %v7282_v16 = vld [vmem:[#allocation6 + $0x38] sm:$0xff] }
 0x3a5   : > { %v5667_v13 = vcombine.low %v7274_v53, %v7276_v48 }
 0x3a7   : > { %4753 = vmatpush1.bf16.msra.mxu0 %v5727_v50  ;;  %4794 = vmatpush1.bf16.msra.mxu1 %v5729_v60  ;;  %v7278_v50 = vld [vmem:[#allocation6 + $0x18] sm:$0xff]  ;;  %v5668_v60 = vcombine.high %v7274_v53, %v7276_v48 }
 0x3a8   : > { %4754 = vmatprep.subr.bf16.mxu0 %v5736_v9  ;;  %4795 = vmatprep.subr.bf16.mxu1 %v5738_v0  ;;  %v5669_v21 = vcombine.low %v7278_v50, %v7282_v16  ;;  %v5670_v19 = vcombine.high %v7278_v50, %v7282_v16  ;;  %v3995_v53 = vld [vmem:[#allocation6 + $0xd8] sm:$0xff] }
 0x3a9   : > { %v3999_v48 = vld [vmem:[#allocation6 + $0xf8] sm:$0xff] }
 0x3ab   : > { %4755 = vmatpush1.bf16.msra.mxu0 %v5735_v26  ;;  %4796 = vmatpush1.bf16.msra.mxu1 %v5737_v33 }
 0x3ac   : > { %4756 = vmatprep.subr.bf16.mxu0 %v5744_v27  ;;  %4797 = vmatprep.subr.bf16.mxu1 %v5746_v29 }
 0x3af   : > { %4757 = vmatpush1.bf16.msra.mxu0 %v5743_v2  ;;  %4798 = vmatpush1.bf16.msra.mxu1 %v5745_v28 }
 0x3b0   : > { %4758 = vmatprep.subr.bf16.mxu0 %v5752_v44  ;;  %4799 = vmatprep.subr.bf16.mxu1 %v5754_v52 }
 0x3b3   : > { %4759 = vmatpush1.bf16.msra.mxu0 %v5751_v7  ;;  %4800 = vmatpush1.bf16.msra.mxu1 %v5753_v43 }
 0x3b4   : > { %4760 = vmatprep.subr.bf16.mxu0 %v5760_v63  ;;  %4801 = vmatprep.subr.bf16.mxu1 %v5762_v24 }
 0x3b7   : > { %4761 = vmatpush1.bf16.msra.mxu0 %v5759_v15  ;;  %4802 = vmatpush1.bf16.msra.mxu1 %v5761_v18 }
 0x3b8   : > { %4762 = vmatprep.subr.bf16.mxu0 %v5768_v30  ;;  %4803 = vmatprep.subr.bf16.mxu1 %v5770_v46  ;;  %v7787_v46 = vld [vmem:[#allocation41_spill] sm:$0xff] }
 0x3bb   : > { %4763 = vmatpush1.bf16.msra.mxu0 %v5767_v41  ;;  %4804 = vmatpush1.bf16.msra.mxu1 %v5769_v45 }
 0x3bc   : > { %4764 = vmatprep.subr.bf16.mxu0 %v5776_v56  ;;  %4805 = vmatprep.subr.bf16.mxu1 %v5778_v62 }
 0x3bf   : > { %4765 = vmatpush1.bf16.msra.mxu0 %v5775_v58  ;;  %4806 = vmatpush1.bf16.msra.mxu1 %v5777_v1  ;;  %v7789_v58 = vld [vmem:[#allocation43_spill] sm:$0xff] }
 0x3c0   : > { %4766 = vmatprep.subr.bf16.mxu0 %v5784_v17  ;;  %4807 = vmatprep.subr.bf16.mxu1 %v5786_v20 }
 0x3c3   : > { %4767 = vmatpush1.bf16.msra.mxu0 %v5783_v31  ;;  %4808 = vmatpush1.bf16.msra.mxu1 %v5785_v38 }
 0x3c4   : > { %4818 = vmatprep.subr.bf16.mxu0 %v5668_v60  ;;  %4859 = vmatprep.subr.bf16.mxu1 %v5670_v19 }
 0x419   : > { %v3754_v26 = vpop.f32.mrb[32].mxu0  ;;  %v3795_v9 = vpop.f32.mrb[32].mxu1 }
 0x41a   : > { %v3890_v25 = vadd.f32 %v3754_v26, %v7783_v5  ;;  %v3892_v33 = vadd.f32 %v3795_v9, %v7784_v36  ;;  %v3756_v0 = vpop.f32.mrb[33].mxu0  ;;  %v3797_v27 = vpop.f32.mrb[33].mxu1 }
 0x41b   : > { %v3891_v61 = vadd.f32 %v3756_v0, %v7785_v49  ;;  %v3893_v29 = vadd.f32 %v3797_v27, %v7786_v54  ;;  %v3758_v22 = vpop.f32.mrb[34].mxu0  ;;  %v3799_v23 = vpop.f32.mrb[34].mxu1  ;;  %v2945_v0 = vsel %vm2943_vm7, %v7194_v4, 0.0  ;;  %v4039_v4 = vld [vmem:[#allocation6 + $0x238] sm:$0xff] }
 0x41c   : > { %v5654_v32 = vmul.f32 -1.442695, %v3890_v25  ;;  %v3759_v2 = vpop.f32.mrb[35].mxu0  ;;  %v3800_v28 = vpop.f32.mrb[35].mxu1 }
 0x41d   : > { %v5655_v44 = vmul.f32 -1.442695, %v3891_v61  ;;  %v5656_v52 = vmul.f32 -1.442695, %v3893_v29  ;;  %v7309_v54 = vpop.permute.xlu1 %3957  ;;  %v3979_v2 = vld [vmem:[#allocation6 + $0x58] sm:$0xff] }
 0x41e   : > { %6015 = vpow2.f32 %v5654_v32  ;;  %vm3959_vm9 = vcmp.eq.s32.totalorder %v7309_v54, 1  ;;  %v3982_v32 = vld [vmem:[#allocation6 + $0x70] sm:$0xff]  ;;  %v3983_v28 = vld [vmem:[#allocation6 + $0x78] sm:$0xff] }
 0x41f   : > { %6017 = vpow2.f32 %v5655_v44  ;;  %vm7315_vm10 = vmpackc.low %vm3959_vm9, %vm3959_vm9 }
 0x420   : > { %6019 = vpow2.f32 %v5656_v52 }
 0x421   : > { %6021 = vtanh.f32 %v3892_v33 }
 0x428   : > { %v6016_v7 = vpop.eup %6015 }
 0x429   : > { %v6018_v43 = vpop.eup %6017  ;;  %v3907_v3 = vadd.f32 1.0, %v6016_v7 }
 0x42a   : > { %v3913_v39 = vadd.f32 1.0, %v6018_v43  ;;  %v6020_v35 = vpop.eup %6019  ;;  %v3986_v43 = vld [vmem:[#allocation6 + $0x90] sm:$0xff] }
 0x42b   : > { %6023 = vrcp.f32 %v3907_v3  ;;  %v6022_v63 = vpop.eup %6021  ;;  %v3920_v24 = vadd.f32 1.0, %v6020_v35  ;;  %v5676_v3 = vcombine.high %v3978_v6, %v3982_v32  ;;  %v3990_v35 = vld [vmem:[#allocation6 + $0xb0] sm:$0xff] }
 0x42c   : > { %6025 = vrcp.f32 %v3913_v39  ;;  %v5678_v39 = vcombine.high %v3979_v2, %v3983_v28  ;;  %v5683_v50 = vcombine.low %v3986_v43, %v3990_v35 }
 0x42d   : > { %6027 = vrcp.f32 %v3920_v24  ;;  %v5684_v24 = vcombine.high %v3986_v43, %v3990_v35  ;;  %v4043_v43 = vld [vmem:[#allocation6 + $0x258] sm:$0xff] }
 0x435   : > { %v6024_v42 = vpop.eup %6023 }
 0x436   : > { %v6026_v15 = vpop.eup %6025  ;;  %v3924_v18 = vmul.f32 %v6024_v42, %v6022_v63  ;;  %v3987_v63 = vld [vmem:[#allocation6 + $0x98] sm:$0xff] }
 0x437   : > { %v3923_v59 = vmul.f32 %v6026_v15, %v7179_v8  ;;  %v6028_v37 = vpop.eup %6027  ;;  %v7790_v8 = vld [vmem:[#allocation44_spill] sm:$0xff]  ;;  %v5675_v15 = vcombine.low %v3978_v6, %v3982_v32 }
 0x438   : > { %v3991_v42 = vld [vmem:[#allocation6 + $0xb8] sm:$0xff] }
 0x439   : > { %v7295_v34 = vadd.f32 %v3924_v18, %v3923_v59  ;;  %v5677_v18 = vcombine.low %v3979_v2, %v3983_v28  ;;  %v5686_v59 = vcombine.high %v3987_v63, %v3991_v42  ;;  %v5685_v16 = vcombine.low %v3987_v63, %v3991_v42 }
 0x43b   : > { %6029 = vtanh.f32 %v7295_v34 }
 0x445   : > { %v6030_v30 = vpop.eup %6029 }
 0x446   : > { %v3927_v40 = vmul.f32 %v6030_v30, %v6028_v37  ;;  %v3994_v37 = vld [vmem:[#allocation6 + $0xd0] sm:$0xff] }
 0x447   : > { %v3998_v30 = vld [vmem:[#allocation6 + $0xf0] sm:$0xff] }
 0x448   : > { %5661 = vst [vmem:[%s6473_s27 + $0x10] sm:$0xff] %v3927_v40  ;;  %v7322_v7 = vpack.c.bf16 %v3927_v40, %v3927_v40  ;;  %v4002_v40 = vld [vmem:[#allocation6 + $0x110] sm:$0xff] }
 0x459   : > { %v3836_v41 = vpop.f32.mrb[36].mxu0  ;;  %v3877_v45 = vpop.f32.mrb[36].mxu1 }
 0x45a   : > { %v3900_v47 = vadd.f32 %v3836_v41, %v7787_v46  ;;  %v3902_v55 = vadd.f32 %v3877_v45, %v7788_v51  ;;  %v3838_v56 = vpop.f32.mrb[37].mxu0  ;;  %v3879_v57 = vpop.f32.mrb[37].mxu1  ;;  %v4006_v41 = vld [vmem:[#allocation6 + $0x130] sm:$0xff]  ;;  %v4003_v45 = vld [vmem:[#allocation6 + $0x118] sm:$0xff]  ;;  %v5693_v51 = vcombine.low %v3995_v53, %v3999_v48 }
 0x45b   : > { %v3901_v1 = vadd.f32 %v3838_v56, %v7789_v58  ;;  %v3903_v62 = vadd.f32 %v3879_v57, %v7790_v8  ;;  %v3840_v10 = vpop.f32.mrb[38].mxu0  ;;  %v3881_v12 = vpop.f32.mrb[38].mxu1  ;;  %v4007_v46 = vld [vmem:[#allocation6 + $0x138] sm:$0xff]  ;;  %v4010_v57 = vld [vmem:[#allocation6 + $0x150] sm:$0xff] }
 0x45c   : > { %v5657_v14 = vmul.f32 -1.442695, %v3900_v47  ;;  %v3841_v17 = vpop.f32.mrb[39].mxu0  ;;  %v3882_v11 = vpop.f32.mrb[39].mxu1  ;;  %v5691_v47 = vcombine.low %v3994_v37, %v3998_v30  ;;  %v5702_v56 = vcombine.high %v4003_v45, %v4007_v46  ;;  %v4014_v58 = vld [vmem:[#allocation6 + $0x170] sm:$0xff]  ;;  %v4015_v8 = vld [vmem:[#allocation6 + $0x178] sm:$0xff]  ;;  %v5701_v10 = vcombine.low %v4003_v45, %v4007_v46 }
 0x45d   : > { %v5658_v31 = vmul.f32 -1.442695, %v3901_v1  ;;  %v5659_v38 = vmul.f32 -1.442695, %v3903_v62  ;;  %v4011_v1 = vld [vmem:[#allocation6 + $0x158] sm:$0xff]  ;;  %v5699_v62 = vcombine.low %v4002_v40, %v4006_v41  ;;  %v5708_v12 = vcombine.high %v4010_v57, %v4014_v58  ;;  %v4018_v17 = vld [vmem:[#allocation6 + $0x190] sm:$0xff] }
 0x45e   : > { %6031 = vpow2.f32 %v5657_v14  ;;  %v5710_v14 = vcombine.high %v4011_v1, %v4015_v8  ;;  %v4022_v11 = vld [vmem:[#allocation6 + $0x1b0] sm:$0xff] }
 0x45f   : > { %6033 = vpow2.f32 %v5658_v31  ;;  %v4019_v31 = vld [vmem:[#allocation6 + $0x198] sm:$0xff] }
 0x460   : > { %6035 = vpow2.f32 %v5659_v38  ;;  %v4023_v38 = vld [vmem:[#allocation6 + $0x1b8] sm:$0xff] }
 0x461   : > { %6037 = vtanh.f32 %v3902_v55  ;;  %v5700_v55 = vcombine.high %v4002_v40, %v4006_v41 }
 0x468   : > { %v6032_v20 = vpop.eup %6031 }
 0x469   : > { %v6034_v60 = vpop.eup %6033  ;;  %v3931_v19 = vadd.f32 1.0, %v6032_v20  ;;  %v5707_v20 = vcombine.low %v4010_v57, %v4014_v58 }
 0x46a   : > { %v3937_v26 = vadd.f32 1.0, %v6034_v60  ;;  %v6036_v9 = vpop.eup %6035  ;;  %v5709_v60 = vcombine.low %v4011_v1, %v4015_v8 }
 0x46b   : > { %6039 = vrcp.f32 %v3931_v19  ;;  %v6038_v5 = vpop.eup %6037  ;;  %v3944_v33 = vadd.f32 1.0, %v6036_v9  ;;  %v5716_v19 = vcombine.high %v4018_v17, %v4022_v11  ;;  %v4026_v9 = vld [vmem:[#allocation6 + $0x1d0] sm:$0xff] }
 0x46c   : > { %6041 = vrcp.f32 %v3937_v26  ;;  %v5718_v26 = vcombine.high %v4019_v31, %v4023_v38 }
 0x46d   : > { %6043 = vrcp.f32 %v3944_v33  ;;  %v5715_v33 = vcombine.low %v4018_v17, %v4022_v11 }
 0x475   : > { %v6040_v25 = vpop.eup %6039 }
 0x476   : > { %v6042_v36 = vpop.eup %6041  ;;  %v3948_v27 = vmul.f32 %v6040_v25, %v6038_v5  ;;  %v4030_v5 = vld [vmem:[#allocation6 + $0x1f0] sm:$0xff]  ;;  %v4027_v25 = vld [vmem:[#allocation6 + $0x1d8] sm:$0xff] }
 0x477   : > { %v3947_v49 = vmul.f32 %v6042_v36, %v2945_v0  ;;  %v6044_v29 = vpop.eup %6043  ;;  %v4031_v36 = vld [vmem:[#allocation6 + $0x1f8] sm:$0xff]  ;;  %v5717_v0 = vcombine.low %v4019_v31, %v4023_v38  ;;  %v5723_v6 = vcombine.low %v4026_v9, %v4030_v5 }
 0x478   : > { %v5725_v32 = vcombine.low %v4027_v25, %v4031_v36 }
 0x479   : > { %v7306_v61 = vadd.f32 %v3948_v27, %v3947_v49  ;;  %v5724_v27 = vcombine.high %v4026_v9, %v4030_v5  ;;  %v5726_v49 = vcombine.high %v4027_v25, %v4031_v36 }
 0x47b   : > { %6045 = vtanh.f32 %v7306_v61 }
 0x485   : > { %v6046_v22 = vpop.eup %6045 }
 0x486   : > { %v3951_v23 = vmul.f32 %v6046_v22, %v6044_v29  ;;  %v4034_v29 = vld [vmem:[#allocation6 + $0x210] sm:$0xff] }
 0x487   : > { %v4038_v22 = vld [vmem:[#allocation6 + $0x230] sm:$0xff] }
 0x488   : > { %v3960_v44 = vsel %vm3959_vm9, %v3951_v23, 0.0  ;;  %v5792_v52 = vpack.c.bf16 %v3951_v23, %v3951_v23  ;;  %v4035_v23 = vld [vmem:[#allocation6 + $0x218] sm:$0xff]  ;;  %v5732_v2 = vcombine.high %v4034_v29, %v4038_v22 }
 0x489   : > { %5662 = vst [vmem:[%s6475_s29 + $0x8] sm:$0xff] %v3960_v44  ;;  %v5734_v28 = vcombine.high %v4035_v23, %v4039_v4  ;;  %v4042_v44 = vld [vmem:[#allocation6 + $0x250] sm:$0xff]  ;;  %v5733_v35 = vcombine.low %v4035_v23, %v4039_v4 }
 0x48a   : > { %5793 = vmatprep.mubr.msk.bf16.mxu0 %vm7315_vm10, %v5792_v52  ;;  %5796 = vmatprep.mubr.msk.bf16.mxu1 %vm7315_vm10, %v5792_v52 }
 0x48b   : > { %4769 = vmatmul.mubr.bf16.vlgmr.msra.gmra.mrb[40].mxu0 %v7322_v7  ;;  %4810 = vmatmul.mubr.bf16.vlgmr.msra.gmra.mrb[40].mxu1 %v7322_v7 }
 0x48c   : > { %4819 = vmatpush1.bf16.msra.mxu0 %v5667_v13  ;;  %4860 = vmatpush1.bf16.msra.mxu1 %v5669_v21  ;;  %v5692_v13 = vcombine.high %v3994_v37, %v3998_v30  ;;  %v5694_v21 = vcombine.high %v3995_v53, %v3999_v48 }
 0x48d   : > { %5799 = vmatprep.mubr.msk.bf16.mxu0 %vm7315_vm10, %v5792_v52  ;;  %5802 = vmatprep.mubr.msk.bf16.mxu1 %vm7315_vm10, %v5792_v52  ;;  %v4046_v52 = vld [vmem:[#allocation6 + $0x270] sm:$0xff] }
 0x48e   : > { %4820 = vmatprep.subr.bf16.mxu0 %v5676_v3  ;;  %4861 = vmatprep.subr.bf16.mxu1 %v5678_v39  ;;  %v4047_v3 = vld [vmem:[#allocation6 + $0x278] sm:$0xff]  ;;  %v5731_v39 = vcombine.low %v4034_v29, %v4038_v22  ;;  %v5740_v63 = vcombine.high %v4042_v44, %v4046_v52  ;;  %v5739_v37 = vcombine.low %v4042_v44, %v4046_v52  ;;  %v7793_v44 = vld [vmem:[#allocation33_spill] sm:$0xff] }
 0x48f   : > { %v5742_v42 = vcombine.high %v4043_v43, %v4047_v3  ;;  %v5741_v30 = vcombine.low %v4043_v43, %v4047_v3  ;;  %v7794_v43 = vld [vmem:[#allocation34_spill] sm:$0xff] }
 0x490   : > { %4821 = vmatpush1.bf16.msra.mxu0 %v5675_v15  ;;  %4862 = vmatpush1.bf16.msra.mxu1 %v5677_v18  ;;  %v4050_v15 = vld [vmem:[#allocation6 + $0x290] sm:$0xff] }
 0x491   : > { %4822 = vmatprep.subr.bf16.mxu0 %v5684_v24  ;;  %4863 = vmatprep.subr.bf16.mxu1 %v5686_v59  ;;  %v4054_v18 = vld [vmem:[#allocation6 + $0x2b0] sm:$0xff]  ;;  %v4051_v24 = vld [vmem:[#allocation6 + $0x298] sm:$0xff] }
 0x492   : > { %v4055_v59 = vld [vmem:[#allocation6 + $0x2b8] sm:$0xff]  ;;  %v5748_v53 = vcombine.high %v4050_v15, %v4054_v18  ;;  %v5747_v40 = vcombine.low %v4050_v15, %v4054_v18 }
 0x493   : > { %v5750_v48 = vcombine.high %v4051_v24, %v4055_v59  ;;  %v5749_v41 = vcombine.low %v4051_v24, %v4055_v59  ;;  %v7796_v15 = vld [vmem:[#allocation36_spill] sm:$0xff] }
 0x494   : > { %4823 = vmatpush1.bf16.msra.mxu0 %v5683_v50  ;;  %4864 = vmatpush1.bf16.msra.mxu1 %v5685_v16  ;;  %v4058_v50 = vld [vmem:[#allocation6 + $0x2d0] sm:$0xff] }
 0x495   : > { %4824 = vmatprep.subr.bf16.mxu0 %v5692_v13  ;;  %4865 = vmatprep.subr.bf16.mxu1 %v5694_v21  ;;  %v4062_v16 = vld [vmem:[#allocation6 + $0x2f0] sm:$0xff]  ;;  %v4059_v13 = vld [vmem:[#allocation6 + $0x2d8] sm:$0xff] }
 0x496   : > { %v4063_v21 = vld [vmem:[#allocation6 + $0x2f8] sm:$0xff]  ;;  %v5756_v45 = vcombine.high %v4058_v50, %v4062_v16  ;;  %v5755_v57 = vcombine.low %v4058_v50, %v4062_v16 }
 0x497   : > { %v5758_v46 = vcombine.high %v4059_v13, %v4063_v21  ;;  %v5757_v58 = vcombine.low %v4059_v13, %v4063_v21 }
 0x498   : > { %4825 = vmatpush1.bf16.msra.mxu0 %v5691_v47  ;;  %4866 = vmatpush1.bf16.msra.mxu1 %v5693_v51  ;;  %v4066_v47 = vld [vmem:[#allocation6 + $0x310] sm:$0xff] }
 0x499   : > { %4826 = vmatprep.subr.bf16.mxu0 %v5700_v55  ;;  %4867 = vmatprep.subr.bf16.mxu1 %v5702_v56  ;;  %v4070_v51 = vld [vmem:[#allocation6 + $0x330] sm:$0xff]  ;;  %v4067_v55 = vld [vmem:[#allocation6 + $0x318] sm:$0xff] }
 0x49a   : > { %v4071_v56 = vld [vmem:[#allocation6 + $0x338] sm:$0xff]  ;;  %v5764_v1 = vcombine.high %v4066_v47, %v4070_v51  ;;  %v5763_v17 = vcombine.low %v4066_v47, %v4070_v51 }
 0x49b   : > { %v5766_v8 = vcombine.high %v4067_v55, %v4071_v56  ;;  %v5765_v11 = vcombine.low %v4067_v55, %v4071_v56 }
 0x49c   : > { %4827 = vmatpush1.bf16.msra.mxu0 %v5699_v62  ;;  %4868 = vmatpush1.bf16.msra.mxu1 %v5701_v10  ;;  %v4074_v62 = vld [vmem:[#allocation6 + $0x350] sm:$0xff] }
 0x49d   : > { %4828 = vmatprep.subr.bf16.mxu0 %v5708_v12  ;;  %4869 = vmatprep.subr.bf16.mxu1 %v5710_v14  ;;  %v4078_v10 = vld [vmem:[#allocation6 + $0x370] sm:$0xff]  ;;  %v4075_v12 = vld [vmem:[#allocation6 + $0x358] sm:$0xff] }
 0x49e   : > { %v4079_v14 = vld [vmem:[#allocation6 + $0x378] sm:$0xff]  ;;  %v5772_v31 = vcombine.high %v4074_v62, %v4078_v10  ;;  %v5771_v9 = vcombine.low %v4074_v62, %v4078_v10 }
 0x49f   : > { %v5774_v38 = vcombine.high %v4075_v12, %v4079_v14  ;;  %v5773_v5 = vcombine.low %v4075_v12, %v4079_v14 }
 0x4a0   : > { %4829 = vmatpush1.bf16.msra.mxu0 %v5707_v20  ;;  %4870 = vmatpush1.bf16.msra.mxu1 %v5709_v60  ;;  %v4082_v20 = vld [vmem:[#allocation6 + $0x390] sm:$0xff] }
 0x4a1   : > { %4830 = vmatprep.subr.bf16.mxu0 %v5716_v19  ;;  %4871 = vmatprep.subr.bf16.mxu1 %v5718_v26  ;;  %v4086_v60 = vld [vmem:[#allocation6 + $0x3b0] sm:$0xff]  ;;  %v4083_v19 = vld [vmem:[#allocation6 + $0x398] sm:$0xff] }
 0x4a2   : > { %v4087_v26 = vld [vmem:[#allocation6 + $0x3b8] sm:$0xff]  ;;  %v5780_v25 = vcombine.high %v4082_v20, %v4086_v60  ;;  %v5779_v29 = vcombine.low %v4082_v20, %v4086_v60 }
 0x4a3   : > { %v5782_v36 = vcombine.high %v4083_v19, %v4087_v26  ;;  %v5781_v22 = vcombine.low %v4083_v19, %v4087_v26 }
 0x4a4   : > { %4831 = vmatpush1.bf16.msra.mxu0 %v5715_v33  ;;  %4872 = vmatpush1.bf16.msra.mxu1 %v5717_v0  ;;  %v4090_v33 = vld [vmem:[#allocation6 + $0x3d0] sm:$0xff] }
 0x4a5   : > { %4832 = vmatprep.subr.bf16.mxu0 %v5724_v27  ;;  %4873 = vmatprep.subr.bf16.mxu1 %v5726_v49  ;;  %v4094_v0 = vld [vmem:[#allocation6 + $0x3f0] sm:$0xff]  ;;  %v4091_v27 = vld [vmem:[#allocation6 + $0x3d8] sm:$0xff] }
 0x4a6   : > { %v4095_v49 = vld [vmem:[#allocation6 + $0x3f8] sm:$0xff]  ;;  %v5788_v23 = vcombine.high %v4090_v33, %v4094_v0 }
 0x4a7   : > { %v5790_v4 = vcombine.high %v4091_v27, %v4095_v49 }
 0x4a8   : > { %4833 = vmatpush1.bf16.msra.mxu0 %v5723_v6  ;;  %4874 = vmatpush1.bf16.msra.mxu1 %v5725_v32  ;;  %v5787_v6 = vcombine.low %v4090_v33, %v4094_v0  ;;  %v5789_v32 = vcombine.low %v4091_v27, %v4095_v49 }
 0x4a9   : > { %4834 = vmatprep.subr.bf16.mxu0 %v5732_v2  ;;  %4875 = vmatprep.subr.bf16.mxu1 %v5734_v28 }
 0x4ac   : > { %4835 = vmatpush1.bf16.msra.mxu0 %v5731_v39  ;;  %4876 = vmatpush1.bf16.msra.mxu1 %v5733_v35 }
 0x4ad   : > { %4836 = vmatprep.subr.bf16.mxu0 %v5740_v63  ;;  %4877 = vmatprep.subr.bf16.mxu1 %v5742_v42  ;;  %v7795_v63 = vld [vmem:[#allocation35_spill] sm:$0xff] }
 0x4b0   : > { %4837 = vmatpush1.bf16.msra.mxu0 %v5739_v37  ;;  %4878 = vmatpush1.bf16.msra.mxu1 %v5741_v30 }
 0x4b1   : > { %4838 = vmatprep.subr.bf16.mxu0 %v5748_v53  ;;  %4879 = vmatprep.subr.bf16.mxu1 %v5750_v48 }
 0x4b4   : > { %4839 = vmatpush1.bf16.msra.mxu0 %v5747_v40  ;;  %4880 = vmatpush1.bf16.msra.mxu1 %v5749_v41 }
 0x4b5   : > { %4840 = vmatprep.subr.bf16.mxu0 %v5756_v45  ;;  %4881 = vmatprep.subr.bf16.mxu1 %v5758_v46 }
 0x4b8   : > { %4841 = vmatpush1.bf16.msra.mxu0 %v5755_v57  ;;  %4882 = vmatpush1.bf16.msra.mxu1 %v5757_v58 }
 0x4b9   : > { %4842 = vmatprep.subr.bf16.mxu0 %v5764_v1  ;;  %4883 = vmatprep.subr.bf16.mxu1 %v5766_v8 }
 0x4bc   : > { %4843 = vmatpush1.bf16.msra.mxu0 %v5763_v17  ;;  %4884 = vmatpush1.bf16.msra.mxu1 %v5765_v11 }
 0x4bd   : > { %4844 = vmatprep.subr.bf16.mxu0 %v5772_v31  ;;  %4885 = vmatprep.subr.bf16.mxu1 %v5774_v38 }
 0x4c0   : > { %4845 = vmatpush1.bf16.msra.mxu0 %v5771_v9  ;;  %4886 = vmatpush1.bf16.msra.mxu1 %v5773_v5 }
 0x4c1   : > { %4846 = vmatprep.subr.bf16.mxu0 %v5780_v25  ;;  %4887 = vmatprep.subr.bf16.mxu1 %v5782_v36 }
 0x4c4   : > { %4847 = vmatpush1.bf16.msra.mxu0 %v5779_v29  ;;  %4888 = vmatpush1.bf16.msra.mxu1 %v5781_v22 }
 0x4c5   : > { %4848 = vmatprep.subr.bf16.mxu0 %v5788_v23  ;;  %4889 = vmatprep.subr.bf16.mxu1 %v5790_v4 }
 0x4c8   : > { %4849 = vmatpush1.bf16.msra.mxu0 %v5787_v6  ;;  %4890 = vmatpush1.bf16.msra.mxu1 %v5789_v32 }
 0x4cb   : > { %4851 = vmatmul.mubr.bf16.vlgmr.msra.gmra.mrb[44].mxu0 %v7322_v7  ;;  %4892 = vmatmul.mubr.bf16.vlgmr.msra.gmra.mrb[44].mxu1 %v7322_v7 }
 0x55e   : > { %v4770_v2 = vpop.f32.mrb[40].mxu0  ;;  %v4811_v28 = vpop.f32.mrb[40].mxu1 }
 0x55f   : > { %v4906_v52 = vadd.f32 %v4770_v2, %v7793_v44  ;;  %v4908_v3 = vadd.f32 %v4811_v28, %v7794_v43  ;;  %v4772_v39 = vpop.f32.mrb[41].mxu0  ;;  %v4813_v35 = vpop.f32.mrb[41].mxu1 }
 0x560   : > { %v4907_v42 = vadd.f32 %v4772_v39, %v7795_v63  ;;  %v4909_v18 = vadd.f32 %v4813_v35, %v7796_v15  ;;  %v4774_v24 = vpop.f32.mrb[42].mxu0  ;;  %v4815_v59 = vpop.f32.mrb[42].mxu1 }
 0x561   : > { %v5803_v37 = vmul.f32 -1.442695, %v4906_v52  ;;  %v4775_v30 = vpop.f32.mrb[43].mxu0  ;;  %v4816_v53 = vpop.f32.mrb[43].mxu1 }
 0x562   : > { %v5804_v48 = vmul.f32 -1.442695, %v4907_v42  ;;  %v5805_v7 = vmul.f32 -1.442695, %v4909_v18 }
 0x563   : > { %6047 = vpow2.f32 %v5803_v37 }
 0x564   : > { %6049 = vpow2.f32 %v5804_v48 }
 0x565   : > { %6051 = vpow2.f32 %v5805_v7 }
 0x566   : > { %6053 = vtanh.f32 %v4908_v3 }
 0x56d   : > { %v6048_v50 = vpop.eup %6047 }
 0x56e   : > { %v6050_v16 = vpop.eup %6049  ;;  %v4923_v13 = vadd.f32 1.0, %v6048_v50 }
 0x56f   : > { %v4929_v21 = vadd.f32 1.0, %v6050_v16  ;;  %v6052_v40 = vpop.eup %6051 }
 0x570   : > { %6055 = vrcp.f32 %v4923_v13  ;;  %v6054_v41 = vpop.eup %6053  ;;  %v4936_v51 = vadd.f32 1.0, %v6052_v40 }
 0x571   : > { %6057 = vrcp.f32 %v4929_v21 }
 0x572   : > { %6059 = vrcp.f32 %v4936_v51 }
 0x57a   : > { %v6056_v45 = vpop.eup %6055 }
 0x57b   : > { %v6058_v46 = vpop.eup %6057  ;;  %v4940_v47 = vmul.f32 %v6056_v45, %v6054_v41 }
 0x57c   : > { %v4939_v55 = vmul.f32 %v6058_v46, %v7295_v34  ;;  %v6060_v57 = vpop.eup %6059 }
 0x57e   : > { %v4941_v56 = vadd.f32 %v4940_v47, %v4939_v55 }
 0x580   : > { %6061 = vtanh.f32 %v4941_v56  ;;  %4982 = vst [vmem:[#allocation5] sm:$0xff] %v4941_v56 }
 0x58a   : > { %v6062_v58 = vpop.eup %6061 }
 0x58b   : > { %v4943_v34 = vmul.f32 %v6062_v58, %v6060_v57 }
 0x58d   : > { %5809 = vst [vmem:[%s6473_s27 + $0x18] sm:$0xff] %v4943_v34  ;;  %4980 = vst [vmem:[#allocation4] sm:$0xff] %v4943_v34 }
 0x58e   : > { %6120 = shalt.err (!%p6117_p0)
}
 0x58f   : > { %s6121_s27 = scalar_lea.hbm %s7352_s11, 512  ;;  %s6125_s21 = scalar_lea.hbm %s7475_s8, 1024 }
 0x590   : > { %p6122_p2 = scmp.ne.s32.totalorder %s7352_s11, %s6121_s27  ;;  %p6126_p4 = scmp.lt.u32.totalorder %s7352_s11, %s7475_s8 }
 0x591   : > { %p6127_p7 = scmp.lt.u32.totalorder %s6125_s21, %s6121_s27  ;;  %p6129_p13 = scmp.lt.u32.totalorder %s6121_s27, %s7352_s11 }
 0x592   : > { %p6123_p6 = pnand %p6122_p2, %p7798_p1 }
 0x593   : > { %p6128_p11 = por %p6127_p7, %p6126_p4 }
 0x594   : > { %p6124_p9 = pneg %p6123_p6 }
 0x595   : > { %p6130_p3 = por %p6129_p13, %p6128_p11 }
 0x597   : > { %p6131_p5 = pnand %p6130_p3, %p6124_p9 }
 0x599   : > { %6134 = shalt.err (!%p6131_p5)
}
 0x59a   : > { %s6253_s18 = smov 128   ;;  %s6254_s5 = smov 8   ;;  %v7799_v62 = vld [vmem:[#allocation37_spill] sm:$0xff]  ;;  %v7800_v12 = vld [vmem:[#allocation38_spill] sm:$0xff]  ;;  %v7801_v31 = vld [vmem:[#allocation39_spill] sm:$0xff]  ;;  %v3961_v32 = vsel %vm3959_vm9, %v7306_v61, 0.0  ;;  %v4973_v44 = vpop.permute.xlu1 %4972 }
 0x59b   : > { %5824 = dma.vmem_to_hbm [thread:$0]  (%p7798_p1), %s7354_s20, 512, %s7352_s11, %s7359_s16, %s6253_s18, %s6253_s18, %s6254_s5   ;;  %v7802_v20 = vld [vmem:[#allocation40_spill] sm:$0xff]  ;;  %vm4974_vm11 = vcmp.eq.s32.totalorder %v4973_v44, 1 }
 0x59c   : > { %s7803_s23 = ssub.s32 1, %s6237_s15  ;;  %s5022_s11 = sshll.u32 %s6475_s29, 4  ;;  %s7401_s11 = int_to_ptr.vmem [resolvable:$true] %s5022_s11 }
 0x59d   : > { %s5819_s20 = sshll.u32 %s7803_s23, 9  ;;  %s7804_s25 = sld [smem:[#allocation126_spill]] }
 0x59e   : > { %v4852_v1 = vpop.f32.mrb[44].mxu0  ;;  %v4893_v8 = vpop.f32.mrb[44].mxu1  ;;  %s7805_s9 = sand.u32 1, %s6217_s10   ;;  %s6135_s15 = scalar_lea.vmem %s7401_s11, 512 }
 0x59f   : > { %v4916_v10 = vadd.f32 %v4852_v1, %v7799_v62  ;;  %v4918_v14 = vadd.f32 %v4893_v8, %v7800_v12  ;;  %v4854_v17 = vpop.f32.mrb[45].mxu0  ;;  %v4895_v11 = vpop.f32.mrb[45].mxu1  ;;  %s7406_s22 = scalar_lea.sflag [#allocation11], %s7805_s9  ;;  %p6136_p1 = scmp.ne.s32.totalorder %s7401_s11, %s6135_s15 }
 0x5a0   : > { %v4917_v38 = vadd.f32 %v4854_v17, %v7801_v31  ;;  %v4919_v60 = vadd.f32 %v4895_v11, %v7802_v20  ;;  %v4856_v19 = vpop.f32.mrb[46].mxu0  ;;  %v4897_v26 = vpop.f32.mrb[46].mxu1  ;;  %p7806_p8 = scmp.ne.s32.totalorder %s7586_s19, 0  ;;  %s6255_s27 = smov [#allocation10]  }
 0x5a1   : > { %v5806_v9 = vmul.f32 -1.442695, %v4916_v10  ;;  %v4857_v5 = vpop.f32.mrb[47].mxu0  ;;  %v4898_v25 = vpop.f32.mrb[47].mxu1  ;;  %s6139_s24 = sshll.u32 %s6255_s27, 4  ;;  %s6140_s24 = int_to_ptr.vmem [resolvable:$false] %s6139_s24 }
 0x5a2   : > { %v5807_v36 = vmul.f32 -1.442695, %v4917_v38  ;;  %v5808_v33 = vmul.f32 -1.442695, %v4919_v60  ;;  %p6137_p10 = pnand %p6136_p1, %p7806_p8  ;;  %s6141_s28 = scalar_lea.vmem %s6140_s24, 1024 }
 0x5a3   : > { %6063 = vpow2.f32 %v5806_v9  ;;  %s7399_s26 = scalar_lea.hbm %s7804_s25, %s5819_s20  ;;  %p6142_p0 = scmp.lt.s32.totalorder %s7401_s11, %s6140_s24 }
 0x5a4   : > { %6065 = vpow2.f32 %v5807_v36  ;;  %p6138_p12 = pneg %p6137_p10  ;;  %p6143_p2 = scmp.lt.s32.totalorder %s6141_s28, %s6135_s15 }
 0x5a5   : > { %6067 = vpow2.f32 %v5808_v33 }
 0x5a6   : > { %6069 = vtanh.f32 %v4918_v14  ;;  %p6144_p6 = por %p6143_p2, %p6142_p0 }
 0x5a8   : > { %p6145_p9 = pnand %p6144_p6, %p6138_p12 }
 0x5ad   : > { %v6064_v0 = vpop.eup %6063 }
 0x5ae   : > { %v6066_v27 = vpop.eup %6065  ;;  %v4947_v49 = vadd.f32 1.0, %v6064_v0 }
 0x5af   : > { %v4953_v29 = vadd.f32 1.0, %v6066_v27  ;;  %v6068_v22 = vpop.eup %6067 }
 0x5b0   : > { %6071 = vrcp.f32 %v4947_v49  ;;  %v6070_v23 = vpop.eup %6069  ;;  %v4960_v28 = vadd.f32 1.0, %v6068_v22 }
 0x5b1   : > { %6073 = vrcp.f32 %v4953_v29 }
 0x5b2   : > { %6075 = vrcp.f32 %v4960_v28 }
 0x5ba   : > { %v6072_v4 = vpop.eup %6071 }
 0x5bb   : > { %v6074_v6 = vpop.eup %6073  ;;  %v4964_v2 = vmul.f32 %v6072_v4, %v6070_v23 }
 0x5bc   : > { %v4963_v52 = vmul.f32 %v6074_v6, %v3961_v32  ;;  %v6076_v39 = vpop.eup %6075 }
 0x5be   : > { %v4965_v43 = vadd.f32 %v4964_v2, %v4963_v52 }
 0x5c0   : > { %6077 = vtanh.f32 %v4965_v43  ;;  %v4976_v3 = vsel %vm4974_vm11, %v4965_v43, 0.0 }
 0x5c1   : > { %4983 = vst [vmem:[#allocation5 + $0x8] sm:$0xff] %v4976_v3 }
 0x5ca   : > { %v6078_v35 = vpop.eup %6077 }
 0x5cb   : > { %v4967_v54 = vmul.f32 %v6078_v35, %v6076_v39 }
 0x5cd   : > { %v4975_v61 = vsel %vm4974_vm11, %v4967_v54, 0.0 }
 0x5ce   : > { %4979 = vst [vmem:[%s6475_s29] sm:$0xff] %v4975_v61  ;;  %4981 = vst [vmem:[#allocation4 + $0x8] sm:$0xff] %v4975_v61 }
 0x5cf   : > { %6148 = shalt.err (!%p6145_p9)
}
 0x5d0   : > { %s6149_s29 = scalar_lea.hbm %s7399_s26, 512  ;;  %s6153_s14 = scalar_lea.hbm %s7804_s25, 1024 }
 0x5d1   : > { %p6150_p4 = scmp.ne.s32.totalorder %s7399_s26, %s6149_s29  ;;  %p6154_p13 = scmp.lt.u32.totalorder %s7399_s26, %s7804_s25 }
 0x5d2   : > { %p6155_p3 = scmp.lt.u32.totalorder %s6153_s14, %s6149_s29  ;;  %p6157_p1 = scmp.lt.u32.totalorder %s6149_s29, %s7399_s26 }
 0x5d3   : > { %p6151_p7 = pnand %p6150_p4, %p7806_p8 }
 0x5d4   : > { %p6156_p5 = por %p6155_p3, %p6154_p13 }
 0x5d5   : > { %p6152_p11 = pneg %p6151_p7 }
 0x5d6   : > { %p6158_p10 = por %p6157_p1, %p6156_p5 }
 0x5d8   : > { %p6159_p12 = pnand %p6158_p10, %p6152_p11 }
 0x5da   : > { %6162 = shalt.err (!%p6159_p12)
}
 0x5db   : > { %5825 = dma.vmem_to_hbm [thread:$0]  (%p7806_p8), %s7401_s11, 512, %s7399_s26, %s7406_s22, %s6253_s18, %s6253_s18, %s6254_s5  }
 0x5dc PF: > { %s7807_s30 = sld [smem:[#allocation17_spill]]  ;;  %s7808_s16 = sld [smem:[#allocation21_spill]] }
 0x5dd   : > { %p5841_p0 = scmp.ge.s32.totalorder %s6245_s17, 2 }
 0x5e2   : > { %s5037_s9 = sand.u32 1, %s7807_s30   ;;  %p7809_p2 = scmp.ne.s32.totalorder %s7808_s16, 0 }
 0x5e3   : > { %s5038_s15 = scalar_lea.sflag [#allocation8], %s5037_s9 }
 0x5e4   : > { %p5833_p6 = pnand %p5841_p0, %p7809_p2 }
 0x5e6   : > { %6204 = dma.done.wait (!%p5833_p6), %s5038_s15, 512  }
 0x5e7   : > { %6206 = vsyncadd (!%p5833_p6), %s5038_s15, 4294966784  ;;  %s7810_s27 = sld [smem:[#allocation15_spill]]  ;;  %s7811_s19 = sld [smem:[#allocation24_spill]] }
 0x5ed   : > { %s5046_s24 = sand.u32 1, %s7810_s27   ;;  %p7812_p9 = scmp.ne.s32.totalorder %s7811_s19, 0 }
 0x5ee   : > { %s5047_s28 = scalar_lea.sflag [#allocation11], %s5046_s24 }
 0x5ef   : > { %p5836_p4 = pnand %p5841_p0, %p7812_p9 }
 0x5f1   : > { %6208 = dma.done.wait (!%p5836_p4), %s5047_s28, 512  }
 0x5f2   : > { %6210 = vsyncadd (!%p5836_p4), %s5047_s28, 4294966784  ;;  %s27_s17 = sadd.s32 1, %s6245_s17   ;;  %s7813_s18 = sld [smem:[#allocation16_spill]] }
 0x5f3   : > { %p24_p8 = scmp.ge.s32.totalorder %s27_s17, 4   ;;  %s7814_s11 = sld [smem:[#allocation23_spill]] }
 0x5f4   : > { %s7815_s5 = sld [smem:[#allocation18_spill]]  ;;  %s7816_s14 = sld [smem:[#allocation22_spill]] }
 0x5f5   : > { %s7817_s15 = sld [smem:[#allocation19_spill]]  ;;  %s7818_s16 = sld [smem:[#allocation20_spill]] }
 0x5f6   : > { %s7819_s30 = smov %s6217_s10  ;;  %s7821_s12 = smov %s6229_s13 }
 0x5f7   :  { %26 = sbr.rel (!%p24_p8) target bundleno = 12 (0xc), region = 136 }
 0x5f8   : > { %s7820_s10 = smov %s7813_s18 }
 0x5fa   : > { %s7822_s13 = smov %s7815_s5 }
 0x5fe   :  { %5052 = vsyncpa [#allocation7], 1 }
 0x5ff   :  { %5054 = vsyncpa [#allocation7 + $0x1], 1 }
 0x600   :  { %5055 = vsyncpa [#allocation8], 1 }
 0x601   :  { %5057 = vsyncpa [#allocation8 + $0x1], 1 }
 0x602   :  { %5058 = vsyncpa [#allocation11], 1 }
 0x603   :  { %5060 = vsyncpa [#allocation11 + $0x1], 1 }

</bundles_post_ra>
